<compile_context>
chip_gen: v6e
topology: v6e:2x2x1
jax: 0.10.0
libtpu: 0.0.40
codegen_flags: <defaults>
</compile_context>

<pallas_src>
import jax
import jax.numpy as jnp
from jax.experimental import pallas as pl
from jax.experimental.pallas import tpu as pltpu


# ----------------------------- Pallas kernel --------------------------------

def _make_conv_kernel(n_in, has_res, offsets, s_out):
    """Fused 3x3 conv (9 shifted flat dots) + folded BN + ReLU (+ residual).

    Ref order: x_flat[0..n_in), w_tap[0..n_in), bias, (residual,) out.
      x_flat_i : (1, Cin_i, S_in)   zero-padded, flattened image (bf16)
      w_tap_i  : (9, Cout, Cin_i)   BN-folded weights per tap (bf16)
      bias     : (Cout, 1)          BN-folded bias (f32)
      residual : (1, Cout, S_out)   optional, added after the ReLU (bf16)
      out      : (1, Cout, S_out)   bf16, spatial (H*Wp) on lanes
    """

    def kernel(*refs):
        x_refs = refs[:n_in]
        w_refs = refs[n_in:2 * n_in]
        b_ref = refs[2 * n_in]
        r_ref = refs[2 * n_in + 1] if has_res else None
        o_ref = refs[-1]

        cout = o_ref.shape[1]
        acc = jnp.zeros((cout, s_out), jnp.float32)
        # 9 (or 18, for fused concat) accumulated MXU dots over contiguous
        # flat-offset windows of the padded image -- no im2col materialisation.
        for x_ref, w_ref in zip(x_refs, w_refs):
            for t, off in enumerate(offsets):
                acc = acc + jnp.dot(w_ref[t], x_ref[0, :, off:off + s_out],
                                    preferred_element_type=jnp.float32)
        y = jnp.maximum(acc + b_ref[...], 0.0)            # folded BN + ReLU
        if has_res:
            y = y + r_ref[0].astype(jnp.float32)          # hx1d + hxin fusion
        o_ref[0] = y.astype(o_ref.dtype)

    return kernel


# ----------------------------- conv wrapper ----------------------------------

def conv_bn_relu(xs, p, dil, residual_flat=None):
    """Fused ConvBnRelu on the (virtual) channel-concat of `xs`.

    xs: list of (N, Ci, H, W) activations (same N/H/W; concat is fused by
        passing each tensor + its weight slice separately -> split-Cin dots).
    Returns (out (N, Cout, H, W) bf16, out_flat (N, Cout, H*Wp) bf16).
    """
    N, _, H, W = xs[0].shape
    d = dil
    Hp, Wp = H + 2 * d, W + 2 * d
    s_in = (Hp + 1) * Wp        # one extra zero row so shifted reads stay in-bounds
    s_out = H * Wp              # "padded-width" flat output; cols >= W are garbage

    # BatchNorm (eval mode) folded into the conv weight / bias.
    scale = p["gamma"] * jax.lax.rsqrt(p["var"] + 1e-5)
    bias = ((p["conv_b"] - p["mean"]) * scale + p["beta"]).astype(jnp.float32)
    w = p["w"] * scale                                    # (3, 3, Cin_tot, Cout)
    cout = w.shape[-1]
    w_taps = jnp.transpose(w, (0, 1, 3, 2)).reshape(9, cout, -1)
    w_taps = w_taps.astype(jnp.bfloat16)                  # (9, Cout, Cin_tot)

    # flat offset of tap (ky, kx) inside the padded, flattened image
    offsets = tuple(ky * d * Wp + kx * d for ky in range(3) for kx in range(3))

    args, in_specs = [], []
    for x in xs:                                          # padded-flat activations
        c = x.shape[1]
        xp = jnp.pad(x.astype(jnp.bfloat16),
                     ((0, 0), (0, 0), (d, d + 1), (d, d))).reshape(N, c, s_in)
        args.append(xp)
        in_specs.append(pl.BlockSpec((1, c, s_in), lambda n: (n, 0, 0)))
    c0 = 0
    for x in xs:                                          # matching weight slices
        c = x.shape[1]
        args.append(w_taps[:, :, c0:c0 + c])
        in_specs.append(pl.BlockSpec((9, cout, c), lambda n: (0, 0, 0)))
        c0 += c
    args.append(bias.reshape(cout, 1))
    in_specs.append(pl.BlockSpec((cout, 1), lambda n: (0, 0)))
    if residual_flat is not None:
        args.append(residual_flat)
        in_specs.append(pl.BlockSpec((1, cout, s_out), lambda n: (n, 0, 0)))

    kernel = _make_conv_kernel(len(xs), residual_flat is not None, offsets, s_out)
    out_flat = pl.pallas_call(
        kernel,
        out_shape=jax.ShapeDtypeStruct((N, cout, s_out), jnp.bfloat16),
        grid=(N,),
        in_specs=in_specs,
        out_specs=pl.BlockSpec((1, cout, s_out), lambda n: (n, 0, 0)),
        compiler_params=pltpu.CompilerParams(
            dimension_semantics=("parallel",)),
    )(*args)

    out = out_flat.reshape(N, cout, H, Wp)[:, :, :, :W]   # drop garbage columns
    return out, out_flat


# ------------------------------- JAX glue ------------------------------------

def _maxpool_2x2_ceil(x):
    """nn.MaxPool2d(2, stride=2, ceil_mode=True) on NCHW.

    Single fused reshape+reduce XLA pass (reads x once, writes 1/4 of it);
    TODO(synk): fuse into the preceding conv kernel's epilogue.
    """
    N, C, H, W = x.shape
    Ho, Wo = -(-H // 2), -(-W // 2)
    ph, pw = 2 * Ho - H, 2 * Wo - W
    if ph or pw:
        x = jnp.pad(x, ((0, 0), (0, 0), (0, ph), (0, pw)),
                    constant_values=-jnp.inf)
    return jnp.max(x.reshape(N, C, Ho, 2, Wo, 2), axis=(3, 5))


def _interp_matrix(out_size, in_size):
    """Bilinear weights, F.interpolate(align_corners=False) semantics."""
    scale = in_size / out_size
    src = jnp.maximum(
        (jnp.arange(out_size, dtype=jnp.float32) + 0.5) * scale - 0.5, 0.0)
    i0 = jnp.minimum(jnp.floor(src).astype(jnp.int32), in_size - 1)
    i1 = jnp.minimum(i0 + 1, in_size - 1)
    lam = src - i0.astype(jnp.float32)
    return (jax.nn.one_hot(i0, in_size, dtype=jnp.float32) * (1.0 - lam)[:, None]
            + jax.nn.one_hot(i1, in_size, dtype=jnp.float32) * lam[:, None])


def _upsample_like(src, out_h, out_w):
    """F.interpolate(mode='bilinear', align_corners=False) as two small
    interpolation-matrix matmuls (gather-free, MXU-friendly).  NCHW."""
    _, _, H, W = src.shape
    ah = _interp_matrix(out_h, H)                         # (out_h, H)
    aw = _interp_matrix(out_w, W)                         # (out_w, W)
    x = src.astype(jnp.float32)
    x = jnp.einsum("ih,nchw->nciw", ah, x)
    x = jnp.einsum("jw,nciw->ncij", aw, x)
    return x


# ------------------------------- RSU3 model ----------------------------------

def init_params(key, in_ch=3, mid_ch=12, out_ch=3):
    def conv_block(k, cin, cout):
        k1, k2, k3, k4, k5, k6 = jax.random.split(k, 6)
        return dict(
            w=0.1 * jax.random.normal(k1, (3, 3, cin, cout), jnp.float32),
            conv_b=0.1 * jax.random.normal(k2, (cout,), jnp.float32),
            gamma=1.0 + 0.1 * jax.random.normal(k3, (cout,), jnp.float32),
            beta=0.1 * jax.random.normal(k4, (cout,), jnp.float32),
            mean=0.1 * jax.random.normal(k5, (cout,), jnp.float32),
            var=1.0 + 0.1 * jnp.abs(jax.random.normal(k6, (cout,), jnp.float32)),
        )

    ks = jax.random.split(key, 6)
    return {
        "in":  conv_block(ks[0], in_ch, out_ch),
        "c1":  conv_block(ks[1], out_ch, mid_ch),
        "c2":  conv_block(ks[2], mid_ch, mid_ch),
        "c3":  conv_block(ks[3], mid_ch, mid_ch),
        "c2d": conv_block(ks[4], 2 * mid_ch, mid_ch),
        "c1d": conv_block(ks[5], 2 * mid_ch, out_ch),
    }


def rsu3_forward(x, params):
    """RSU3 (encoder=True) forward.  x: (N, in_ch, H, W) f32; NCHW in / out."""
    hxin, hxin_flat = conv_bn_relu([x], params["in"], dil=1)
    hx1, _ = conv_bn_relu([hxin], params["c1"], dil=1)
    hx = _maxpool_2x2_ceil(hx1)
    hx2, _ = conv_bn_relu([hx], params["c2"], dil=1)
    hx3, _ = conv_bn_relu([hx2], params["c3"], dil=2)
    hx2d, _ = conv_bn_relu([hx3, hx2], params["c2d"], dil=1)      # fused concat
    hx2dup = _upsample_like(hx2d, hx1.shape[2], hx1.shape[3])
    # last block fuses the concat AND the residual add (hx1d + hxin)
    out, _ = conv_bn_relu([hx2dup, hx1], params["c1d"], dil=1,
                          residual_flat=hxin_flat)
    return out.astype(jnp.float32)


if __name__ == "__main__":
    key = jax.random.PRNGKey(0)
    k_param, k_x = jax.random.split(key)
    params = init_params(k_param, in_ch=3, mid_ch=12, out_ch=3)
    x = jax.random.normal(k_x, (2, 3, 16, 16), jnp.float32)       # NCHW input

    fwd = jax.jit(rsu3_forward)
    y = jax.block_until_ready(fwd(x, params))

    assert y.shape == (2, 3, 16, 16), y.shape
    assert bool(jnp.all(jnp.isfinite(y)))
    print("KERNEL_OK")
</pallas_src>

<mosaic_0001>
module attributes {stable_mosaic.version = 11 : i64} {
  func.func @kernel(%arg0: i32, %arg1: memref<1x3x342xbf16, #tpu.memory_space<vmem>>, %arg2: memref<9x3x3xbf16, #tpu.memory_space<vmem>>, %arg3: memref<3x1xf32, #tpu.memory_space<vmem>>, %arg4: memref<1x3x288xbf16, #tpu.memory_space<vmem>>) attributes {dimension_semantics = [#tpu.dimension_semantics<parallel>], iteration_bounds = array<i64: 2>, scalar_prefetch = 0 : i64, scratch_operands = 0 : i64, tpu.core_type = #tpu.core_type<tc>, window_params = [{transform_indices = @transform_0, window_bounds = array<i64: 1, 3, 342>}, {pipeline_mode = #tpu.pipeline_mode<synchronous>, transform_indices = @transform_1, window_bounds = array<i64: 9, 3, 3>}, {pipeline_mode = #tpu.pipeline_mode<synchronous>, transform_indices = @transform_2, window_bounds = array<i64: 3, 1>}, {transform_indices = @transform_3, window_bounds = array<i64: 1, 3, 288>}]} {
    %cst = arith.constant 0.000000e+00 : f32
    %0 = vector.broadcast %cst : f32 to vector<3x288xf32>
    %c0 = arith.constant 0 : index
    %c0_0 = arith.constant 0 : index
    %c0_1 = arith.constant 0 : index
    %1 = vector.load %arg2[%c0, %c0_0, %c0_1] : memref<9x3x3xbf16, #tpu.memory_space<vmem>>, vector<1x3x3xbf16>
    %2 = vector.shape_cast %1 : vector<1x3x3xbf16> to vector<3x3xbf16>
    %c0_2 = arith.constant 0 : index
    %c0_3 = arith.constant 0 : index
    %c0_4 = arith.constant 0 : index
    %3 = vector.load %arg1[%c0_2, %c0_3, %c0_4] : memref<1x3x342xbf16, #tpu.memory_space<vmem>>, vector<1x3x288xbf16>
    %4 = vector.shape_cast %3 : vector<1x3x288xbf16> to vector<3x288xbf16>
    %cst_5 = arith.constant dense<0.000000e+00> : vector<3x288xf32>
    %5 = tpu.matmul %2, %4, %cst_5 {dimension_numbers = #tpu.dot_dimension_numbers<[1], [0], [0], [1], [0, 0, 1, 1], [], []>} : vector<3x3xbf16>, vector<3x288xbf16>, vector<3x288xf32> -> vector<3x288xf32>
    %6 = arith.addf %0, %5 : vector<3x288xf32>
    %c1 = arith.constant 1 : index
    %c0_6 = arith.constant 0 : index
    %c0_7 = arith.constant 0 : index
    %7 = vector.load %arg2[%c1, %c0_6, %c0_7] : memref<9x3x3xbf16, #tpu.memory_space<vmem>>, vector<1x3x3xbf16>
    %8 = vector.shape_cast %7 : vector<1x3x3xbf16> to vector<3x3xbf16>
    %c0_8 = arith.constant 0 : index
    %c0_9 = arith.constant 0 : index
    %c1_10 = arith.constant 1 : index
    %9 = vector.load %arg1[%c0_8, %c0_9, %c1_10] : memref<1x3x342xbf16, #tpu.memory_space<vmem>>, vector<1x3x288xbf16>
    %10 = vector.shape_cast %9 : vector<1x3x288xbf16> to vector<3x288xbf16>
    %cst_11 = arith.constant dense<0.000000e+00> : vector<3x288xf32>
    %11 = tpu.matmul %8, %10, %cst_11 {dimension_numbers = #tpu.dot_dimension_numbers<[1], [0], [0], [1], [0, 0, 1, 1], [], []>} : vector<3x3xbf16>, vector<3x288xbf16>, vector<3x288xf32> -> vector<3x288xf32>
    %12 = arith.addf %6, %11 : vector<3x288xf32>
    %c2 = arith.constant 2 : index
    %c0_12 = arith.constant 0 : index
    %c0_13 = arith.constant 0 : index
    %13 = vector.load %arg2[%c2, %c0_12, %c0_13] : memref<9x3x3xbf16, #tpu.memory_space<vmem>>, vector<1x3x3xbf16>
    %14 = vector.shape_cast %13 : vector<1x3x3xbf16> to vector<3x3xbf16>
    %c0_14 = arith.constant 0 : index
    %c0_15 = arith.constant 0 : index
    %c2_16 = arith.constant 2 : index
    %15 = vector.load %arg1[%c0_14, %c0_15, %c2_16] : memref<1x3x342xbf16, #tpu.memory_space<vmem>>, vector<1x3x288xbf16>
    %16 = vector.shape_cast %15 : vector<1x3x288xbf16> to vector<3x288xbf16>
    %cst_17 = arith.constant dense<0.000000e+00> : vector<3x288xf32>
    %17 = tpu.matmul %14, %16, %cst_17 {dimension_numbers = #tpu.dot_dimension_numbers<[1], [0], [0], [1], [0, 0, 1, 1], [], []>} : vector<3x3xbf16>, vector<3x288xbf16>, vector<3x288xf32> -> vector<3x288xf32>
    %18 = arith.addf %12, %17 : vector<3x288xf32>
    %c3 = arith.constant 3 : index
    %c0_18 = arith.constant 0 : index
    %c0_19 = arith.constant 0 : index
    %19 = vector.load %arg2[%c3, %c0_18, %c0_19] : memref<9x3x3xbf16, #tpu.memory_space<vmem>>, vector<1x3x3xbf16>
    %20 = vector.shape_cast %19 : vector<1x3x3xbf16> to vector<3x3xbf16>
    %c0_20 = arith.constant 0 : index
    %c0_21 = arith.constant 0 : index
    %c18 = arith.constant 18 : index
    %21 = vector.load %arg1[%c0_20, %c0_21, %c18] : memref<1x3x342xbf16, #tpu.memory_space<vmem>>, vector<1x3x288xbf16>
    %22 = vector.shape_cast %21 : vector<1x3x288xbf16> to vector<3x288xbf16>
    %cst_22 = arith.constant dense<0.000000e+00> : vector<3x288xf32>
    %23 = tpu.matmul %20, %22, %cst_22 {dimension_numbers = #tpu.dot_dimension_numbers<[1], [0], [0], [1], [0, 0, 1, 1], [], []>} : vector<3x3xbf16>, vector<3x288xbf16>, vector<3x288xf32> -> vector<3x288xf32>
    %24 = arith.addf %18, %23 : vector<3x288xf32>
    %c4 = arith.constant 4 : index
    %c0_23 = arith.constant 0 : index
    %c0_24 = arith.constant 0 : index
    %25 = vector.load %arg2[%c4, %c0_23, %c0_24] : memref<9x3x3xbf16, #tpu.memory_space<vmem>>, vector<1x3x3xbf16>
    %26 = vector.shape_cast %25 : vector<1x3x3xbf16> to vector<3x3xbf16>
    %c0_25 = arith.constant 0 : index
    %c0_26 = arith.constant 0 : index
    %c19 = arith.constant 19 : index
    %27 = vector.load %arg1[%c0_25, %c0_26, %c19] : memref<1x3x342xbf16, #tpu.memory_space<vmem>>, vector<1x3x288xbf16>
    %28 = vector.shape_cast %27 : vector<1x3x288xbf16> to vector<3x288xbf16>
    %cst_27 = arith.constant dense<0.000000e+00> : vector<3x288xf32>
    %29 = tpu.matmul %26, %28, %cst_27 {dimension_numbers = #tpu.dot_dimension_numbers<[1], [0], [0], [1], [0, 0, 1, 1], [], []>} : vector<3x3xbf16>, vector<3x288xbf16>, vector<3x288xf32> -> vector<3x288xf32>
    %30 = arith.addf %24, %29 : vector<3x288xf32>
    %c5 = arith.constant 5 : index
    %c0_28 = arith.constant 0 : index
    %c0_29 = arith.constant 0 : index
    %31 = vector.load %arg2[%c5, %c0_28, %c0_29] : memref<9x3x3xbf16, #tpu.memory_space<vmem>>, vector<1x3x3xbf16>
    %32 = vector.shape_cast %31 : vector<1x3x3xbf16> to vector<3x3xbf16>
    %c0_30 = arith.constant 0 : index
    %c0_31 = arith.constant 0 : index
    %c20 = arith.constant 20 : index
    %33 = vector.load %arg1[%c0_30, %c0_31, %c20] : memref<1x3x342xbf16, #tpu.memory_space<vmem>>, vector<1x3x288xbf16>
    %34 = vector.shape_cast %33 : vector<1x3x288xbf16> to vector<3x288xbf16>
    %cst_32 = arith.constant dense<0.000000e+00> : vector<3x288xf32>
    %35 = tpu.matmul %32, %34, %cst_32 {dimension_numbers = #tpu.dot_dimension_numbers<[1], [0], [0], [1], [0, 0, 1, 1], [], []>} : vector<3x3xbf16>, vector<3x288xbf16>, vector<3x288xf32> -> vector<3x288xf32>
    %36 = arith.addf %30, %35 : vector<3x288xf32>
    %c6 = arith.constant 6 : index
    %c0_33 = arith.constant 0 : index
    %c0_34 = arith.constant 0 : index
    %37 = vector.load %arg2[%c6, %c0_33, %c0_34] : memref<9x3x3xbf16, #tpu.memory_space<vmem>>, vector<1x3x3xbf16>
    %38 = vector.shape_cast %37 : vector<1x3x3xbf16> to vector<3x3xbf16>
    %c0_35 = arith.constant 0 : index
    %c0_36 = arith.constant 0 : index
    %c36 = arith.constant 36 : index
    %39 = vector.load %arg1[%c0_35, %c0_36, %c36] : memref<1x3x342xbf16, #tpu.memory_space<vmem>>, vector<1x3x288xbf16>
    %40 = vector.shape_cast %39 : vector<1x3x288xbf16> to vector<3x288xbf16>
    %cst_37 = arith.constant dense<0.000000e+00> : vector<3x288xf32>
    %41 = tpu.matmul %38, %40, %cst_37 {dimension_numbers = #tpu.dot_dimension_numbers<[1], [0], [0], [1], [0, 0, 1, 1], [], []>} : vector<3x3xbf16>, vector<3x288xbf16>, vector<3x288xf32> -> vector<3x288xf32>
    %42 = arith.addf %36, %41 : vector<3x288xf32>
    %c7 = arith.constant 7 : index
    %c0_38 = arith.constant 0 : index
    %c0_39 = arith.constant 0 : index
    %43 = vector.load %arg2[%c7, %c0_38, %c0_39] : memref<9x3x3xbf16, #tpu.memory_space<vmem>>, vector<1x3x3xbf16>
    %44 = vector.shape_cast %43 : vector<1x3x3xbf16> to vector<3x3xbf16>
    %c0_40 = arith.constant 0 : index
    %c0_41 = arith.constant 0 : index
    %c37 = arith.constant 37 : index
    %45 = vector.load %arg1[%c0_40, %c0_41, %c37] : memref<1x3x342xbf16, #tpu.memory_space<vmem>>, vector<1x3x288xbf16>
    %46 = vector.shape_cast %45 : vector<1x3x288xbf16> to vector<3x288xbf16>
    %cst_42 = arith.constant dense<0.000000e+00> : vector<3x288xf32>
    %47 = tpu.matmul %44, %46, %cst_42 {dimension_numbers = #tpu.dot_dimension_numbers<[1], [0], [0], [1], [0, 0, 1, 1], [], []>} : vector<3x3xbf16>, vector<3x288xbf16>, vector<3x288xf32> -> vector<3x288xf32>
    %48 = arith.addf %42, %47 : vector<3x288xf32>
    %c8 = arith.constant 8 : index
    %c0_43 = arith.constant 0 : index
    %c0_44 = arith.constant 0 : index
    %49 = vector.load %arg2[%c8, %c0_43, %c0_44] : memref<9x3x3xbf16, #tpu.memory_space<vmem>>, vector<1x3x3xbf16>
    %50 = vector.shape_cast %49 : vector<1x3x3xbf16> to vector<3x3xbf16>
    %c0_45 = arith.constant 0 : index
    %c0_46 = arith.constant 0 : index
    %c38 = arith.constant 38 : index
    %51 = vector.load %arg1[%c0_45, %c0_46, %c38] : memref<1x3x342xbf16, #tpu.memory_space<vmem>>, vector<1x3x288xbf16>
    %52 = vector.shape_cast %51 : vector<1x3x288xbf16> to vector<3x288xbf16>
    %cst_47 = arith.constant dense<0.000000e+00> : vector<3x288xf32>
    %53 = tpu.matmul %50, %52, %cst_47 {dimension_numbers = #tpu.dot_dimension_numbers<[1], [0], [0], [1], [0, 0, 1, 1], [], []>} : vector<3x3xbf16>, vector<3x288xbf16>, vector<3x288xf32> -> vector<3x288xf32>
    %54 = arith.addf %48, %53 : vector<3x288xf32>
    %c0_48 = arith.constant 0 : index
    %c0_49 = arith.constant 0 : index
    %55 = vector.load %arg3[%c0_48, %c0_49] : memref<3x1xf32, #tpu.memory_space<vmem>>, vector<3x1xf32>
    %56 = vector.broadcast %55 : vector<3x1xf32> to vector<3x288xf32>
    %57 = arith.addf %54, %56 : vector<3x288xf32>
    %cst_50 = arith.constant 0.000000e+00 : f32
    %58 = vector.broadcast %cst_50 : f32 to vector<3x288xf32>
    %59 = arith.maximumf %57, %58 : vector<3x288xf32>
    %60 = arith.truncf %59 : vector<3x288xf32> to vector<3x288xbf16>
    %c0_51 = arith.constant 0 : index
    %c0_52 = arith.constant 0 : index
    %c0_53 = arith.constant 0 : index
    %61 = vector.load %arg4[%c0_51, %c0_52, %c0_53] : memref<1x3x288xbf16, #tpu.memory_space<vmem>>, vector<1x3x288xbf16>
    %62 = vector.shape_cast %61 : vector<1x3x288xbf16> to vector<3x288xbf16>
    %63 = vector.shape_cast %60 : vector<3x288xbf16> to vector<1x3x288xbf16>
    tpu.vector_store %arg4[%c0_51, %c0_52, %c0_53], %63 {strides = array<i32>} : memref<1x3x288xbf16, #tpu.memory_space<vmem>>, vector<1x3x288xbf16>,
    return
  }
  func.func @transform_0(%arg0: i32) -> (i32, i32, i32) {
    %c0_i32 = arith.constant 0 : i32
    %c0_i32_0 = arith.constant 0 : i32
    %c0_i32_1 = arith.constant 0 : i32
    return %arg0, %c0_i32, %c0_i32_0 : i32, i32, i32
  }
  func.func @transform_1(%arg0: i32) -> (i32, i32, i32) {
    %c0_i32 = arith.constant 0 : i32
    %c0_i32_0 = arith.constant 0 : i32
    %c0_i32_1 = arith.constant 0 : i32
    %c0_i32_2 = arith.constant 0 : i32
    return %c0_i32, %c0_i32_0, %c0_i32_1 : i32, i32, i32
  }
  func.func @transform_2(%arg0: i32) -> (i32, i32) {
    %c0_i32 = arith.constant 0 : i32
    %c0_i32_0 = arith.constant 0 : i32
    %c0_i32_1 = arith.constant 0 : i32
    return %c0_i32, %c0_i32_0 : i32, i32
  }
  func.func @transform_3(%arg0: i32) -> (i32, i32, i32) {
    %c0_i32 = arith.constant 0 : i32
    %c0_i32_0 = arith.constant 0 : i32
    %c0_i32_1 = arith.constant 0 : i32
    return %arg0, %c0_i32, %c0_i32_0 : i32, i32, i32
  }
}

module attributes {stable_mosaic.version = 11 : i64} {
  func.func @kernel(%arg0: i32, %arg1: memref<1x3x342xbf16, #tpu.memory_space<vmem>>, %arg2: memref<9x12x3xbf16, #tpu.memory_space<vmem>>, %arg3: memref<12x1xf32, #tpu.memory_space<vmem>>, %arg4: memref<1x12x288xbf16, #tpu.memory_space<vmem>>) attributes {dimension_semantics = [#tpu.dimension_semantics<parallel>], iteration_bounds = array<i64: 2>, scalar_prefetch = 0 : i64, scratch_operands = 0 : i64, tpu.core_type = #tpu.core_type<tc>, window_params = [{transform_indices = @transform_0, window_bounds = array<i64: 1, 3, 342>}, {pipeline_mode = #tpu.pipeline_mode<synchronous>, transform_indices = @transform_1, window_bounds = array<i64: 9, 12, 3>}, {pipeline_mode = #tpu.pipeline_mode<synchronous>, transform_indices = @transform_2, window_bounds = array<i64: 12, 1>}, {transform_indices = @transform_3, window_bounds = array<i64: 1, 12, 288>}]} {
    %cst = arith.constant 0.000000e+00 : f32
    %0 = vector.broadcast %cst : f32 to vector<12x288xf32>
    %c0 = arith.constant 0 : index
    %c0_0 = arith.constant 0 : index
    %c0_1 = arith.constant 0 : index
    %1 = vector.load %arg2[%c0, %c0_0, %c0_1] : memref<9x12x3xbf16, #tpu.memory_space<vmem>>, vector<1x12x3xbf16>
    %2 = vector.shape_cast %1 : vector<1x12x3xbf16> to vector<12x3xbf16>
    %c0_2 = arith.constant 0 : index
    %c0_3 = arith.constant 0 : index
    %c0_4 = arith.constant 0 : index
    %3 = vector.load %arg1[%c0_2, %c0_3, %c0_4] : memref<1x3x342xbf16, #tpu.memory_space<vmem>>, vector<1x3x288xbf16>
    %4 = vector.shape_cast %3 : vector<1x3x288xbf16> to vector<3x288xbf16>
    %cst_5 = arith.constant dense<0.000000e+00> : vector<12x288xf32>
    %5 = tpu.matmul %2, %4, %cst_5 {dimension_numbers = #tpu.dot_dimension_numbers<[1], [0], [0], [1], [0, 0, 1, 1], [], []>} : vector<12x3xbf16>, vector<3x288xbf16>, vector<12x288xf32> -> vector<12x288xf32>
    %6 = arith.addf %0, %5 : vector<12x288xf32>
    %c1 = arith.constant 1 : index
    %c0_6 = arith.constant 0 : index
    %c0_7 = arith.constant 0 : index
    %7 = vector.load %arg2[%c1, %c0_6, %c0_7] : memref<9x12x3xbf16, #tpu.memory_space<vmem>>, vector<1x12x3xbf16>
    %8 = vector.shape_cast %7 : vector<1x12x3xbf16> to vector<12x3xbf16>
    %c0_8 = arith.constant 0 : index
    %c0_9 = arith.constant 0 : index
    %c1_10 = arith.constant 1 : index
    %9 = vector.load %arg1[%c0_8, %c0_9, %c1_10] : memref<1x3x342xbf16, #tpu.memory_space<vmem>>, vector<1x3x288xbf16>
    %10 = vector.shape_cast %9 : vector<1x3x288xbf16> to vector<3x288xbf16>
    %cst_11 = arith.constant dense<0.000000e+00> : vector<12x288xf32>
    %11 = tpu.matmul %8, %10, %cst_11 {dimension_numbers = #tpu.dot_dimension_numbers<[1], [0], [0], [1], [0, 0, 1, 1], [], []>} : vector<12x3xbf16>, vector<3x288xbf16>, vector<12x288xf32> -> vector<12x288xf32>
    %12 = arith.addf %6, %11 : vector<12x288xf32>
    %c2 = arith.constant 2 : index
    %c0_12 = arith.constant 0 : index
    %c0_13 = arith.constant 0 : index
    %13 = vector.load %arg2[%c2, %c0_12, %c0_13] : memref<9x12x3xbf16, #tpu.memory_space<vmem>>, vector<1x12x3xbf16>
    %14 = vector.shape_cast %13 : vector<1x12x3xbf16> to vector<12x3xbf16>
    %c0_14 = arith.constant 0 : index
    %c0_15 = arith.constant 0 : index
    %c2_16 = arith.constant 2 : index
    %15 = vector.load %arg1[%c0_14, %c0_15, %c2_16] : memref<1x3x342xbf16, #tpu.memory_space<vmem>>, vector<1x3x288xbf16>
    %16 = vector.shape_cast %15 : vector<1x3x288xbf16> to vector<3x288xbf16>
    %cst_17 = arith.constant dense<0.000000e+00> : vector<12x288xf32>
    %17 = tpu.matmul %14, %16, %cst_17 {dimension_numbers = #tpu.dot_dimension_numbers<[1], [0], [0], [1], [0, 0, 1, 1], [], []>} : vector<12x3xbf16>, vector<3x288xbf16>, vector<12x288xf32> -> vector<12x288xf32>
    %18 = arith.addf %12, %17 : vector<12x288xf32>
    %c3 = arith.constant 3 : index
    %c0_18 = arith.constant 0 : index
    %c0_19 = arith.constant 0 : index
    %19 = vector.load %arg2[%c3, %c0_18, %c0_19] : memref<9x12x3xbf16, #tpu.memory_space<vmem>>, vector<1x12x3xbf16>
    %20 = vector.shape_cast %19 : vector<1x12x3xbf16> to vector<12x3xbf16>
    %c0_20 = arith.constant 0 : index
    %c0_21 = arith.constant 0 : index
    %c18 = arith.constant 18 : index
    %21 = vector.load %arg1[%c0_20, %c0_21, %c18] : memref<1x3x342xbf16, #tpu.memory_space<vmem>>, vector<1x3x288xbf16>
    %22 = vector.shape_cast %21 : vector<1x3x288xbf16> to vector<3x288xbf16>
    %cst_22 = arith.constant dense<0.000000e+00> : vector<12x288xf32>
    %23 = tpu.matmul %20, %22, %cst_22 {dimension_numbers = #tpu.dot_dimension_numbers<[1], [0], [0], [1], [0, 0, 1, 1], [], []>} : vector<12x3xbf16>, vector<3x288xbf16>, vector<12x288xf32> -> vector<12x288xf32>
    %24 = arith.addf %18, %23 : vector<12x288xf32>
    %c4 = arith.constant 4 : index
    %c0_23 = arith.constant 0 : index
    %c0_24 = arith.constant 0 : index
    %25 = vector.load %arg2[%c4, %c0_23, %c0_24] : memref<9x12x3xbf16, #tpu.memory_space<vmem>>, vector<1x12x3xbf16>
    %26 = vector.shape_cast %25 : vector<1x12x3xbf16> to vector<12x3xbf16>
    %c0_25 = arith.constant 0 : index
    %c0_26 = arith.constant 0 : index
    %c19 = arith.constant 19 : index
    %27 = vector.load %arg1[%c0_25, %c0_26, %c19] : memref<1x3x342xbf16, #tpu.memory_space<vmem>>, vector<1x3x288xbf16>
    %28 = vector.shape_cast %27 : vector<1x3x288xbf16> to vector<3x288xbf16>
    %cst_27 = arith.constant dense<0.000000e+00> : vector<12x288xf32>
    %29 = tpu.matmul %26, %28, %cst_27 {dimension_numbers = #tpu.dot_dimension_numbers<[1], [0], [0], [1], [0, 0, 1, 1], [], []>} : vector<12x3xbf16>, vector<3x288xbf16>, vector<12x288xf32> -> vector<12x288xf32>
    %30 = arith.addf %24, %29 : vector<12x288xf32>
    %c5 = arith.constant 5 : index
    %c0_28 = arith.constant 0 : index
    %c0_29 = arith.constant 0 : index
    %31 = vector.load %arg2[%c5, %c0_28, %c0_29] : memref<9x12x3xbf16, #tpu.memory_space<vmem>>, vector<1x12x3xbf16>
    %32 = vector.shape_cast %31 : vector<1x12x3xbf16> to vector<12x3xbf16>
    %c0_30 = arith.constant 0 : index
    %c0_31 = arith.constant 0 : index
    %c20 = arith.constant 20 : index
    %33 = vector.load %arg1[%c0_30, %c0_31, %c20] : memref<1x3x342xbf16, #tpu.memory_space<vmem>>, vector<1x3x288xbf16>
    %34 = vector.shape_cast %33 : vector<1x3x288xbf16> to vector<3x288xbf16>
    %cst_32 = arith.constant dense<0.000000e+00> : vector<12x288xf32>
    %35 = tpu.matmul %32, %34, %cst_32 {dimension_numbers = #tpu.dot_dimension_numbers<[1], [0], [0], [1], [0, 0, 1, 1], [], []>} : vector<12x3xbf16>, vector<3x288xbf16>, vector<12x288xf32> -> vector<12x288xf32>
    %36 = arith.addf %30, %35 : vector<12x288xf32>
    %c6 = arith.constant 6 : index
    %c0_33 = arith.constant 0 : index
    %c0_34 = arith.constant 0 : index
    %37 = vector.load %arg2[%c6, %c0_33, %c0_34] : memref<9x12x3xbf16, #tpu.memory_space<vmem>>, vector<1x12x3xbf16>
    %38 = vector.shape_cast %37 : vector<1x12x3xbf16> to vector<12x3xbf16>
    %c0_35 = arith.constant 0 : index
    %c0_36 = arith.constant 0 : index
    %c36 = arith.constant 36 : index
    %39 = vector.load %arg1[%c0_35, %c0_36, %c36] : memref<1x3x342xbf16, #tpu.memory_space<vmem>>, vector<1x3x288xbf16>
    %40 = vector.shape_cast %39 : vector<1x3x288xbf16> to vector<3x288xbf16>
    %cst_37 = arith.constant dense<0.000000e+00> : vector<12x288xf32>
    %41 = tpu.matmul %38, %40, %cst_37 {dimension_numbers = #tpu.dot_dimension_numbers<[1], [0], [0], [1], [0, 0, 1, 1], [], []>} : vector<12x3xbf16>, vector<3x288xbf16>, vector<12x288xf32> -> vector<12x288xf32>
    %42 = arith.addf %36, %41 : vector<12x288xf32>
    %c7 = arith.constant 7 : index
    %c0_38 = arith.constant 0 : index
    %c0_39 = arith.constant 0 : index
    %43 = vector.load %arg2[%c7, %c0_38, %c0_39] : memref<9x12x3xbf16, #tpu.memory_space<vmem>>, vector<1x12x3xbf16>
    %44 = vector.shape_cast %43 : vector<1x12x3xbf16> to vector<12x3xbf16>
    %c0_40 = arith.constant 0 : index
    %c0_41 = arith.constant 0 : index
    %c37 = arith.constant 37 : index
    %45 = vector.load %arg1[%c0_40, %c0_41, %c37] : memref<1x3x342xbf16, #tpu.memory_space<vmem>>, vector<1x3x288xbf16>
    %46 = vector.shape_cast %45 : vector<1x3x288xbf16> to vector<3x288xbf16>
    %cst_42 = arith.constant dense<0.000000e+00> : vector<12x288xf32>
    %47 = tpu.matmul %44, %46, %cst_42 {dimension_numbers = #tpu.dot_dimension_numbers<[1], [0], [0], [1], [0, 0, 1, 1], [], []>} : vector<12x3xbf16>, vector<3x288xbf16>, vector<12x288xf32> -> vector<12x288xf32>
    %48 = arith.addf %42, %47 : vector<12x288xf32>
    %c8 = arith.constant 8 : index
    %c0_43 = arith.constant 0 : index
    %c0_44 = arith.constant 0 : index
    %49 = vector.load %arg2[%c8, %c0_43, %c0_44] : memref<9x12x3xbf16, #tpu.memory_space<vmem>>, vector<1x12x3xbf16>
    %50 = vector.shape_cast %49 : vector<1x12x3xbf16> to vector<12x3xbf16>
    %c0_45 = arith.constant 0 : index
    %c0_46 = arith.constant 0 : index
    %c38 = arith.constant 38 : index
    %51 = vector.load %arg1[%c0_45, %c0_46, %c38] : memref<1x3x342xbf16, #tpu.memory_space<vmem>>, vector<1x3x288xbf16>
    %52 = vector.shape_cast %51 : vector<1x3x288xbf16> to vector<3x288xbf16>
    %cst_47 = arith.constant dense<0.000000e+00> : vector<12x288xf32>
    %53 = tpu.matmul %50, %52, %cst_47 {dimension_numbers = #tpu.dot_dimension_numbers<[1], [0], [0], [1], [0, 0, 1, 1], [], []>} : vector<12x3xbf16>, vector<3x288xbf16>, vector<12x288xf32> -> vector<12x288xf32>
    %54 = arith.addf %48, %53 : vector<12x288xf32>
    %c0_48 = arith.constant 0 : index
    %c0_49 = arith.constant 0 : index
    %55 = vector.load %arg3[%c0_48, %c0_49] : memref<12x1xf32, #tpu.memory_space<vmem>>, vector<12x1xf32>
    %56 = vector.broadcast %55 : vector<12x1xf32> to vector<12x288xf32>
    %57 = arith.addf %54, %56 : vector<12x288xf32>
    %cst_50 = arith.constant 0.000000e+00 : f32
    %58 = vector.broadcast %cst_50 : f32 to vector<12x288xf32>
    %59 = arith.maximumf %57, %58 : vector<12x288xf32>
    %60 = arith.truncf %59 : vector<12x288xf32> to vector<12x288xbf16>
    %c0_51 = arith.constant 0 : index
    %c0_52 = arith.constant 0 : index
    %c0_53 = arith.constant 0 : index
    %61 = vector.load %arg4[%c0_51, %c0_52, %c0_53] : memref<1x12x288xbf16, #tpu.memory_space<vmem>>, vector<1x12x288xbf16>
    %62 = vector.shape_cast %61 : vector<1x12x288xbf16> to vector<12x288xbf16>
    %63 = vector.shape_cast %60 : vector<12x288xbf16> to vector<1x12x288xbf16>
    tpu.vector_store %arg4[%c0_51, %c0_52, %c0_53], %63 {strides = array<i32>} : memref<1x12x288xbf16, #tpu.memory_space<vmem>>, vector<1x12x288xbf16>,
    return
  }
  func.func @transform_0(%arg0: i32) -> (i32, i32, i32) {
    %c0_i32 = arith.constant 0 : i32
    %c0_i32_0 = arith.constant 0 : i32
    %c0_i32_1 = arith.constant 0 : i32
    return %arg0, %c0_i32, %c0_i32_0 : i32, i32, i32
  }
  func.func @transform_1(%arg0: i32) -> (i32, i32, i32) {
    %c0_i32 = arith.constant 0 : i32
    %c0_i32_0 = arith.constant 0 : i32
    %c0_i32_1 = arith.constant 0 : i32
    %c0_i32_2 = arith.constant 0 : i32
    return %c0_i32, %c0_i32_0, %c0_i32_1 : i32, i32, i32
  }
  func.func @transform_2(%arg0: i32) -> (i32, i32) {
    %c0_i32 = arith.constant 0 : i32
    %c0_i32_0 = arith.constant 0 : i32
    %c0_i32_1 = arith.constant 0 : i32
    return %c0_i32, %c0_i32_0 : i32, i32
  }
  func.func @transform_3(%arg0: i32) -> (i32, i32, i32) {
    %c0_i32 = arith.constant 0 : i32
    %c0_i32_0 = arith.constant 0 : i32
    %c0_i32_1 = arith.constant 0 : i32
    return %arg0, %c0_i32, %c0_i32_0 : i32, i32, i32
  }
}

module attributes {stable_mosaic.version = 11 : i64} {
  func.func @kernel(%arg0: i32, %arg1: memref<1x12x110xbf16, #tpu.memory_space<vmem>>, %arg2: memref<9x12x12xbf16, #tpu.memory_space<vmem>>, %arg3: memref<12x1xf32, #tpu.memory_space<vmem>>, %arg4: memref<1x12x80xbf16, #tpu.memory_space<vmem>>) attributes {dimension_semantics = [#tpu.dimension_semantics<parallel>], iteration_bounds = array<i64: 2>, scalar_prefetch = 0 : i64, scratch_operands = 0 : i64, tpu.core_type = #tpu.core_type<tc>, window_params = [{transform_indices = @transform_0, window_bounds = array<i64: 1, 12, 110>}, {pipeline_mode = #tpu.pipeline_mode<synchronous>, transform_indices = @transform_1, window_bounds = array<i64: 9, 12, 12>}, {pipeline_mode = #tpu.pipeline_mode<synchronous>, transform_indices = @transform_2, window_bounds = array<i64: 12, 1>}, {transform_indices = @transform_3, window_bounds = array<i64: 1, 12, 80>}]} {
    %cst = arith.constant 0.000000e+00 : f32
    %0 = vector.broadcast %cst : f32 to vector<12x80xf32>
    %c0 = arith.constant 0 : index
    %c0_0 = arith.constant 0 : index
    %c0_1 = arith.constant 0 : index
    %1 = vector.load %arg2[%c0, %c0_0, %c0_1] : memref<9x12x12xbf16, #tpu.memory_space<vmem>>, vector<1x12x12xbf16>
    %2 = vector.shape_cast %1 : vector<1x12x12xbf16> to vector<12x12xbf16>
    %c0_2 = arith.constant 0 : index
    %c0_3 = arith.constant 0 : index
    %c0_4 = arith.constant 0 : index
    %3 = vector.load %arg1[%c0_2, %c0_3, %c0_4] : memref<1x12x110xbf16, #tpu.memory_space<vmem>>, vector<1x12x80xbf16>
    %4 = vector.shape_cast %3 : vector<1x12x80xbf16> to vector<12x80xbf16>
    %cst_5 = arith.constant dense<0.000000e+00> : vector<12x80xf32>
    %5 = tpu.matmul %2, %4, %cst_5 {dimension_numbers = #tpu.dot_dimension_numbers<[1], [0], [0], [1], [0, 0, 1, 1], [], []>} : vector<12x12xbf16>, vector<12x80xbf16>, vector<12x80xf32> -> vector<12x80xf32>
    %6 = arith.addf %0, %5 : vector<12x80xf32>
    %c1 = arith.constant 1 : index
    %c0_6 = arith.constant 0 : index
    %c0_7 = arith.constant 0 : index
    %7 = vector.load %arg2[%c1, %c0_6, %c0_7] : memref<9x12x12xbf16, #tpu.memory_space<vmem>>, vector<1x12x12xbf16>
    %8 = vector.shape_cast %7 : vector<1x12x12xbf16> to vector<12x12xbf16>
    %c0_8 = arith.constant 0 : index
    %c0_9 = arith.constant 0 : index
    %c1_10 = arith.constant 1 : index
    %9 = vector.load %arg1[%c0_8, %c0_9, %c1_10] : memref<1x12x110xbf16, #tpu.memory_space<vmem>>, vector<1x12x80xbf16>
    %10 = vector.shape_cast %9 : vector<1x12x80xbf16> to vector<12x80xbf16>
    %cst_11 = arith.constant dense<0.000000e+00> : vector<12x80xf32>
    %11 = tpu.matmul %8, %10, %cst_11 {dimension_numbers = #tpu.dot_dimension_numbers<[1], [0], [0], [1], [0, 0, 1, 1], [], []>} : vector<12x12xbf16>, vector<12x80xbf16>, vector<12x80xf32> -> vector<12x80xf32>
    %12 = arith.addf %6, %11 : vector<12x80xf32>
    %c2 = arith.constant 2 : index
    %c0_12 = arith.constant 0 : index
    %c0_13 = arith.constant 0 : index
    %13 = vector.load %arg2[%c2, %c0_12, %c0_13] : memref<9x12x12xbf16, #tpu.memory_space<vmem>>, vector<1x12x12xbf16>
    %14 = vector.shape_cast %13 : vector<1x12x12xbf16> to vector<12x12xbf16>
    %c0_14 = arith.constant 0 : index
    %c0_15 = arith.constant 0 : index
    %c2_16 = arith.constant 2 : index
    %15 = vector.load %arg1[%c0_14, %c0_15, %c2_16] : memref<1x12x110xbf16, #tpu.memory_space<vmem>>, vector<1x12x80xbf16>
    %16 = vector.shape_cast %15 : vector<1x12x80xbf16> to vector<12x80xbf16>
    %cst_17 = arith.constant dense<0.000000e+00> : vector<12x80xf32>
    %17 = tpu.matmul %14, %16, %cst_17 {dimension_numbers = #tpu.dot_dimension_numbers<[1], [0], [0], [1], [0, 0, 1, 1], [], []>} : vector<12x12xbf16>, vector<12x80xbf16>, vector<12x80xf32> -> vector<12x80xf32>
    %18 = arith.addf %12, %17 : vector<12x80xf32>
    %c3 = arith.constant 3 : index
    %c0_18 = arith.constant 0 : index
    %c0_19 = arith.constant 0 : index
    %19 = vector.load %arg2[%c3, %c0_18, %c0_19] : memref<9x12x12xbf16, #tpu.memory_space<vmem>>, vector<1x12x12xbf16>
    %20 = vector.shape_cast %19 : vector<1x12x12xbf16> to vector<12x12xbf16>
    %c0_20 = arith.constant 0 : index
    %c0_21 = arith.constant 0 : index
    %c10 = arith.constant 10 : index
    %21 = vector.load %arg1[%c0_20, %c0_21, %c10] : memref<1x12x110xbf16, #tpu.memory_space<vmem>>, vector<1x12x80xbf16>
    %22 = vector.shape_cast %21 : vector<1x12x80xbf16> to vector<12x80xbf16>
    %cst_22 = arith.constant dense<0.000000e+00> : vector<12x80xf32>
    %23 = tpu.matmul %20, %22, %cst_22 {dimension_numbers = #tpu.dot_dimension_numbers<[1], [0], [0], [1], [0, 0, 1, 1], [], []>} : vector<12x12xbf16>, vector<12x80xbf16>, vector<12x80xf32> -> vector<12x80xf32>
    %24 = arith.addf %18, %23 : vector<12x80xf32>
    %c4 = arith.constant 4 : index
    %c0_23 = arith.constant 0 : index
    %c0_24 = arith.constant 0 : index
    %25 = vector.load %arg2[%c4, %c0_23, %c0_24] : memref<9x12x12xbf16, #tpu.memory_space<vmem>>, vector<1x12x12xbf16>
    %26 = vector.shape_cast %25 : vector<1x12x12xbf16> to vector<12x12xbf16>
    %c0_25 = arith.constant 0 : index
    %c0_26 = arith.constant 0 : index
    %c11 = arith.constant 11 : index
    %27 = vector.load %arg1[%c0_25, %c0_26, %c11] : memref<1x12x110xbf16, #tpu.memory_space<vmem>>, vector<1x12x80xbf16>
    %28 = vector.shape_cast %27 : vector<1x12x80xbf16> to vector<12x80xbf16>
    %cst_27 = arith.constant dense<0.000000e+00> : vector<12x80xf32>
    %29 = tpu.matmul %26, %28, %cst_27 {dimension_numbers = #tpu.dot_dimension_numbers<[1], [0], [0], [1], [0, 0, 1, 1], [], []>} : vector<12x12xbf16>, vector<12x80xbf16>, vector<12x80xf32> -> vector<12x80xf32>
    %30 = arith.addf %24, %29 : vector<12x80xf32>
    %c5 = arith.constant 5 : index
    %c0_28 = arith.constant 0 : index
    %c0_29 = arith.constant 0 : index
    %31 = vector.load %arg2[%c5, %c0_28, %c0_29] : memref<9x12x12xbf16, #tpu.memory_space<vmem>>, vector<1x12x12xbf16>
    %32 = vector.shape_cast %31 : vector<1x12x12xbf16> to vector<12x12xbf16>
    %c0_30 = arith.constant 0 : index
    %c0_31 = arith.constant 0 : index
    %c12 = arith.constant 12 : index
    %33 = vector.load %arg1[%c0_30, %c0_31, %c12] : memref<1x12x110xbf16, #tpu.memory_space<vmem>>, vector<1x12x80xbf16>
    %34 = vector.shape_cast %33 : vector<1x12x80xbf16> to vector<12x80xbf16>
    %cst_32 = arith.constant dense<0.000000e+00> : vector<12x80xf32>
    %35 = tpu.matmul %32, %34, %cst_32 {dimension_numbers = #tpu.dot_dimension_numbers<[1], [0], [0], [1], [0, 0, 1, 1], [], []>} : vector<12x12xbf16>, vector<12x80xbf16>, vector<12x80xf32> -> vector<12x80xf32>
    %36 = arith.addf %30, %35 : vector<12x80xf32>
    %c6 = arith.constant 6 : index
    %c0_33 = arith.constant 0 : index
    %c0_34 = arith.constant 0 : index
    %37 = vector.load %arg2[%c6, %c0_33, %c0_34] : memref<9x12x12xbf16, #tpu.memory_space<vmem>>, vector<1x12x12xbf16>
    %38 = vector.shape_cast %37 : vector<1x12x12xbf16> to vector<12x12xbf16>
    %c0_35 = arith.constant 0 : index
    %c0_36 = arith.constant 0 : index
    %c20 = arith.constant 20 : index
    %39 = vector.load %arg1[%c0_35, %c0_36, %c20] : memref<1x12x110xbf16, #tpu.memory_space<vmem>>, vector<1x12x80xbf16>
    %40 = vector.shape_cast %39 : vector<1x12x80xbf16> to vector<12x80xbf16>
    %cst_37 = arith.constant dense<0.000000e+00> : vector<12x80xf32>
    %41 = tpu.matmul %38, %40, %cst_37 {dimension_numbers = #tpu.dot_dimension_numbers<[1], [0], [0], [1], [0, 0, 1, 1], [], []>} : vector<12x12xbf16>, vector<12x80xbf16>, vector<12x80xf32> -> vector<12x80xf32>
    %42 = arith.addf %36, %41 : vector<12x80xf32>
    %c7 = arith.constant 7 : index
    %c0_38 = arith.constant 0 : index
    %c0_39 = arith.constant 0 : index
    %43 = vector.load %arg2[%c7, %c0_38, %c0_39] : memref<9x12x12xbf16, #tpu.memory_space<vmem>>, vector<1x12x12xbf16>
    %44 = vector.shape_cast %43 : vector<1x12x12xbf16> to vector<12x12xbf16>
    %c0_40 = arith.constant 0 : index
    %c0_41 = arith.constant 0 : index
    %c21 = arith.constant 21 : index
    %45 = vector.load %arg1[%c0_40, %c0_41, %c21] : memref<1x12x110xbf16, #tpu.memory_space<vmem>>, vector<1x12x80xbf16>
    %46 = vector.shape_cast %45 : vector<1x12x80xbf16> to vector<12x80xbf16>
    %cst_42 = arith.constant dense<0.000000e+00> : vector<12x80xf32>
    %47 = tpu.matmul %44, %46, %cst_42 {dimension_numbers = #tpu.dot_dimension_numbers<[1], [0], [0], [1], [0, 0, 1, 1], [], []>} : vector<12x12xbf16>, vector<12x80xbf16>, vector<12x80xf32> -> vector<12x80xf32>
    %48 = arith.addf %42, %47 : vector<12x80xf32>
    %c8 = arith.constant 8 : index
    %c0_43 = arith.constant 0 : index
    %c0_44 = arith.constant 0 : index
    %49 = vector.load %arg2[%c8, %c0_43, %c0_44] : memref<9x12x12xbf16, #tpu.memory_space<vmem>>, vector<1x12x12xbf16>
    %50 = vector.shape_cast %49 : vector<1x12x12xbf16> to vector<12x12xbf16>
    %c0_45 = arith.constant 0 : index
    %c0_46 = arith.constant 0 : index
    %c22 = arith.constant 22 : index
    %51 = vector.load %arg1[%c0_45, %c0_46, %c22] : memref<1x12x110xbf16, #tpu.memory_space<vmem>>, vector<1x12x80xbf16>
    %52 = vector.shape_cast %51 : vector<1x12x80xbf16> to vector<12x80xbf16>
    %cst_47 = arith.constant dense<0.000000e+00> : vector<12x80xf32>
    %53 = tpu.matmul %50, %52, %cst_47 {dimension_numbers = #tpu.dot_dimension_numbers<[1], [0], [0], [1], [0, 0, 1, 1], [], []>} : vector<12x12xbf16>, vector<12x80xbf16>, vector<12x80xf32> -> vector<12x80xf32>
    %54 = arith.addf %48, %53 : vector<12x80xf32>
    %c0_48 = arith.constant 0 : index
    %c0_49 = arith.constant 0 : index
    %55 = vector.load %arg3[%c0_48, %c0_49] : memref<12x1xf32, #tpu.memory_space<vmem>>, vector<12x1xf32>
    %56 = vector.broadcast %55 : vector<12x1xf32> to vector<12x80xf32>
    %57 = arith.addf %54, %56 : vector<12x80xf32>
    %cst_50 = arith.constant 0.000000e+00 : f32
    %58 = vector.broadcast %cst_50 : f32 to vector<12x80xf32>
    %59 = arith.maximumf %57, %58 : vector<12x80xf32>
    %60 = arith.truncf %59 : vector<12x80xf32> to vector<12x80xbf16>
    %c0_51 = arith.constant 0 : index
    %c0_52 = arith.constant 0 : index
    %c0_53 = arith.constant 0 : index
    %61 = vector.load %arg4[%c0_51, %c0_52, %c0_53] : memref<1x12x80xbf16, #tpu.memory_space<vmem>>, vector<1x12x80xbf16>
    %62 = vector.shape_cast %61 : vector<1x12x80xbf16> to vector<12x80xbf16>
    %63 = vector.shape_cast %60 : vector<12x80xbf16> to vector<1x12x80xbf16>
    tpu.vector_store %arg4[%c0_51, %c0_52, %c0_53], %63 {strides = array<i32>} : memref<1x12x80xbf16, #tpu.memory_space<vmem>>, vector<1x12x80xbf16>,
    return
  }
  func.func @transform_0(%arg0: i32) -> (i32, i32, i32) {
    %c0_i32 = arith.constant 0 : i32
    %c0_i32_0 = arith.constant 0 : i32
    %c0_i32_1 = arith.constant 0 : i32
    return %arg0, %c0_i32, %c0_i32_0 : i32, i32, i32
  }
  func.func @transform_1(%arg0: i32) -> (i32, i32, i32) {
    %c0_i32 = arith.constant 0 : i32
    %c0_i32_0 = arith.constant 0 : i32
    %c0_i32_1 = arith.constant 0 : i32
    %c0_i32_2 = arith.constant 0 : i32
    return %c0_i32, %c0_i32_0, %c0_i32_1 : i32, i32, i32
  }
  func.func @transform_2(%arg0: i32) -> (i32, i32) {
    %c0_i32 = arith.constant 0 : i32
    %c0_i32_0 = arith.constant 0 : i32
    %c0_i32_1 = arith.constant 0 : i32
    return %c0_i32, %c0_i32_0 : i32, i32
  }
  func.func @transform_3(%arg0: i32) -> (i32, i32, i32) {
    %c0_i32 = arith.constant 0 : i32
    %c0_i32_0 = arith.constant 0 : i32
    %c0_i32_1 = arith.constant 0 : i32
    return %arg0, %c0_i32, %c0_i32_0 : i32, i32, i32
  }
}

module attributes {stable_mosaic.version = 11 : i64} {
  func.func @kernel(%arg0: i32, %arg1: memref<1x12x156xbf16, #tpu.memory_space<vmem>>, %arg2: memref<9x12x12xbf16, #tpu.memory_space<vmem>>, %arg3: memref<12x1xf32, #tpu.memory_space<vmem>>, %arg4: memref<1x12x96xbf16, #tpu.memory_space<vmem>>) attributes {dimension_semantics = [#tpu.dimension_semantics<parallel>], iteration_bounds = array<i64: 2>, scalar_prefetch = 0 : i64, scratch_operands = 0 : i64, tpu.core_type = #tpu.core_type<tc>, window_params = [{transform_indices = @transform_0, window_bounds = array<i64: 1, 12, 156>}, {pipeline_mode = #tpu.pipeline_mode<synchronous>, transform_indices = @transform_1, window_bounds = array<i64: 9, 12, 12>}, {pipeline_mode = #tpu.pipeline_mode<synchronous>, transform_indices = @transform_2, window_bounds = array<i64: 12, 1>}, {transform_indices = @transform_3, window_bounds = array<i64: 1, 12, 96>}]} {
    %cst = arith.constant 0.000000e+00 : f32
    %0 = vector.broadcast %cst : f32 to vector<12x96xf32>
    %c0 = arith.constant 0 : index
    %c0_0 = arith.constant 0 : index
    %c0_1 = arith.constant 0 : index
    %1 = vector.load %arg2[%c0, %c0_0, %c0_1] : memref<9x12x12xbf16, #tpu.memory_space<vmem>>, vector<1x12x12xbf16>
    %2 = vector.shape_cast %1 : vector<1x12x12xbf16> to vector<12x12xbf16>
    %c0_2 = arith.constant 0 : index
    %c0_3 = arith.constant 0 : index
    %c0_4 = arith.constant 0 : index
    %3 = vector.load %arg1[%c0_2, %c0_3, %c0_4] : memref<1x12x156xbf16, #tpu.memory_space<vmem>>, vector<1x12x96xbf16>
    %4 = vector.shape_cast %3 : vector<1x12x96xbf16> to vector<12x96xbf16>
    %cst_5 = arith.constant dense<0.000000e+00> : vector<12x96xf32>
    %5 = tpu.matmul %2, %4, %cst_5 {dimension_numbers = #tpu.dot_dimension_numbers<[1], [0], [0], [1], [0, 0, 1, 1], [], []>} : vector<12x12xbf16>, vector<12x96xbf16>, vector<12x96xf32> -> vector<12x96xf32>
    %6 = arith.addf %0, %5 : vector<12x96xf32>
    %c1 = arith.constant 1 : index
    %c0_6 = arith.constant 0 : index
    %c0_7 = arith.constant 0 : index
    %7 = vector.load %arg2[%c1, %c0_6, %c0_7] : memref<9x12x12xbf16, #tpu.memory_space<vmem>>, vector<1x12x12xbf16>
    %8 = vector.shape_cast %7 : vector<1x12x12xbf16> to vector<12x12xbf16>
    %c0_8 = arith.constant 0 : index
    %c0_9 = arith.constant 0 : index
    %c2 = arith.constant 2 : index
    %9 = vector.load %arg1[%c0_8, %c0_9, %c2] : memref<1x12x156xbf16, #tpu.memory_space<vmem>>, vector<1x12x96xbf16>
    %10 = vector.shape_cast %9 : vector<1x12x96xbf16> to vector<12x96xbf16>
    %cst_10 = arith.constant dense<0.000000e+00> : vector<12x96xf32>
    %11 = tpu.matmul %8, %10, %cst_10 {dimension_numbers = #tpu.dot_dimension_numbers<[1], [0], [0], [1], [0, 0, 1, 1], [], []>} : vector<12x12xbf16>, vector<12x96xbf16>, vector<12x96xf32> -> vector<12x96xf32>
    %12 = arith.addf %6, %11 : vector<12x96xf32>
    %c2_11 = arith.constant 2 : index
    %c0_12 = arith.constant 0 : index
    %c0_13 = arith.constant 0 : index
    %13 = vector.load %arg2[%c2_11, %c0_12, %c0_13] : memref<9x12x12xbf16, #tpu.memory_space<vmem>>, vector<1x12x12xbf16>
    %14 = vector.shape_cast %13 : vector<1x12x12xbf16> to vector<12x12xbf16>
    %c0_14 = arith.constant 0 : index
    %c0_15 = arith.constant 0 : index
    %c4 = arith.constant 4 : index
    %15 = vector.load %arg1[%c0_14, %c0_15, %c4] : memref<1x12x156xbf16, #tpu.memory_space<vmem>>, vector<1x12x96xbf16>
    %16 = vector.shape_cast %15 : vector<1x12x96xbf16> to vector<12x96xbf16>
    %cst_16 = arith.constant dense<0.000000e+00> : vector<12x96xf32>
    %17 = tpu.matmul %14, %16, %cst_16 {dimension_numbers = #tpu.dot_dimension_numbers<[1], [0], [0], [1], [0, 0, 1, 1], [], []>} : vector<12x12xbf16>, vector<12x96xbf16>, vector<12x96xf32> -> vector<12x96xf32>
    %18 = arith.addf %12, %17 : vector<12x96xf32>
    %c3 = arith.constant 3 : index
    %c0_17 = arith.constant 0 : index
    %c0_18 = arith.constant 0 : index
    %19 = vector.load %arg2[%c3, %c0_17, %c0_18] : memref<9x12x12xbf16, #tpu.memory_space<vmem>>, vector<1x12x12xbf16>
    %20 = vector.shape_cast %19 : vector<1x12x12xbf16> to vector<12x12xbf16>
    %c0_19 = arith.constant 0 : index
    %c0_20 = arith.constant 0 : index
    %c24 = arith.constant 24 : index
    %21 = vector.load %arg1[%c0_19, %c0_20, %c24] : memref<1x12x156xbf16, #tpu.memory_space<vmem>>, vector<1x12x96xbf16>
    %22 = vector.shape_cast %21 : vector<1x12x96xbf16> to vector<12x96xbf16>
    %cst_21 = arith.constant dense<0.000000e+00> : vector<12x96xf32>
    %23 = tpu.matmul %20, %22, %cst_21 {dimension_numbers = #tpu.dot_dimension_numbers<[1], [0], [0], [1], [0, 0, 1, 1], [], []>} : vector<12x12xbf16>, vector<12x96xbf16>, vector<12x96xf32> -> vector<12x96xf32>
    %24 = arith.addf %18, %23 : vector<12x96xf32>
    %c4_22 = arith.constant 4 : index
    %c0_23 = arith.constant 0 : index
    %c0_24 = arith.constant 0 : index
    %25 = vector.load %arg2[%c4_22, %c0_23, %c0_24] : memref<9x12x12xbf16, #tpu.memory_space<vmem>>, vector<1x12x12xbf16>
    %26 = vector.shape_cast %25 : vector<1x12x12xbf16> to vector<12x12xbf16>
    %c0_25 = arith.constant 0 : index
    %c0_26 = arith.constant 0 : index
    %c26 = arith.constant 26 : index
    %27 = vector.load %arg1[%c0_25, %c0_26, %c26] : memref<1x12x156xbf16, #tpu.memory_space<vmem>>, vector<1x12x96xbf16>
    %28 = vector.shape_cast %27 : vector<1x12x96xbf16> to vector<12x96xbf16>
    %cst_27 = arith.constant dense<0.000000e+00> : vector<12x96xf32>
    %29 = tpu.matmul %26, %28, %cst_27 {dimension_numbers = #tpu.dot_dimension_numbers<[1], [0], [0], [1], [0, 0, 1, 1], [], []>} : vector<12x12xbf16>, vector<12x96xbf16>, vector<12x96xf32> -> vector<12x96xf32>
    %30 = arith.addf %24, %29 : vector<12x96xf32>
    %c5 = arith.constant 5 : index
    %c0_28 = arith.constant 0 : index
    %c0_29 = arith.constant 0 : index
    %31 = vector.load %arg2[%c5, %c0_28, %c0_29] : memref<9x12x12xbf16, #tpu.memory_space<vmem>>, vector<1x12x12xbf16>
    %32 = vector.shape_cast %31 : vector<1x12x12xbf16> to vector<12x12xbf16>
    %c0_30 = arith.constant 0 : index
    %c0_31 = arith.constant 0 : index
    %c28 = arith.constant 28 : index
    %33 = vector.load %arg1[%c0_30, %c0_31, %c28] : memref<1x12x156xbf16, #tpu.memory_space<vmem>>, vector<1x12x96xbf16>
    %34 = vector.shape_cast %33 : vector<1x12x96xbf16> to vector<12x96xbf16>
    %cst_32 = arith.constant dense<0.000000e+00> : vector<12x96xf32>
    %35 = tpu.matmul %32, %34, %cst_32 {dimension_numbers = #tpu.dot_dimension_numbers<[1], [0], [0], [1], [0, 0, 1, 1], [], []>} : vector<12x12xbf16>, vector<12x96xbf16>, vector<12x96xf32> -> vector<12x96xf32>
    %36 = arith.addf %30, %35 : vector<12x96xf32>
    %c6 = arith.constant 6 : index
    %c0_33 = arith.constant 0 : index
    %c0_34 = arith.constant 0 : index
    %37 = vector.load %arg2[%c6, %c0_33, %c0_34] : memref<9x12x12xbf16, #tpu.memory_space<vmem>>, vector<1x12x12xbf16>
    %38 = vector.shape_cast %37 : vector<1x12x12xbf16> to vector<12x12xbf16>
    %c0_35 = arith.constant 0 : index
    %c0_36 = arith.constant 0 : index
    %c48 = arith.constant 48 : index
    %39 = vector.load %arg1[%c0_35, %c0_36, %c48] : memref<1x12x156xbf16, #tpu.memory_space<vmem>>, vector<1x12x96xbf16>
    %40 = vector.shape_cast %39 : vector<1x12x96xbf16> to vector<12x96xbf16>
    %cst_37 = arith.constant dense<0.000000e+00> : vector<12x96xf32>
    %41 = tpu.matmul %38, %40, %cst_37 {dimension_numbers = #tpu.dot_dimension_numbers<[1], [0], [0], [1], [0, 0, 1, 1], [], []>} : vector<12x12xbf16>, vector<12x96xbf16>, vector<12x96xf32> -> vector<12x96xf32>
    %42 = arith.addf %36, %41 : vector<12x96xf32>
    %c7 = arith.constant 7 : index
    %c0_38 = arith.constant 0 : index
    %c0_39 = arith.constant 0 : index
    %43 = vector.load %arg2[%c7, %c0_38, %c0_39] : memref<9x12x12xbf16, #tpu.memory_space<vmem>>, vector<1x12x12xbf16>
    %44 = vector.shape_cast %43 : vector<1x12x12xbf16> to vector<12x12xbf16>
    %c0_40 = arith.constant 0 : index
    %c0_41 = arith.constant 0 : index
    %c50 = arith.constant 50 : index
    %45 = vector.load %arg1[%c0_40, %c0_41, %c50] : memref<1x12x156xbf16, #tpu.memory_space<vmem>>, vector<1x12x96xbf16>
    %46 = vector.shape_cast %45 : vector<1x12x96xbf16> to vector<12x96xbf16>
    %cst_42 = arith.constant dense<0.000000e+00> : vector<12x96xf32>
    %47 = tpu.matmul %44, %46, %cst_42 {dimension_numbers = #tpu.dot_dimension_numbers<[1], [0], [0], [1], [0, 0, 1, 1], [], []>} : vector<12x12xbf16>, vector<12x96xbf16>, vector<12x96xf32> -> vector<12x96xf32>
    %48 = arith.addf %42, %47 : vector<12x96xf32>
    %c8 = arith.constant 8 : index
    %c0_43 = arith.constant 0 : index
    %c0_44 = arith.constant 0 : index
    %49 = vector.load %arg2[%c8, %c0_43, %c0_44] : memref<9x12x12xbf16, #tpu.memory_space<vmem>>, vector<1x12x12xbf16>
    %50 = vector.shape_cast %49 : vector<1x12x12xbf16> to vector<12x12xbf16>
    %c0_45 = arith.constant 0 : index
    %c0_46 = arith.constant 0 : index
    %c52 = arith.constant 52 : index
    %51 = vector.load %arg1[%c0_45, %c0_46, %c52] : memref<1x12x156xbf16, #tpu.memory_space<vmem>>, vector<1x12x96xbf16>
    %52 = vector.shape_cast %51 : vector<1x12x96xbf16> to vector<12x96xbf16>
    %cst_47 = arith.constant dense<0.000000e+00> : vector<12x96xf32>
    %53 = tpu.matmul %50, %52, %cst_47 {dimension_numbers = #tpu.dot_dimension_numbers<[1], [0], [0], [1], [0, 0, 1, 1], [], []>} : vector<12x12xbf16>, vector<12x96xbf16>, vector<12x96xf32> -> vector<12x96xf32>
    %54 = arith.addf %48, %53 : vector<12x96xf32>
    %c0_48 = arith.constant 0 : index
    %c0_49 = arith.constant 0 : index
    %55 = vector.load %arg3[%c0_48, %c0_49] : memref<12x1xf32, #tpu.memory_space<vmem>>, vector<12x1xf32>
    %56 = vector.broadcast %55 : vector<12x1xf32> to vector<12x96xf32>
    %57 = arith.addf %54, %56 : vector<12x96xf32>
    %cst_50 = arith.constant 0.000000e+00 : f32
    %58 = vector.broadcast %cst_50 : f32 to vector<12x96xf32>
    %59 = arith.maximumf %57, %58 : vector<12x96xf32>
    %60 = arith.truncf %59 : vector<12x96xf32> to vector<12x96xbf16>
    %c0_51 = arith.constant 0 : index
    %c0_52 = arith.constant 0 : index
    %c0_53 = arith.constant 0 : index
    %61 = vector.load %arg4[%c0_51, %c0_52, %c0_53] : memref<1x12x96xbf16, #tpu.memory_space<vmem>>, vector<1x12x96xbf16>
    %62 = vector.shape_cast %61 : vector<1x12x96xbf16> to vector<12x96xbf16>
    %63 = vector.shape_cast %60 : vector<12x96xbf16> to vector<1x12x96xbf16>
    tpu.vector_store %arg4[%c0_51, %c0_52, %c0_53], %63 {strides = array<i32>} : memref<1x12x96xbf16, #tpu.memory_space<vmem>>, vector<1x12x96xbf16>,
    return
  }
  func.func @transform_0(%arg0: i32) -> (i32, i32, i32) {
    %c0_i32 = arith.constant 0 : i32
    %c0_i32_0 = arith.constant 0 : i32
    %c0_i32_1 = arith.constant 0 : i32
    return %arg0, %c0_i32, %c0_i32_0 : i32, i32, i32
  }
  func.func @transform_1(%arg0: i32) -> (i32, i32, i32) {
    %c0_i32 = arith.constant 0 : i32
    %c0_i32_0 = arith.constant 0 : i32
    %c0_i32_1 = arith.constant 0 : i32
    %c0_i32_2 = arith.constant 0 : i32
    return %c0_i32, %c0_i32_0, %c0_i32_1 : i32, i32, i32
  }
  func.func @transform_2(%arg0: i32) -> (i32, i32) {
    %c0_i32 = arith.constant 0 : i32
    %c0_i32_0 = arith.constant 0 : i32
    %c0_i32_1 = arith.constant 0 : i32
    return %c0_i32, %c0_i32_0 : i32, i32
  }
  func.func @transform_3(%arg0: i32) -> (i32, i32, i32) {
    %c0_i32 = arith.constant 0 : i32
    %c0_i32_0 = arith.constant 0 : i32
    %c0_i32_1 = arith.constant 0 : i32
    return %arg0, %c0_i32, %c0_i32_0 : i32, i32, i32
  }
}

module attributes {stable_mosaic.version = 11 : i64} {
  func.func @kernel(%arg0: i32, %arg1: memref<1x12x110xbf16, #tpu.memory_space<vmem>>, %arg2: memref<1x12x110xbf16, #tpu.memory_space<vmem>>, %arg3: memref<9x12x12xbf16, #tpu.memory_space<vmem>>, %arg4: memref<9x12x12xbf16, #tpu.memory_space<vmem>>, %arg5: memref<12x1xf32, #tpu.memory_space<vmem>>, %arg6: memref<1x12x80xbf16, #tpu.memory_space<vmem>>) attributes {dimension_semantics = [#tpu.dimension_semantics<parallel>], iteration_bounds = array<i64: 2>, scalar_prefetch = 0 : i64, scratch_operands = 0 : i64, tpu.core_type = #tpu.core_type<tc>, window_params = [{transform_indices = @transform_0, window_bounds = array<i64: 1, 12, 110>}, {transform_indices = @transform_1, window_bounds = array<i64: 1, 12, 110>}, {pipeline_mode = #tpu.pipeline_mode<synchronous>, transform_indices = @transform_2, window_bounds = array<i64: 9, 12, 12>}, {pipeline_mode = #tpu.pipeline_mode<synchronous>, transform_indices = @transform_3, window_bounds = array<i64: 9, 12, 12>}, {pipeline_mode = #tpu.pipeline_mode<synchronous>, transform_indices = @transform_4, window_bounds = array<i64: 12, 1>}, {transform_indices = @transform_5, window_bounds = array<i64: 1, 12, 80>}]} {
    %cst = arith.constant 0.000000e+00 : f32
    %0 = vector.broadcast %cst : f32 to vector<12x80xf32>
    %c0 = arith.constant 0 : index
    %c0_0 = arith.constant 0 : index
    %c0_1 = arith.constant 0 : index
    %1 = vector.load %arg3[%c0, %c0_0, %c0_1] : memref<9x12x12xbf16, #tpu.memory_space<vmem>>, vector<1x12x12xbf16>
    %2 = vector.shape_cast %1 : vector<1x12x12xbf16> to vector<12x12xbf16>
    %c0_2 = arith.constant 0 : index
    %c0_3 = arith.constant 0 : index
    %c0_4 = arith.constant 0 : index
    %3 = vector.load %arg1[%c0_2, %c0_3, %c0_4] : memref<1x12x110xbf16, #tpu.memory_space<vmem>>, vector<1x12x80xbf16>
    %4 = vector.shape_cast %3 : vector<1x12x80xbf16> to vector<12x80xbf16>
    %cst_5 = arith.constant dense<0.000000e+00> : vector<12x80xf32>
    %5 = tpu.matmul %2, %4, %cst_5 {dimension_numbers = #tpu.dot_dimension_numbers<[1], [0], [0], [1], [0, 0, 1, 1], [], []>} : vector<12x12xbf16>, vector<12x80xbf16>, vector<12x80xf32> -> vector<12x80xf32>
    %6 = arith.addf %0, %5 : vector<12x80xf32>
    %c1 = arith.constant 1 : index
    %c0_6 = arith.constant 0 : index
    %c0_7 = arith.constant 0 : index
    %7 = vector.load %arg3[%c1, %c0_6, %c0_7] : memref<9x12x12xbf16, #tpu.memory_space<vmem>>, vector<1x12x12xbf16>
    %8 = vector.shape_cast %7 : vector<1x12x12xbf16> to vector<12x12xbf16>
    %c0_8 = arith.constant 0 : index
    %c0_9 = arith.constant 0 : index
    %c1_10 = arith.constant 1 : index
    %9 = vector.load %arg1[%c0_8, %c0_9, %c1_10] : memref<1x12x110xbf16, #tpu.memory_space<vmem>>, vector<1x12x80xbf16>
    %10 = vector.shape_cast %9 : vector<1x12x80xbf16> to vector<12x80xbf16>
    %cst_11 = arith.constant dense<0.000000e+00> : vector<12x80xf32>
    %11 = tpu.matmul %8, %10, %cst_11 {dimension_numbers = #tpu.dot_dimension_numbers<[1], [0], [0], [1], [0, 0, 1, 1], [], []>} : vector<12x12xbf16>, vector<12x80xbf16>, vector<12x80xf32> -> vector<12x80xf32>
    %12 = arith.addf %6, %11 : vector<12x80xf32>
    %c2 = arith.constant 2 : index
    %c0_12 = arith.constant 0 : index
    %c0_13 = arith.constant 0 : index
    %13 = vector.load %arg3[%c2, %c0_12, %c0_13] : memref<9x12x12xbf16, #tpu.memory_space<vmem>>, vector<1x12x12xbf16>
    %14 = vector.shape_cast %13 : vector<1x12x12xbf16> to vector<12x12xbf16>
    %c0_14 = arith.constant 0 : index
    %c0_15 = arith.constant 0 : index
    %c2_16 = arith.constant 2 : index
    %15 = vector.load %arg1[%c0_14, %c0_15, %c2_16] : memref<1x12x110xbf16, #tpu.memory_space<vmem>>, vector<1x12x80xbf16>
    %16 = vector.shape_cast %15 : vector<1x12x80xbf16> to vector<12x80xbf16>
    %cst_17 = arith.constant dense<0.000000e+00> : vector<12x80xf32>
    %17 = tpu.matmul %14, %16, %cst_17 {dimension_numbers = #tpu.dot_dimension_numbers<[1], [0], [0], [1], [0, 0, 1, 1], [], []>} : vector<12x12xbf16>, vector<12x80xbf16>, vector<12x80xf32> -> vector<12x80xf32>
    %18 = arith.addf %12, %17 : vector<12x80xf32>
    %c3 = arith.constant 3 : index
    %c0_18 = arith.constant 0 : index
    %c0_19 = arith.constant 0 : index
    %19 = vector.load %arg3[%c3, %c0_18, %c0_19] : memref<9x12x12xbf16, #tpu.memory_space<vmem>>, vector<1x12x12xbf16>
    %20 = vector.shape_cast %19 : vector<1x12x12xbf16> to vector<12x12xbf16>
    %c0_20 = arith.constant 0 : index
    %c0_21 = arith.constant 0 : index
    %c10 = arith.constant 10 : index
    %21 = vector.load %arg1[%c0_20, %c0_21, %c10] : memref<1x12x110xbf16, #tpu.memory_space<vmem>>, vector<1x12x80xbf16>
    %22 = vector.shape_cast %21 : vector<1x12x80xbf16> to vector<12x80xbf16>
    %cst_22 = arith.constant dense<0.000000e+00> : vector<12x80xf32>
    %23 = tpu.matmul %20, %22, %cst_22 {dimension_numbers = #tpu.dot_dimension_numbers<[1], [0], [0], [1], [0, 0, 1, 1], [], []>} : vector<12x12xbf16>, vector<12x80xbf16>, vector<12x80xf32> -> vector<12x80xf32>
    %24 = arith.addf %18, %23 : vector<12x80xf32>
    %c4 = arith.constant 4 : index
    %c0_23 = arith.constant 0 : index
    %c0_24 = arith.constant 0 : index
    %25 = vector.load %arg3[%c4, %c0_23, %c0_24] : memref<9x12x12xbf16, #tpu.memory_space<vmem>>, vector<1x12x12xbf16>
    %26 = vector.shape_cast %25 : vector<1x12x12xbf16> to vector<12x12xbf16>
    %c0_25 = arith.constant 0 : index
    %c0_26 = arith.constant 0 : index
    %c11 = arith.constant 11 : index
    %27 = vector.load %arg1[%c0_25, %c0_26, %c11] : memref<1x12x110xbf16, #tpu.memory_space<vmem>>, vector<1x12x80xbf16>
    %28 = vector.shape_cast %27 : vector<1x12x80xbf16> to vector<12x80xbf16>
    %cst_27 = arith.constant dense<0.000000e+00> : vector<12x80xf32>
    %29 = tpu.matmul %26, %28, %cst_27 {dimension_numbers = #tpu.dot_dimension_numbers<[1], [0], [0], [1], [0, 0, 1, 1], [], []>} : vector<12x12xbf16>, vector<12x80xbf16>, vector<12x80xf32> -> vector<12x80xf32>
    %30 = arith.addf %24, %29 : vector<12x80xf32>
    %c5 = arith.constant 5 : index
    %c0_28 = arith.constant 0 : index
    %c0_29 = arith.constant 0 : index
    %31 = vector.load %arg3[%c5, %c0_28, %c0_29] : memref<9x12x12xbf16, #tpu.memory_space<vmem>>, vector<1x12x12xbf16>
    %32 = vector.shape_cast %31 : vector<1x12x12xbf16> to vector<12x12xbf16>
    %c0_30 = arith.constant 0 : index
    %c0_31 = arith.constant 0 : index
    %c12 = arith.constant 12 : index
    %33 = vector.load %arg1[%c0_30, %c0_31, %c12] : memref<1x12x110xbf16, #tpu.memory_space<vmem>>, vector<1x12x80xbf16>
    %34 = vector.shape_cast %33 : vector<1x12x80xbf16> to vector<12x80xbf16>
    %cst_32 = arith.constant dense<0.000000e+00> : vector<12x80xf32>
    %35 = tpu.matmul %32, %34, %cst_32 {dimension_numbers = #tpu.dot_dimension_numbers<[1], [0], [0], [1], [0, 0, 1, 1], [], []>} : vector<12x12xbf16>, vector<12x80xbf16>, vector<12x80xf32> -> vector<12x80xf32>
    %36 = arith.addf %30, %35 : vector<12x80xf32>
    %c6 = arith.constant 6 : index
    %c0_33 = arith.constant 0 : index
    %c0_34 = arith.constant 0 : index
    %37 = vector.load %arg3[%c6, %c0_33, %c0_34] : memref<9x12x12xbf16, #tpu.memory_space<vmem>>, vector<1x12x12xbf16>
    %38 = vector.shape_cast %37 : vector<1x12x12xbf16> to vector<12x12xbf16>
    %c0_35 = arith.constant 0 : index
    %c0_36 = arith.constant 0 : index
    %c20 = arith.constant 20 : index
    %39 = vector.load %arg1[%c0_35, %c0_36, %c20] : memref<1x12x110xbf16, #tpu.memory_space<vmem>>, vector<1x12x80xbf16>
    %40 = vector.shape_cast %39 : vector<1x12x80xbf16> to vector<12x80xbf16>
    %cst_37 = arith.constant dense<0.000000e+00> : vector<12x80xf32>
    %41 = tpu.matmul %38, %40, %cst_37 {dimension_numbers = #tpu.dot_dimension_numbers<[1], [0], [0], [1], [0, 0, 1, 1], [], []>} : vector<12x12xbf16>, vector<12x80xbf16>, vector<12x80xf32> -> vector<12x80xf32>
    %42 = arith.addf %36, %41 : vector<12x80xf32>
    %c7 = arith.constant 7 : index
    %c0_38 = arith.constant 0 : index
    %c0_39 = arith.constant 0 : index
    %43 = vector.load %arg3[%c7, %c0_38, %c0_39] : memref<9x12x12xbf16, #tpu.memory_space<vmem>>, vector<1x12x12xbf16>
    %44 = vector.shape_cast %43 : vector<1x12x12xbf16> to vector<12x12xbf16>
    %c0_40 = arith.constant 0 : index
    %c0_41 = arith.constant 0 : index
    %c21 = arith.constant 21 : index
    %45 = vector.load %arg1[%c0_40, %c0_41, %c21] : memref<1x12x110xbf16, #tpu.memory_space<vmem>>, vector<1x12x80xbf16>
    %46 = vector.shape_cast %45 : vector<1x12x80xbf16> to vector<12x80xbf16>
    %cst_42 = arith.constant dense<0.000000e+00> : vector<12x80xf32>
    %47 = tpu.matmul %44, %46, %cst_42 {dimension_numbers = #tpu.dot_dimension_numbers<[1], [0], [0], [1], [0, 0, 1, 1], [], []>} : vector<12x12xbf16>, vector<12x80xbf16>, vector<12x80xf32> -> vector<12x80xf32>
    %48 = arith.addf %42, %47 : vector<12x80xf32>
    %c8 = arith.constant 8 : index
    %c0_43 = arith.constant 0 : index
    %c0_44 = arith.constant 0 : index
    %49 = vector.load %arg3[%c8, %c0_43, %c0_44] : memref<9x12x12xbf16, #tpu.memory_space<vmem>>, vector<1x12x12xbf16>
    %50 = vector.shape_cast %49 : vector<1x12x12xbf16> to vector<12x12xbf16>
    %c0_45 = arith.constant 0 : index
    %c0_46 = arith.constant 0 : index
    %c22 = arith.constant 22 : index
    %51 = vector.load %arg1[%c0_45, %c0_46, %c22] : memref<1x12x110xbf16, #tpu.memory_space<vmem>>, vector<1x12x80xbf16>
    %52 = vector.shape_cast %51 : vector<1x12x80xbf16> to vector<12x80xbf16>
    %cst_47 = arith.constant dense<0.000000e+00> : vector<12x80xf32>
    %53 = tpu.matmul %50, %52, %cst_47 {dimension_numbers = #tpu.dot_dimension_numbers<[1], [0], [0], [1], [0, 0, 1, 1], [], []>} : vector<12x12xbf16>, vector<12x80xbf16>, vector<12x80xf32> -> vector<12x80xf32>
    %54 = arith.addf %48, %53 : vector<12x80xf32>
    %c0_48 = arith.constant 0 : index
    %c0_49 = arith.constant 0 : index
    %c0_50 = arith.constant 0 : index
    %55 = vector.load %arg4[%c0_48, %c0_49, %c0_50] : memref<9x12x12xbf16, #tpu.memory_space<vmem>>, vector<1x12x12xbf16>
    %56 = vector.shape_cast %55 : vector<1x12x12xbf16> to vector<12x12xbf16>
    %c0_51 = arith.constant 0 : index
    %c0_52 = arith.constant 0 : index
    %c0_53 = arith.constant 0 : index
    %57 = vector.load %arg2[%c0_51, %c0_52, %c0_53] : memref<1x12x110xbf16, #tpu.memory_space<vmem>>, vector<1x12x80xbf16>
    %58 = vector.shape_cast %57 : vector<1x12x80xbf16> to vector<12x80xbf16>
    %cst_54 = arith.constant dense<0.000000e+00> : vector<12x80xf32>
    %59 = tpu.matmul %56, %58, %cst_54 {dimension_numbers = #tpu.dot_dimension_numbers<[1], [0], [0], [1], [0, 0, 1, 1], [], []>} : vector<12x12xbf16>, vector<12x80xbf16>, vector<12x80xf32> -> vector<12x80xf32>
    %60 = arith.addf %54, %59 : vector<12x80xf32>
    %c1_55 = arith.constant 1 : index
    %c0_56 = arith.constant 0 : index
    %c0_57 = arith.constant 0 : index
    %61 = vector.load %arg4[%c1_55, %c0_56, %c0_57] : memref<9x12x12xbf16, #tpu.memory_space<vmem>>, vector<1x12x12xbf16>
    %62 = vector.shape_cast %61 : vector<1x12x12xbf16> to vector<12x12xbf16>
    %c0_58 = arith.constant 0 : index
    %c0_59 = arith.constant 0 : index
    %c1_60 = arith.constant 1 : index
    %63 = vector.load %arg2[%c0_58, %c0_59, %c1_60] : memref<1x12x110xbf16, #tpu.memory_space<vmem>>, vector<1x12x80xbf16>
    %64 = vector.shape_cast %63 : vector<1x12x80xbf16> to vector<12x80xbf16>
    %cst_61 = arith.constant dense<0.000000e+00> : vector<12x80xf32>
    %65 = tpu.matmul %62, %64, %cst_61 {dimension_numbers = #tpu.dot_dimension_numbers<[1], [0], [0], [1], [0, 0, 1, 1], [], []>} : vector<12x12xbf16>, vector<12x80xbf16>, vector<12x80xf32> -> vector<12x80xf32>
    %66 = arith.addf %60, %65 : vector<12x80xf32>
    %c2_62 = arith.constant 2 : index
    %c0_63 = arith.constant 0 : index
    %c0_64 = arith.constant 0 : index
    %67 = vector.load %arg4[%c2_62, %c0_63, %c0_64] : memref<9x12x12xbf16, #tpu.memory_space<vmem>>, vector<1x12x12xbf16>
    %68 = vector.shape_cast %67 : vector<1x12x12xbf16> to vector<12x12xbf16>
    %c0_65 = arith.constant 0 : index
    %c0_66 = arith.constant 0 : index
    %c2_67 = arith.constant 2 : index
    %69 = vector.load %arg2[%c0_65, %c0_66, %c2_67] : memref<1x12x110xbf16, #tpu.memory_space<vmem>>, vector<1x12x80xbf16>
    %70 = vector.shape_cast %69 : vector<1x12x80xbf16> to vector<12x80xbf16>
    %cst_68 = arith.constant dense<0.000000e+00> : vector<12x80xf32>
    %71 = tpu.matmul %68, %70, %cst_68 {dimension_numbers = #tpu.dot_dimension_numbers<[1], [0], [0], [1], [0, 0, 1, 1], [], []>} : vector<12x12xbf16>, vector<12x80xbf16>, vector<12x80xf32> -> vector<12x80xf32>
    %72 = arith.addf %66, %71 : vector<12x80xf32>
    %c3_69 = arith.constant 3 : index
    %c0_70 = arith.constant 0 : index
    %c0_71 = arith.constant 0 : index
    %73 = vector.load %arg4[%c3_69, %c0_70, %c0_71] : memref<9x12x12xbf16, #tpu.memory_space<vmem>>, vector<1x12x12xbf16>
    %74 = vector.shape_cast %73 : vector<1x12x12xbf16> to vector<12x12xbf16>
    %c0_72 = arith.constant 0 : index
    %c0_73 = arith.constant 0 : index
    %c10_74 = arith.constant 10 : index
    %75 = vector.load %arg2[%c0_72, %c0_73, %c10_74] : memref<1x12x110xbf16, #tpu.memory_space<vmem>>, vector<1x12x80xbf16>
    %76 = vector.shape_cast %75 : vector<1x12x80xbf16> to vector<12x80xbf16>
    %cst_75 = arith.constant dense<0.000000e+00> : vector<12x80xf32>
    %77 = tpu.matmul %74, %76, %cst_75 {dimension_numbers = #tpu.dot_dimension_numbers<[1], [0], [0], [1], [0, 0, 1, 1], [], []>} : vector<12x12xbf16>, vector<12x80xbf16>, vector<12x80xf32> -> vector<12x80xf32>
    %78 = arith.addf %72, %77 : vector<12x80xf32>
    %c4_76 = arith.constant 4 : index
    %c0_77 = arith.constant 0 : index
    %c0_78 = arith.constant 0 : index
    %79 = vector.load %arg4[%c4_76, %c0_77, %c0_78] : memref<9x12x12xbf16, #tpu.memory_space<vmem>>, vector<1x12x12xbf16>
    %80 = vector.shape_cast %79 : vector<1x12x12xbf16> to vector<12x12xbf16>
    %c0_79 = arith.constant 0 : index
    %c0_80 = arith.constant 0 : index
    %c11_81 = arith.constant 11 : index
    %81 = vector.load %arg2[%c0_79, %c0_80, %c11_81] : memref<1x12x110xbf16, #tpu.memory_space<vmem>>, vector<1x12x80xbf16>
    %82 = vector.shape_cast %81 : vector<1x12x80xbf16> to vector<12x80xbf16>
    %cst_82 = arith.constant dense<0.000000e+00> : vector<12x80xf32>
    %83 = tpu.matmul %80, %82, %cst_82 {dimension_numbers = #tpu.dot_dimension_numbers<[1], [0], [0], [1], [0, 0, 1, 1], [], []>} : vector<12x12xbf16>, vector<12x80xbf16>, vector<12x80xf32> -> vector<12x80xf32>
    %84 = arith.addf %78, %83 : vector<12x80xf32>
    %c5_83 = arith.constant 5 : index
    %c0_84 = arith.constant 0 : index
    %c0_85 = arith.constant 0 : index
    %85 = vector.load %arg4[%c5_83, %c0_84, %c0_85] : memref<9x12x12xbf16, #tpu.memory_space<vmem>>, vector<1x12x12xbf16>
    %86 = vector.shape_cast %85 : vector<1x12x12xbf16> to vector<12x12xbf16>
    %c0_86 = arith.constant 0 : index
    %c0_87 = arith.constant 0 : index
    %c12_88 = arith.constant 12 : index
    %87 = vector.load %arg2[%c0_86, %c0_87, %c12_88] : memref<1x12x110xbf16, #tpu.memory_space<vmem>>, vector<1x12x80xbf16>
    %88 = vector.shape_cast %87 : vector<1x12x80xbf16> to vector<12x80xbf16>
    %cst_89 = arith.constant dense<0.000000e+00> : vector<12x80xf32>
    %89 = tpu.matmul %86, %88, %cst_89 {dimension_numbers = #tpu.dot_dimension_numbers<[1], [0], [0], [1], [0, 0, 1, 1], [], []>} : vector<12x12xbf16>, vector<12x80xbf16>, vector<12x80xf32> -> vector<12x80xf32>
    %90 = arith.addf %84, %89 : vector<12x80xf32>
    %c6_90 = arith.constant 6 : index
    %c0_91 = arith.constant 0 : index
    %c0_92 = arith.constant 0 : index
    %91 = vector.load %arg4[%c6_90, %c0_91, %c0_92] : memref<9x12x12xbf16, #tpu.memory_space<vmem>>, vector<1x12x12xbf16>
    %92 = vector.shape_cast %91 : vector<1x12x12xbf16> to vector<12x12xbf16>
    %c0_93 = arith.constant 0 : index
    %c0_94 = arith.constant 0 : index
    %c20_95 = arith.constant 20 : index
    %93 = vector.load %arg2[%c0_93, %c0_94, %c20_95] : memref<1x12x110xbf16, #tpu.memory_space<vmem>>, vector<1x12x80xbf16>
    %94 = vector.shape_cast %93 : vector<1x12x80xbf16> to vector<12x80xbf16>
    %cst_96 = arith.constant dense<0.000000e+00> : vector<12x80xf32>
    %95 = tpu.matmul %92, %94, %cst_96 {dimension_numbers = #tpu.dot_dimension_numbers<[1], [0], [0], [1], [0, 0, 1, 1], [], []>} : vector<12x12xbf16>, vector<12x80xbf16>, vector<12x80xf32> -> vector<12x80xf32>
    %96 = arith.addf %90, %95 : vector<12x80xf32>
    %c7_97 = arith.constant 7 : index
    %c0_98 = arith.constant 0 : index
    %c0_99 = arith.constant 0 : index
    %97 = vector.load %arg4[%c7_97, %c0_98, %c0_99] : memref<9x12x12xbf16, #tpu.memory_space<vmem>>, vector<1x12x12xbf16>
    %98 = vector.shape_cast %97 : vector<1x12x12xbf16> to vector<12x12xbf16>
    %c0_100 = arith.constant 0 : index
    %c0_101 = arith.constant 0 : index
    %c21_102 = arith.constant 21 : index
    %99 = vector.load %arg2[%c0_100, %c0_101, %c21_102] : memref<1x12x110xbf16, #tpu.memory_space<vmem>>, vector<1x12x80xbf16>
    %100 = vector.shape_cast %99 : vector<1x12x80xbf16> to vector<12x80xbf16>
    %cst_103 = arith.constant dense<0.000000e+00> : vector<12x80xf32>
    %101 = tpu.matmul %98, %100, %cst_103 {dimension_numbers = #tpu.dot_dimension_numbers<[1], [0], [0], [1], [0, 0, 1, 1], [], []>} : vector<12x12xbf16>, vector<12x80xbf16>, vector<12x80xf32> -> vector<12x80xf32>
    %102 = arith.addf %96, %101 : vector<12x80xf32>
    %c8_104 = arith.constant 8 : index
    %c0_105 = arith.constant 0 : index
    %c0_106 = arith.constant 0 : index
    %103 = vector.load %arg4[%c8_104, %c0_105, %c0_106] : memref<9x12x12xbf16, #tpu.memory_space<vmem>>, vector<1x12x12xbf16>
    %104 = vector.shape_cast %103 : vector<1x12x12xbf16> to vector<12x12xbf16>
    %c0_107 = arith.constant 0 : index
    %c0_108 = arith.constant 0 : index
    %c22_109 = arith.constant 22 : index
    %105 = vector.load %arg2[%c0_107, %c0_108, %c22_109] : memref<1x12x110xbf16, #tpu.memory_space<vmem>>, vector<1x12x80xbf16>
    %106 = vector.shape_cast %105 : vector<1x12x80xbf16> to vector<12x80xbf16>
    %cst_110 = arith.constant dense<0.000000e+00> : vector<12x80xf32>
    %107 = tpu.matmul %104, %106, %cst_110 {dimension_numbers = #tpu.dot_dimension_numbers<[1], [0], [0], [1], [0, 0, 1, 1], [], []>} : vector<12x12xbf16>, vector<12x80xbf16>, vector<12x80xf32> -> vector<12x80xf32>
    %108 = arith.addf %102, %107 : vector<12x80xf32>
    %c0_111 = arith.constant 0 : index
    %c0_112 = arith.constant 0 : index
    %109 = vector.load %arg5[%c0_111, %c0_112] : memref<12x1xf32, #tpu.memory_space<vmem>>, vector<12x1xf32>
    %110 = vector.broadcast %109 : vector<12x1xf32> to vector<12x80xf32>
    %111 = arith.addf %108, %110 : vector<12x80xf32>
    %cst_113 = arith.constant 0.000000e+00 : f32
    %112 = vector.broadcast %cst_113 : f32 to vector<12x80xf32>
    %113 = arith.maximumf %111, %112 : vector<12x80xf32>
    %114 = arith.truncf %113 : vector<12x80xf32> to vector<12x80xbf16>
    %c0_114 = arith.constant 0 : index
    %c0_115 = arith.constant 0 : index
    %c0_116 = arith.constant 0 : index
    %115 = vector.load %arg6[%c0_114, %c0_115, %c0_116] : memref<1x12x80xbf16, #tpu.memory_space<vmem>>, vector<1x12x80xbf16>
    %116 = vector.shape_cast %115 : vector<1x12x80xbf16> to vector<12x80xbf16>
    %117 = vector.shape_cast %114 : vector<12x80xbf16> to vector<1x12x80xbf16>
    tpu.vector_store %arg6[%c0_114, %c0_115, %c0_116], %117 {strides = array<i32>} : memref<1x12x80xbf16, #tpu.memory_space<vmem>>, vector<1x12x80xbf16>,
    return
  }
  func.func @transform_0(%arg0: i32) -> (i32, i32, i32) {
    %c0_i32 = arith.constant 0 : i32
    %c0_i32_0 = arith.constant 0 : i32
    %c0_i32_1 = arith.constant 0 : i32
    return %arg0, %c0_i32, %c0_i32_0 : i32, i32, i32
  }
  func.func @transform_1(%arg0: i32) -> (i32, i32, i32) {
    %c0_i32 = arith.constant 0 : i32
    %c0_i32_0 = arith.constant 0 : i32
    %c0_i32_1 = arith.constant 0 : i32
    return %arg0, %c0_i32, %c0_i32_0 : i32, i32, i32
  }
  func.func @transform_2(%arg0: i32) -> (i32, i32, i32) {
    %c0_i32 = arith.constant 0 : i32
    %c0_i32_0 = arith.constant 0 : i32
    %c0_i32_1 = arith.constant 0 : i32
    %c0_i32_2 = arith.constant 0 : i32
    return %c0_i32, %c0_i32_0, %c0_i32_1 : i32, i32, i32
  }
  func.func @transform_3(%arg0: i32) -> (i32, i32, i32) {
    %c0_i32 = arith.constant 0 : i32
    %c0_i32_0 = arith.constant 0 : i32
    %c0_i32_1 = arith.constant 0 : i32
    %c0_i32_2 = arith.constant 0 : i32
    return %c0_i32, %c0_i32_0, %c0_i32_1 : i32, i32, i32
  }
  func.func @transform_4(%arg0: i32) -> (i32, i32) {
    %c0_i32 = arith.constant 0 : i32
    %c0_i32_0 = arith.constant 0 : i32
    %c0_i32_1 = arith.constant 0 : i32
    return %c0_i32, %c0_i32_0 : i32, i32
  }
  func.func @transform_5(%arg0: i32) -> (i32, i32, i32) {
    %c0_i32 = arith.constant 0 : i32
    %c0_i32_0 = arith.constant 0 : i32
    %c0_i32_1 = arith.constant 0 : i32
    return %arg0, %c0_i32, %c0_i32_0 : i32, i32, i32
  }
}

module attributes {stable_mosaic.version = 11 : i64} {
  func.func @kernel(%arg0: i32, %arg1: memref<1x12x342xbf16, #tpu.memory_space<vmem>>, %arg2: memref<1x12x342xbf16, #tpu.memory_space<vmem>>, %arg3: memref<9x3x12xbf16, #tpu.memory_space<vmem>>, %arg4: memref<9x3x12xbf16, #tpu.memory_space<vmem>>, %arg5: memref<3x1xf32, #tpu.memory_space<vmem>>, %arg6: memref<1x3x288xbf16, #tpu.memory_space<vmem>>, %arg7: memref<1x3x288xbf16, #tpu.memory_space<vmem>>) attributes {dimension_semantics = [#tpu.dimension_semantics<parallel>], iteration_bounds = array<i64: 2>, scalar_prefetch = 0 : i64, scratch_operands = 0 : i64, tpu.core_type = #tpu.core_type<tc>, window_params = [{transform_indices = @transform_0, window_bounds = array<i64: 1, 12, 342>}, {transform_indices = @transform_1, window_bounds = array<i64: 1, 12, 342>}, {pipeline_mode = #tpu.pipeline_mode<synchronous>, transform_indices = @transform_2, window_bounds = array<i64: 9, 3, 12>}, {pipeline_mode = #tpu.pipeline_mode<synchronous>, transform_indices = @transform_3, window_bounds = array<i64: 9, 3, 12>}, {pipeline_mode = #tpu.pipeline_mode<synchronous>, transform_indices = @transform_4, window_bounds = array<i64: 3, 1>}, {transform_indices = @transform_5, window_bounds = array<i64: 1, 3, 288>}, {transform_indices = @transform_6, window_bounds = array<i64: 1, 3, 288>}]} {
    %cst = arith.constant 0.000000e+00 : f32
    %0 = vector.broadcast %cst : f32 to vector<3x288xf32>
    %c0 = arith.constant 0 : index
    %c0_0 = arith.constant 0 : index
    %c0_1 = arith.constant 0 : index
    %1 = vector.load %arg3[%c0, %c0_0, %c0_1] : memref<9x3x12xbf16, #tpu.memory_space<vmem>>, vector<1x3x12xbf16>
    %2 = vector.shape_cast %1 : vector<1x3x12xbf16> to vector<3x12xbf16>
    %c0_2 = arith.constant 0 : index
    %c0_3 = arith.constant 0 : index
    %c0_4 = arith.constant 0 : index
    %3 = vector.load %arg1[%c0_2, %c0_3, %c0_4] : memref<1x12x342xbf16, #tpu.memory_space<vmem>>, vector<1x12x288xbf16>
    %4 = vector.shape_cast %3 : vector<1x12x288xbf16> to vector<12x288xbf16>
    %cst_5 = arith.constant dense<0.000000e+00> : vector<3x288xf32>
    %5 = tpu.matmul %2, %4, %cst_5 {dimension_numbers = #tpu.dot_dimension_numbers<[1], [0], [0], [1], [0, 0, 1, 1], [], []>} : vector<3x12xbf16>, vector<12x288xbf16>, vector<3x288xf32> -> vector<3x288xf32>
    %6 = arith.addf %0, %5 : vector<3x288xf32>
    %c1 = arith.constant 1 : index
    %c0_6 = arith.constant 0 : index
    %c0_7 = arith.constant 0 : index
    %7 = vector.load %arg3[%c1, %c0_6, %c0_7] : memref<9x3x12xbf16, #tpu.memory_space<vmem>>, vector<1x3x12xbf16>
    %8 = vector.shape_cast %7 : vector<1x3x12xbf16> to vector<3x12xbf16>
    %c0_8 = arith.constant 0 : index
    %c0_9 = arith.constant 0 : index
    %c1_10 = arith.constant 1 : index
    %9 = vector.load %arg1[%c0_8, %c0_9, %c1_10] : memref<1x12x342xbf16, #tpu.memory_space<vmem>>, vector<1x12x288xbf16>
    %10 = vector.shape_cast %9 : vector<1x12x288xbf16> to vector<12x288xbf16>
    %cst_11 = arith.constant dense<0.000000e+00> : vector<3x288xf32>
    %11 = tpu.matmul %8, %10, %cst_11 {dimension_numbers = #tpu.dot_dimension_numbers<[1], [0], [0], [1], [0, 0, 1, 1], [], []>} : vector<3x12xbf16>, vector<12x288xbf16>, vector<3x288xf32> -> vector<3x288xf32>
    %12 = arith.addf %6, %11 : vector<3x288xf32>
    %c2 = arith.constant 2 : index
    %c0_12 = arith.constant 0 : index
    %c0_13 = arith.constant 0 : index
    %13 = vector.load %arg3[%c2, %c0_12, %c0_13] : memref<9x3x12xbf16, #tpu.memory_space<vmem>>, vector<1x3x12xbf16>
    %14 = vector.shape_cast %13 : vector<1x3x12xbf16> to vector<3x12xbf16>
    %c0_14 = arith.constant 0 : index
    %c0_15 = arith.constant 0 : index
    %c2_16 = arith.constant 2 : index
    %15 = vector.load %arg1[%c0_14, %c0_15, %c2_16] : memref<1x12x342xbf16, #tpu.memory_space<vmem>>, vector<1x12x288xbf16>
    %16 = vector.shape_cast %15 : vector<1x12x288xbf16> to vector<12x288xbf16>
    %cst_17 = arith.constant dense<0.000000e+00> : vector<3x288xf32>
    %17 = tpu.matmul %14, %16, %cst_17 {dimension_numbers = #tpu.dot_dimension_numbers<[1], [0], [0], [1], [0, 0, 1, 1], [], []>} : vector<3x12xbf16>, vector<12x288xbf16>, vector<3x288xf32> -> vector<3x288xf32>
    %18 = arith.addf %12, %17 : vector<3x288xf32>
    %c3 = arith.constant 3 : index
    %c0_18 = arith.constant 0 : index
    %c0_19 = arith.constant 0 : index
    %19 = vector.load %arg3[%c3, %c0_18, %c0_19] : memref<9x3x12xbf16, #tpu.memory_space<vmem>>, vector<1x3x12xbf16>
    %20 = vector.shape_cast %19 : vector<1x3x12xbf16> to vector<3x12xbf16>
    %c0_20 = arith.constant 0 : index
    %c0_21 = arith.constant 0 : index
    %c18 = arith.constant 18 : index
    %21 = vector.load %arg1[%c0_20, %c0_21, %c18] : memref<1x12x342xbf16, #tpu.memory_space<vmem>>, vector<1x12x288xbf16>
    %22 = vector.shape_cast %21 : vector<1x12x288xbf16> to vector<12x288xbf16>
    %cst_22 = arith.constant dense<0.000000e+00> : vector<3x288xf32>
    %23 = tpu.matmul %20, %22, %cst_22 {dimension_numbers = #tpu.dot_dimension_numbers<[1], [0], [0], [1], [0, 0, 1, 1], [], []>} : vector<3x12xbf16>, vector<12x288xbf16>, vector<3x288xf32> -> vector<3x288xf32>
    %24 = arith.addf %18, %23 : vector<3x288xf32>
    %c4 = arith.constant 4 : index
    %c0_23 = arith.constant 0 : index
    %c0_24 = arith.constant 0 : index
    %25 = vector.load %arg3[%c4, %c0_23, %c0_24] : memref<9x3x12xbf16, #tpu.memory_space<vmem>>, vector<1x3x12xbf16>
    %26 = vector.shape_cast %25 : vector<1x3x12xbf16> to vector<3x12xbf16>
    %c0_25 = arith.constant 0 : index
    %c0_26 = arith.constant 0 : index
    %c19 = arith.constant 19 : index
    %27 = vector.load %arg1[%c0_25, %c0_26, %c19] : memref<1x12x342xbf16, #tpu.memory_space<vmem>>, vector<1x12x288xbf16>
    %28 = vector.shape_cast %27 : vector<1x12x288xbf16> to vector<12x288xbf16>
    %cst_27 = arith.constant dense<0.000000e+00> : vector<3x288xf32>
    %29 = tpu.matmul %26, %28, %cst_27 {dimension_numbers = #tpu.dot_dimension_numbers<[1], [0], [0], [1], [0, 0, 1, 1], [], []>} : vector<3x12xbf16>, vector<12x288xbf16>, vector<3x288xf32> -> vector<3x288xf32>
    %30 = arith.addf %24, %29 : vector<3x288xf32>
    %c5 = arith.constant 5 : index
    %c0_28 = arith.constant 0 : index
    %c0_29 = arith.constant 0 : index
    %31 = vector.load %arg3[%c5, %c0_28, %c0_29] : memref<9x3x12xbf16, #tpu.memory_space<vmem>>, vector<1x3x12xbf16>
    %32 = vector.shape_cast %31 : vector<1x3x12xbf16> to vector<3x12xbf16>
    %c0_30 = arith.constant 0 : index
    %c0_31 = arith.constant 0 : index
    %c20 = arith.constant 20 : index
    %33 = vector.load %arg1[%c0_30, %c0_31, %c20] : memref<1x12x342xbf16, #tpu.memory_space<vmem>>, vector<1x12x288xbf16>
    %34 = vector.shape_cast %33 : vector<1x12x288xbf16> to vector<12x288xbf16>
    %cst_32 = arith.constant dense<0.000000e+00> : vector<3x288xf32>
    %35 = tpu.matmul %32, %34, %cst_32 {dimension_numbers = #tpu.dot_dimension_numbers<[1], [0], [0], [1], [0, 0, 1, 1], [], []>} : vector<3x12xbf16>, vector<12x288xbf16>, vector<3x288xf32> -> vector<3x288xf32>
    %36 = arith.addf %30, %35 : vector<3x288xf32>
    %c6 = arith.constant 6 : index
    %c0_33 = arith.constant 0 : index
    %c0_34 = arith.constant 0 : index
    %37 = vector.load %arg3[%c6, %c0_33, %c0_34] : memref<9x3x12xbf16, #tpu.memory_space<vmem>>, vector<1x3x12xbf16>
    %38 = vector.shape_cast %37 : vector<1x3x12xbf16> to vector<3x12xbf16>
    %c0_35 = arith.constant 0 : index
    %c0_36 = arith.constant 0 : index
    %c36 = arith.constant 36 : index
    %39 = vector.load %arg1[%c0_35, %c0_36, %c36] : memref<1x12x342xbf16, #tpu.memory_space<vmem>>, vector<1x12x288xbf16>
    %40 = vector.shape_cast %39 : vector<1x12x288xbf16> to vector<12x288xbf16>
    %cst_37 = arith.constant dense<0.000000e+00> : vector<3x288xf32>
    %41 = tpu.matmul %38, %40, %cst_37 {dimension_numbers = #tpu.dot_dimension_numbers<[1], [0], [0], [1], [0, 0, 1, 1], [], []>} : vector<3x12xbf16>, vector<12x288xbf16>, vector<3x288xf32> -> vector<3x288xf32>
    %42 = arith.addf %36, %41 : vector<3x288xf32>
    %c7 = arith.constant 7 : index
    %c0_38 = arith.constant 0 : index
    %c0_39 = arith.constant 0 : index
    %43 = vector.load %arg3[%c7, %c0_38, %c0_39] : memref<9x3x12xbf16, #tpu.memory_space<vmem>>, vector<1x3x12xbf16>
    %44 = vector.shape_cast %43 : vector<1x3x12xbf16> to vector<3x12xbf16>
    %c0_40 = arith.constant 0 : index
    %c0_41 = arith.constant 0 : index
    %c37 = arith.constant 37 : index
    %45 = vector.load %arg1[%c0_40, %c0_41, %c37] : memref<1x12x342xbf16, #tpu.memory_space<vmem>>, vector<1x12x288xbf16>
    %46 = vector.shape_cast %45 : vector<1x12x288xbf16> to vector<12x288xbf16>
    %cst_42 = arith.constant dense<0.000000e+00> : vector<3x288xf32>
    %47 = tpu.matmul %44, %46, %cst_42 {dimension_numbers = #tpu.dot_dimension_numbers<[1], [0], [0], [1], [0, 0, 1, 1], [], []>} : vector<3x12xbf16>, vector<12x288xbf16>, vector<3x288xf32> -> vector<3x288xf32>
    %48 = arith.addf %42, %47 : vector<3x288xf32>
    %c8 = arith.constant 8 : index
    %c0_43 = arith.constant 0 : index
    %c0_44 = arith.constant 0 : index
    %49 = vector.load %arg3[%c8, %c0_43, %c0_44] : memref<9x3x12xbf16, #tpu.memory_space<vmem>>, vector<1x3x12xbf16>
    %50 = vector.shape_cast %49 : vector<1x3x12xbf16> to vector<3x12xbf16>
    %c0_45 = arith.constant 0 : index
    %c0_46 = arith.constant 0 : index
    %c38 = arith.constant 38 : index
    %51 = vector.load %arg1[%c0_45, %c0_46, %c38] : memref<1x12x342xbf16, #tpu.memory_space<vmem>>, vector<1x12x288xbf16>
    %52 = vector.shape_cast %51 : vector<1x12x288xbf16> to vector<12x288xbf16>
    %cst_47 = arith.constant dense<0.000000e+00> : vector<3x288xf32>
    %53 = tpu.matmul %50, %52, %cst_47 {dimension_numbers = #tpu.dot_dimension_numbers<[1], [0], [0], [1], [0, 0, 1, 1], [], []>} : vector<3x12xbf16>, vector<12x288xbf16>, vector<3x288xf32> -> vector<3x288xf32>
    %54 = arith.addf %48, %53 : vector<3x288xf32>
    %c0_48 = arith.constant 0 : index
    %c0_49 = arith.constant 0 : index
    %c0_50 = arith.constant 0 : index
    %55 = vector.load %arg4[%c0_48, %c0_49, %c0_50] : memref<9x3x12xbf16, #tpu.memory_space<vmem>>, vector<1x3x12xbf16>
    %56 = vector.shape_cast %55 : vector<1x3x12xbf16> to vector<3x12xbf16>
    %c0_51 = arith.constant 0 : index
    %c0_52 = arith.constant 0 : index
    %c0_53 = arith.constant 0 : index
    %57 = vector.load %arg2[%c0_51, %c0_52, %c0_53] : memref<1x12x342xbf16, #tpu.memory_space<vmem>>, vector<1x12x288xbf16>
    %58 = vector.shape_cast %57 : vector<1x12x288xbf16> to vector<12x288xbf16>
    %cst_54 = arith.constant dense<0.000000e+00> : vector<3x288xf32>
    %59 = tpu.matmul %56, %58, %cst_54 {dimension_numbers = #tpu.dot_dimension_numbers<[1], [0], [0], [1], [0, 0, 1, 1], [], []>} : vector<3x12xbf16>, vector<12x288xbf16>, vector<3x288xf32> -> vector<3x288xf32>
    %60 = arith.addf %54, %59 : vector<3x288xf32>
    %c1_55 = arith.constant 1 : index
    %c0_56 = arith.constant 0 : index
    %c0_57 = arith.constant 0 : index
    %61 = vector.load %arg4[%c1_55, %c0_56, %c0_57] : memref<9x3x12xbf16, #tpu.memory_space<vmem>>, vector<1x3x12xbf16>
    %62 = vector.shape_cast %61 : vector<1x3x12xbf16> to vector<3x12xbf16>
    %c0_58 = arith.constant 0 : index
    %c0_59 = arith.constant 0 : index
    %c1_60 = arith.constant 1 : index
    %63 = vector.load %arg2[%c0_58, %c0_59, %c1_60] : memref<1x12x342xbf16, #tpu.memory_space<vmem>>, vector<1x12x288xbf16>
    %64 = vector.shape_cast %63 : vector<1x12x288xbf16> to vector<12x288xbf16>
    %cst_61 = arith.constant dense<0.000000e+00> : vector<3x288xf32>
    %65 = tpu.matmul %62, %64, %cst_61 {dimension_numbers = #tpu.dot_dimension_numbers<[1], [0], [0], [1], [0, 0, 1, 1], [], []>} : vector<3x12xbf16>, vector<12x288xbf16>, vector<3x288xf32> -> vector<3x288xf32>
    %66 = arith.addf %60, %65 : vector<3x288xf32>
    %c2_62 = arith.constant 2 : index
    %c0_63 = arith.constant 0 : index
    %c0_64 = arith.constant 0 : index
    %67 = vector.load %arg4[%c2_62, %c0_63, %c0_64] : memref<9x3x12xbf16, #tpu.memory_space<vmem>>, vector<1x3x12xbf16>
    %68 = vector.shape_cast %67 : vector<1x3x12xbf16> to vector<3x12xbf16>
    %c0_65 = arith.constant 0 : index
    %c0_66 = arith.constant 0 : index
    %c2_67 = arith.constant 2 : index
    %69 = vector.load %arg2[%c0_65, %c0_66, %c2_67] : memref<1x12x342xbf16, #tpu.memory_space<vmem>>, vector<1x12x288xbf16>
    %70 = vector.shape_cast %69 : vector<1x12x288xbf16> to vector<12x288xbf16>
    %cst_68 = arith.constant dense<0.000000e+00> : vector<3x288xf32>
    %71 = tpu.matmul %68, %70, %cst_68 {dimension_numbers = #tpu.dot_dimension_numbers<[1], [0], [0], [1], [0, 0, 1, 1], [], []>} : vector<3x12xbf16>, vector<12x288xbf16>, vector<3x288xf32> -> vector<3x288xf32>
    %72 = arith.addf %66, %71 : vector<3x288xf32>
    %c3_69 = arith.constant 3 : index
    %c0_70 = arith.constant 0 : index
    %c0_71 = arith.constant 0 : index
    %73 = vector.load %arg4[%c3_69, %c0_70, %c0_71] : memref<9x3x12xbf16, #tpu.memory_space<vmem>>, vector<1x3x12xbf16>
    %74 = vector.shape_cast %73 : vector<1x3x12xbf16> to vector<3x12xbf16>
    %c0_72 = arith.constant 0 : index
    %c0_73 = arith.constant 0 : index
    %c18_74 = arith.constant 18 : index
    %75 = vector.load %arg2[%c0_72, %c0_73, %c18_74] : memref<1x12x342xbf16, #tpu.memory_space<vmem>>, vector<1x12x288xbf16>
    %76 = vector.shape_cast %75 : vector<1x12x288xbf16> to vector<12x288xbf16>
    %cst_75 = arith.constant dense<0.000000e+00> : vector<3x288xf32>
    %77 = tpu.matmul %74, %76, %cst_75 {dimension_numbers = #tpu.dot_dimension_numbers<[1], [0], [0], [1], [0, 0, 1, 1], [], []>} : vector<3x12xbf16>, vector<12x288xbf16>, vector<3x288xf32> -> vector<3x288xf32>
    %78 = arith.addf %72, %77 : vector<3x288xf32>
    %c4_76 = arith.constant 4 : index
    %c0_77 = arith.constant 0 : index
    %c0_78 = arith.constant 0 : index
    %79 = vector.load %arg4[%c4_76, %c0_77, %c0_78] : memref<9x3x12xbf16, #tpu.memory_space<vmem>>, vector<1x3x12xbf16>
    %80 = vector.shape_cast %79 : vector<1x3x12xbf16> to vector<3x12xbf16>
    %c0_79 = arith.constant 0 : index
    %c0_80 = arith.constant 0 : index
    %c19_81 = arith.constant 19 : index
    %81 = vector.load %arg2[%c0_79, %c0_80, %c19_81] : memref<1x12x342xbf16, #tpu.memory_space<vmem>>, vector<1x12x288xbf16>
    %82 = vector.shape_cast %81 : vector<1x12x288xbf16> to vector<12x288xbf16>
    %cst_82 = arith.constant dense<0.000000e+00> : vector<3x288xf32>
    %83 = tpu.matmul %80, %82, %cst_82 {dimension_numbers = #tpu.dot_dimension_numbers<[1], [0], [0], [1], [0, 0, 1, 1], [], []>} : vector<3x12xbf16>, vector<12x288xbf16>, vector<3x288xf32> -> vector<3x288xf32>
    %84 = arith.addf %78, %83 : vector<3x288xf32>
    %c5_83 = arith.constant 5 : index
    %c0_84 = arith.constant 0 : index
    %c0_85 = arith.constant 0 : index
    %85 = vector.load %arg4[%c5_83, %c0_84, %c0_85] : memref<9x3x12xbf16, #tpu.memory_space<vmem>>, vector<1x3x12xbf16>
    %86 = vector.shape_cast %85 : vector<1x3x12xbf16> to vector<3x12xbf16>
    %c0_86 = arith.constant 0 : index
    %c0_87 = arith.constant 0 : index
    %c20_88 = arith.constant 20 : index
    %87 = vector.load %arg2[%c0_86, %c0_87, %c20_88] : memref<1x12x342xbf16, #tpu.memory_space<vmem>>, vector<1x12x288xbf16>
    %88 = vector.shape_cast %87 : vector<1x12x288xbf16> to vector<12x288xbf16>
    %cst_89 = arith.constant dense<0.000000e+00> : vector<3x288xf32>
    %89 = tpu.matmul %86, %88, %cst_89 {dimension_numbers = #tpu.dot_dimension_numbers<[1], [0], [0], [1], [0, 0, 1, 1], [], []>} : vector<3x12xbf16>, vector<12x288xbf16>, vector<3x288xf32> -> vector<3x288xf32>
    %90 = arith.addf %84, %89 : vector<3x288xf32>
    %c6_90 = arith.constant 6 : index
    %c0_91 = arith.constant 0 : index
    %c0_92 = arith.constant 0 : index
    %91 = vector.load %arg4[%c6_90, %c0_91, %c0_92] : memref<9x3x12xbf16, #tpu.memory_space<vmem>>, vector<1x3x12xbf16>
    %92 = vector.shape_cast %91 : vector<1x3x12xbf16> to vector<3x12xbf16>
    %c0_93 = arith.constant 0 : index
    %c0_94 = arith.constant 0 : index
    %c36_95 = arith.constant 36 : index
    %93 = vector.load %arg2[%c0_93, %c0_94, %c36_95] : memref<1x12x342xbf16, #tpu.memory_space<vmem>>, vector<1x12x288xbf16>
    %94 = vector.shape_cast %93 : vector<1x12x288xbf16> to vector<12x288xbf16>
    %cst_96 = arith.constant dense<0.000000e+00> : vector<3x288xf32>
    %95 = tpu.matmul %92, %94, %cst_96 {dimension_numbers = #tpu.dot_dimension_numbers<[1], [0], [0], [1], [0, 0, 1, 1], [], []>} : vector<3x12xbf16>, vector<12x288xbf16>, vector<3x288xf32> -> vector<3x288xf32>
    %96 = arith.addf %90, %95 : vector<3x288xf32>
    %c7_97 = arith.constant 7 : index
    %c0_98 = arith.constant 0 : index
    %c0_99 = arith.constant 0 : index
    %97 = vector.load %arg4[%c7_97, %c0_98, %c0_99] : memref<9x3x12xbf16, #tpu.memory_space<vmem>>, vector<1x3x12xbf16>
    %98 = vector.shape_cast %97 : vector<1x3x12xbf16> to vector<3x12xbf16>
    %c0_100 = arith.constant 0 : index
    %c0_101 = arith.constant 0 : index
    %c37_102 = arith.constant 37 : index
    %99 = vector.load %arg2[%c0_100, %c0_101, %c37_102] : memref<1x12x342xbf16, #tpu.memory_space<vmem>>, vector<1x12x288xbf16>
    %100 = vector.shape_cast %99 : vector<1x12x288xbf16> to vector<12x288xbf16>
    %cst_103 = arith.constant dense<0.000000e+00> : vector<3x288xf32>
    %101 = tpu.matmul %98, %100, %cst_103 {dimension_numbers = #tpu.dot_dimension_numbers<[1], [0], [0], [1], [0, 0, 1, 1], [], []>} : vector<3x12xbf16>, vector<12x288xbf16>, vector<3x288xf32> -> vector<3x288xf32>
    %102 = arith.addf %96, %101 : vector<3x288xf32>
    %c8_104 = arith.constant 8 : index
    %c0_105 = arith.constant 0 : index
    %c0_106 = arith.constant 0 : index
    %103 = vector.load %arg4[%c8_104, %c0_105, %c0_106] : memref<9x3x12xbf16, #tpu.memory_space<vmem>>, vector<1x3x12xbf16>
    %104 = vector.shape_cast %103 : vector<1x3x12xbf16> to vector<3x12xbf16>
    %c0_107 = arith.constant 0 : index
    %c0_108 = arith.constant 0 : index
    %c38_109 = arith.constant 38 : index
    %105 = vector.load %arg2[%c0_107, %c0_108, %c38_109] : memref<1x12x342xbf16, #tpu.memory_space<vmem>>, vector<1x12x288xbf16>
    %106 = vector.shape_cast %105 : vector<1x12x288xbf16> to vector<12x288xbf16>
    %cst_110 = arith.constant dense<0.000000e+00> : vector<3x288xf32>
    %107 = tpu.matmul %104, %106, %cst_110 {dimension_numbers = #tpu.dot_dimension_numbers<[1], [0], [0], [1], [0, 0, 1, 1], [], []>} : vector<3x12xbf16>, vector<12x288xbf16>, vector<3x288xf32> -> vector<3x288xf32>
    %108 = arith.addf %102, %107 : vector<3x288xf32>
    %c0_111 = arith.constant 0 : index
    %c0_112 = arith.constant 0 : index
    %109 = vector.load %arg5[%c0_111, %c0_112] : memref<3x1xf32, #tpu.memory_space<vmem>>, vector<3x1xf32>
    %110 = vector.broadcast %109 : vector<3x1xf32> to vector<3x288xf32>
    %111 = arith.addf %108, %110 : vector<3x288xf32>
    %cst_113 = arith.constant 0.000000e+00 : f32
    %112 = vector.broadcast %cst_113 : f32 to vector<3x288xf32>
    %113 = arith.maximumf %111, %112 : vector<3x288xf32>
    %c0_114 = arith.constant 0 : index
    %c0_115 = arith.constant 0 : index
    %c0_116 = arith.constant 0 : index
    %114 = vector.load %arg6[%c0_114, %c0_115, %c0_116] : memref<1x3x288xbf16, #tpu.memory_space<vmem>>, vector<1x3x288xbf16>
    %115 = vector.shape_cast %114 : vector<1x3x288xbf16> to vector<3x288xbf16>
    %116 = arith.extf %115 : vector<3x288xbf16> to vector<3x288xf32>
    %117 = arith.addf %113, %116 : vector<3x288xf32>
    %118 = arith.truncf %117 : vector<3x288xf32> to vector<3x288xbf16>
    %c0_117 = arith.constant 0 : index
    %c0_118 = arith.constant 0 : index
    %c0_119 = arith.constant 0 : index
    %119 = vector.load %arg7[%c0_117, %c0_118, %c0_119] : memref<1x3x288xbf16, #tpu.memory_space<vmem>>, vector<1x3x288xbf16>
    %120 = vector.shape_cast %119 : vector<1x3x288xbf16> to vector<3x288xbf16>
    %121 = vector.shape_cast %118 : vector<3x288xbf16> to vector<1x3x288xbf16>
    tpu.vector_store %arg7[%c0_117, %c0_118, %c0_119], %121 {strides = array<i32>} : memref<1x3x288xbf16, #tpu.memory_space<vmem>>, vector<1x3x288xbf16>,
    return
  }
  func.func @transform_0(%arg0: i32) -> (i32, i32, i32) {
    %c0_i32 = arith.constant 0 : i32
    %c0_i32_0 = arith.constant 0 : i32
    %c0_i32_1 = arith.constant 0 : i32
    return %arg0, %c0_i32, %c0_i32_0 : i32, i32, i32
  }
  func.func @transform_1(%arg0: i32) -> (i32, i32, i32) {
    %c0_i32 = arith.constant 0 : i32
    %c0_i32_0 = arith.constant 0 : i32
    %c0_i32_1 = arith.constant 0 : i32
    return %arg0, %c0_i32, %c0_i32_0 : i32, i32, i32
  }
  func.func @transform_2(%arg0: i32) -> (i32, i32, i32) {
    %c0_i32 = arith.constant 0 : i32
    %c0_i32_0 = arith.constant 0 : i32
    %c0_i32_1 = arith.constant 0 : i32
    %c0_i32_2 = arith.constant 0 : i32
    return %c0_i32, %c0_i32_0, %c0_i32_1 : i32, i32, i32
  }
  func.func @transform_3(%arg0: i32) -> (i32, i32, i32) {
    %c0_i32 = arith.constant 0 : i32
    %c0_i32_0 = arith.constant 0 : i32
    %c0_i32_1 = arith.constant 0 : i32
    %c0_i32_2 = arith.constant 0 : i32
    return %c0_i32, %c0_i32_0, %c0_i32_1 : i32, i32, i32
  }
  func.func @transform_4(%arg0: i32) -> (i32, i32) {
    %c0_i32 = arith.constant 0 : i32
    %c0_i32_0 = arith.constant 0 : i32
    %c0_i32_1 = arith.constant 0 : i32
    return %c0_i32, %c0_i32_0 : i32, i32
  }
  func.func @transform_5(%arg0: i32) -> (i32, i32, i32) {
    %c0_i32 = arith.constant 0 : i32
    %c0_i32_0 = arith.constant 0 : i32
    %c0_i32_1 = arith.constant 0 : i32
    return %arg0, %c0_i32, %c0_i32_0 : i32, i32, i32
  }
  func.func @transform_6(%arg0: i32) -> (i32, i32, i32) {
    %c0_i32 = arith.constant 0 : i32
    %c0_i32_0 = arith.constant 0 : i32
    %c0_i32_1 = arith.constant 0 : i32
    return %arg0, %c0_i32, %c0_i32_0 : i32, i32, i32
  }
}

</mosaic_0001>

<bundles_post_ra>
// kernel: rsu3_forward.6
= control target key start
LH: loop header
LB: loop body
LE: loop exit
PB: predicated region body
PF: predicated region fallthrough
CT: control target
= control target key end

     0   :  { %s1552_s12 = smov 0   ;;  %s1756_s0 = inlined_call_operand.vmem [shape: bf16[2,3,342], index: 0, kind: input, shape index: {}]   ;;  %s1757_s1 = inlined_call_operand.vmem [shape: bf16[9,3,3], index: 1, kind: input, shape index: {}]   ;;  %s1758_s2 = inlined_call_operand.vmem [shape: f32[3,1], index: 2, kind: input, shape index: {}]   ;;  %s1759_s3 = inlined_call_operand.vmem [shape: bf16[2,3,288], index: 3, kind: output, shape index: {}]  }
   0x1 LB: > { %s1372_s13 = sadd.s32 4294967295, %s1517_s12   ;;  %p1376_p0 = scmp.ge.s32.totalorder %s1517_s12, 1  ;;  %s1517_s12 = sphi %s1552_s12, %s13_s12  }
   0x2   : > { %p137_p1 = scmp.lt.s32.totalorder %s1517_s12, 3 }
   0x4   : > { %p138_p2 = pnand %p1376_p0, %p137_p1 }
   0x5   : > { %p161_p3 = scmp.lt.s32.totalorder (!%p138_p2), %s1372_s13, 1  ;;  %s1522_s18 = smov (!%p138_p2), 127  }
   0x6   : > { %141 = sbr.rel (%p138_p2) target bundleno = 421 (0x1a5), region = 32  ;;  %s1523_s19 = smov (!%p138_p2), 126  }
   0x7   : > { %s1525_s20 = smov (!%p138_p2), 110   ;;  %s1526_s21 = smov (!%p138_p2), 109  }
   0x8   : > { %s1527_s22 = smov (!%p138_p2), 108   ;;  %s1528_s23 = smov (!%p138_p2), 92  }
   0x9   : > { %s1529_s24 = smov (!%p138_p2), 91   ;;  %s1530_s25 = smov (!%p138_p2), 90  }
   0xb   : > { %v181_v0 = vlaneseq  ;;  %v1519_v1 = vmov 1983009808   ;;  %s1763_s13 = smov (!%p161_p3, %s1372_s13), 1  ;;  %v1520_v5 = vmov 0.0   ;;  %vm1521_vm0 = vmmov 0  }
   0xc   : > { %v179_v2 = vunpack.c.l.s4 %v1519_v1  ;;  %1426 = vmatprep.subr.bf16.mxu1 %v1520_v5  ;;  %s1480_s14 = smul.u32 6, %s1763_s13  ;;  %1428 = vmatprep.mubr.msk.bf16.mxu1 %vm1521_vm0, %v1520_v5  ;;  %v1524_v21 = vmov 0   ;;  %v1268_v48 = vld [vmem:[%s1758_s2] sm:$0x7]  ;;  %vm206_vm1 = vcmask 1040384   ;;  %vm207_vm2 = vcmask 1041408  }
   0xd   : > { %v182_v3 = vshrl.u32 %v181_v0, 7  ;;  %251 = vmatprep.mubr.bf16.mxu0 %v1524_v21  ;;  %1502 = vset.pattern.permute.xlu0 %v1524_v21  ;;  %v1531_v51 = vmov 65535   ;;  %vm199_vm3 = vcmask 1039360   ;;  %vm419_vm4 = vcmask 1031168   ;;  %v1379_v63 = vld [vmem:[%s1757_s1 + $0x2] sm:$0x3] }
   0xe   : > { %v180_v4 = vunpack.c.0.s8 %v179_v2  ;;  %s1571_s17 = scalar_lea.vmem %s1756_s0, %s1480_s14  ;;  %v208_v52 = vsel %vm206_vm1, 4294967295, %v1531_v51  ;;  %vm202_vm5 = vcmask 23552   ;;  %vm544_vm6 = vcmask 900096  }
   0xf   : > { %v173_v7 = vld [vmem:[%s1571_s17] sm:$0x3f]  ;;  %v1616_v54 = vsel %vm207_vm2, %v208_v52, 0  ;;  %vm669_vm7 = vcmask 891904   ;;  %vm794_vm8 = vcmask 883712   ;;  %vm919_vm9 = vcmask 752640  }
  0x10   : > { %v1564_v6 = vsub.s32 %v180_v4, %v182_v3  ;;  %v395_v8 = vld [vmem:[%s1571_s17] sm:$0x3f]  ;;  %v177_v10 = vcombine.high %v173_v7, %v173_v7  ;;  %vm1044_vm10 = vcmask 744448   ;;  %vm1169_vm11 = vcmask 736256  }
  0x11   : > { %v397_v15 = vcombine.high %v395_v8, %v395_v8  ;;  %v520_v16 = vld [vmem:[%s1571_s17] sm:$0x3f]  ;;  %vm1304_vm12 = vsmask.f32 1280  ;;  %vm1306_vm13 = vcmask 1043458   ;;  %vm1310_vm1 = vcmask 259076  }
  0x12   : > { %v1578_v9 = vrot.slane %v173_v7, %v1564_v6  ;;  %v404_v11 = vrot.slane %v395_v8, %v1564_v6  ;;  %v1588_v14 = vrot.slane %v177_v10, %v1564_v6  ;;  %v522_v17 = vcombine.high %v520_v16, %v520_v16  ;;  %v645_v18 = vld [vmem:[%s1571_s17] sm:$0x3f]  ;;  %vm1740_vm15 = vmand %vm207_vm2, %vm1304_vm12 }
  0x13   : > { %v411_v19 = vrot.slane %v397_v15, %v1564_v6  ;;  %v529_v20 = vrot.slane %v520_v16, %v1564_v6  ;;  %v654_v23 = vrot.slane %v645_v18, %v1564_v6  ;;  %v647_v26 = vcombine.high %v645_v18, %v645_v18  ;;  %v770_v27 = vld [vmem:[%s1571_s17] sm:$0x3f] }
  0x14   : > { %193 = vrot.lane.b32.xlu1 %v1578_v9, %s1522_s18  ;;  %v1584_v12 = vcombine.high %v1578_v9, %v1578_v9  ;;  %v412_v13 = vcombine.high %v404_v11, %v404_v11  ;;  %v536_v22 = vrot.slane %v522_v17, %v1564_v6  ;;  %v772_v28 = vcombine.high %v770_v27, %v770_v27  ;;  %v895_v29 = vld [vmem:[%s1571_s17] sm:$0x3f] }
  0x15   : > { %v537_v24 = vcombine.high %v529_v20, %v529_v20  ;;  %v662_v25 = vcombine.high %v654_v23, %v654_v23  ;;  %v661_v30 = vrot.slane %v647_v26, %v1564_v6  ;;  %v779_v31 = vrot.slane %v770_v27, %v1564_v6  ;;  %v1020_v37 = vld [vmem:[%s1571_s17] sm:$0x3f] }
  0x16   : > { %195 = vrot.lane.b32.xlu0 %v1584_v12, %s1522_s18  ;;  %v786_v32 = vrot.slane %v772_v28, %v1564_v6  ;;  %v904_v33 = vrot.slane %v895_v29, %v1564_v6  ;;  %v897_v36 = vcombine.high %v895_v29, %v895_v29  ;;  %v1022_v38 = vcombine.high %v1020_v37, %v1020_v37  ;;  %v1145_v39 = vld [vmem:[%s1571_s17] sm:$0x3f] }
  0x17   : > { %v787_v34 = vcombine.high %v779_v31, %v779_v31  ;;  %v1029_v41 = vrot.slane %v1020_v37, %v1564_v6  ;;  %v1154_v43 = vrot.slane %v1145_v39, %v1564_v6  ;;  %v1147_v46 = vcombine.high %v1145_v39, %v1145_v39  ;;  %v1390_v39 = vld [vmem:[%s1757_s1 + $0x8] sm:$0x3] }
  0x18   : > { %415 = vrot.lane.b32.xlu1 %v412_v13, %s1523_s19  ;;  %v912_v35 = vcombine.high %v904_v33, %v904_v33  ;;  %v911_v40 = vrot.slane %v897_v36, %v1564_v6  ;;  %v1036_v42 = vrot.slane %v1022_v38, %v1564_v6  ;;  %v307_v59 = vand.u32 %v1616_v54, %v1584_v12 }
  0x19   : > { %v1037_v44 = vcombine.high %v1029_v41, %v1029_v41  ;;  %v1162_v45 = vcombine.high %v1154_v43, %v1154_v43  ;;  %v1161_v47 = vrot.slane %v1147_v46, %v1564_v6  ;;  %v310_v61 = vand.u32 %v1616_v54, %v1588_v14 }
  0x1a   : > { %197 = vrot.lane.b32.xlu0 %v1588_v14, %s1522_s18  ;;  %v304_v2 = vand.u32 %v1616_v54, %v1578_v9  ;;  %vm1307_vm14 = vsmask.f32 3328 }
  0x1c   : > { %413 = vrot.lane.b32.xlu1 %v404_v11, %s1523_s19  ;;  %v172_v11 = vld [vmem:[%s1757_s1] sm:$0x3] }
  0x1e   : > { %417 = vrot.lane.b32.xlu0 %v411_v19, %s1523_s19 }
  0x20   : > { %542 = vrot.lane.b32.xlu1 %v536_v22, %s1525_s20 }
  0x22   : > { %540 = vrot.lane.b32.xlu0 %v537_v24, %s1525_s20 }
  0x24   : > { %665 = vrot.lane.b32.xlu1 %v662_v25, %s1526_s21 }
  0x26   : > { %538 = vrot.lane.b32.xlu0 %v529_v20, %s1525_s20  ;;  %v1384_v20 = vld [vmem:[%s1757_s1 + $0x4] sm:$0x3] }
  0x28   : > { %663 = vrot.lane.b32.xlu1 %v654_v23, %s1526_s21 }
  0x2a   : > { %667 = vrot.lane.b32.xlu0 %v661_v30, %s1526_s21  ;;  %v1387_v30 = vld [vmem:[%s1757_s1 + $0x6] sm:$0x3] }
  0x2c   : > { %792 = vrot.lane.b32.xlu1 %v786_v32, %s1527_s22 }
  0x2e   : > { %790 = vrot.lane.b32.xlu0 %v787_v34, %s1527_s22 }
  0x30   : > { %915 = vrot.lane.b32.xlu1 %v912_v35, %s1528_s23 }
  0x32   : > { %788 = vrot.lane.b32.xlu0 %v779_v31, %s1527_s22 }
  0x34   : > { %913 = vrot.lane.b32.xlu1 %v904_v33, %s1528_s23 }
  0x36   : > { %917 = vrot.lane.b32.xlu0 %v911_v40, %s1528_s23 }
  0x38   : > { %1042 = vrot.lane.b32.xlu1 %v1036_v42, %s1529_s24 }
  0x3a   : > { %1040 = vrot.lane.b32.xlu0 %v1037_v44, %s1529_s24 }
  0x3c   : > { %1165 = vrot.lane.b32.xlu1 %v1162_v45, %s1530_s25 }
  0x3e   : > { %1038 = vrot.lane.b32.xlu0 %v1029_v41, %s1529_s24  ;;  %s170_s24 = scalar_lea.vmem %s1759_s3, %s1480_s14 }
  0x40   : > { %1163 = vrot.lane.b32.xlu1 %v1154_v43, %s1530_s25 }
  0x42   : > { %1167 = vrot.lane.b32.xlu0 %v1161_v47, %s1530_s25 }
  0x46   : > { %1271 = vperm.xlu0 %1502, %v1268_v48   ;;  %v1393_v48 = vld [vmem:[%s1757_s1 + $0xa] sm:$0x3] }
  0x86   : > { %v194_v49 = vpop.permute.xlu1 %193 }
  0x88   : > { %v196_v50 = vpop.permute.xlu0 %195 }
  0x89   : > { %v200_v55 = vsel %vm199_vm3, %v194_v49, %v196_v50 }
  0x8a   : > { %v416_v53 = vpop.permute.xlu1 %415  ;;  %v211_v62 = vand.u32 %v1616_v54, %v200_v55 }
  0x8c   : > { %v198_v56 = vpop.permute.xlu0 %197 }
  0x8d   : > { %v217_v57 = vand.u32 %v1616_v54, %v198_v56  ;;  %v201_v58 = vsel %vm199_vm3, %v196_v50, %v198_v56  ;;  %vm1311_vm3 = vsmask.f32 5376 }
  0x8e   : > { %v214_v60 = vand.u32 %v1616_v54, %v201_v58  ;;  %v414_v0 = vpop.permute.xlu1 %413  ;;  %v1396_v58 = vld [vmem:[%s1757_s1 + $0xc] sm:$0x3]  ;;  %vm1312_vm2 = vmand %vm1310_vm1, %vm1311_vm3 }
  0x8f   : > { %1427 = vmatpush3.bf16.msra.mxu1 %v217_v57  ;;  %v420_v9 = vsel %vm419_vm4, %v414_v0, %v416_v53 }
  0x90   : > { %233 = vmatprep.subr.bf16.mxu0 %v214_v60  ;;  %v418_v1 = vpop.permute.xlu0 %417  ;;  %1432 = vmatprep.subr.bf16.mxu1 %v1520_v5  ;;  %v426_v14 = vand.u32 %v420_v9, %v1616_v54 }
  0x91   : > { %234 = vmatpush1.bf16.msra.mxu0 %v211_v62  ;;  %v421_v3 = vsel %vm419_vm4, %v416_v53, %v418_v1  ;;  %v432_v10 = vand.u32 %v418_v1, %v1616_v54  ;;  %v1399_v1 = vld [vmem:[%s1757_s1 + $0xe] sm:$0x3] }
  0x92   : > { %1429 = vmatmul.mubr.msk.bf16.vlgmr.msra.gmra.mxu1 %vm202_vm5, %v1379_v63  ;;  %326 = vmatprep.subr.bf16.mxu0 %v307_v59  ;;  %v429_v4 = vand.u32 %v421_v3, %v1616_v54  ;;  %v543_v8 = vpop.permute.xlu1 %542  ;;  %v1402_v3 = vld [vmem:[%s1757_s1 + $0x10] sm:$0x3] }
  0x93   : > { %1433 = vmatpush3.bf16.msra.mxu1 %v310_v61  ;;  %1434 = vmatprep.mubr.msk.bf16.mxu1 %vm1521_vm0, %v1520_v5  ;;  %v557_v19 = vand.u32 %v543_v8, %v1616_v54 }
  0x94   : > { %1380 = vmatmul.mubr.msk.bf16.vlgmr.msra.gmra.mxu0 %vm202_vm5, %v1379_v63  ;;  %v541_v7 = vpop.permute.xlu0 %540  ;;  %1438 = vmatprep.subr.bf16.mxu1 %v1520_v5 }
  0x95   : > { %327 = vmatpush1.bf16.msra.mxu0 %v304_v2  ;;  %344 = vmatprep.mubr.bf16.mxu0 %v1524_v21  ;;  %v546_v12 = vsel %vm544_vm6, %v541_v7, %v543_v8 }
  0x96   : > { %448 = vmatprep.subr.bf16.mxu0 %v429_v4  ;;  %v554_v15 = vand.u32 %v546_v12, %v1616_v54  ;;  %v666_v16 = vpop.permute.xlu1 %665 }
  0x98   : > { %v539_v13 = vpop.permute.xlu0 %538 }
  0x99   : > { %v545_v18 = vsel %vm544_vm6, %v539_v13, %v541_v7 }
  0x9a   : > { %1435 = vmatmul.mubr.msk.bf16.vlgmr.msra.gmra.mxu1 %vm202_vm5, %v172_v11  ;;  %v664_v23 = vpop.permute.xlu1 %663  ;;  %v551_v24 = vand.u32 %v545_v18, %v1616_v54 }
  0x9b   : > { %1439 = vmatpush3.bf16.msra.mxu1 %v432_v10  ;;  %1440 = vmatprep.mubr.msk.bf16.mxu1 %vm1521_vm0, %v1520_v5  ;;  %v670_v28 = vsel %vm669_vm7, %v664_v23, %v666_v16 }
  0x9c   : > { %1382 = vmatmul.mubr.msk.bf16.vlgmr.msra.gmra.mxu0 %vm202_vm5, %v172_v11  ;;  %1444 = vmatprep.subr.bf16.mxu1 %v1520_v5  ;;  %v668_v17 = vpop.permute.xlu0 %667  ;;  %v676_v33 = vand.u32 %v670_v28, %v1616_v54 }
  0x9d   : > { %449 = vmatpush1.bf16.msra.mxu0 %v426_v14  ;;  %466 = vmatprep.mubr.bf16.mxu0 %v1524_v21  ;;  %v671_v22 = vsel %vm669_vm7, %v666_v16, %v668_v17  ;;  %v682_v29 = vand.u32 %v668_v17, %v1616_v54 }
  0x9e   : > { %573 = vmatprep.subr.bf16.mxu0 %v554_v15  ;;  %v679_v25 = vand.u32 %v671_v22, %v1616_v54  ;;  %v793_v27 = vpop.permute.xlu1 %792 }
  0x9f   : > { %v807_v38 = vand.u32 %v793_v27, %v1616_v54 }
  0xa0   : > { %v791_v26 = vpop.permute.xlu0 %790 }
  0xa1   : > { %v796_v31 = vsel %vm794_vm8, %v791_v26, %v793_v27 }
  0xa2   : > { %1441 = vmatmul.mubr.msk.bf16.vlgmr.msra.gmra.mxu1 %vm202_vm5, %v1384_v20  ;;  %v804_v34 = vand.u32 %v796_v31, %v1616_v54  ;;  %v916_v35 = vpop.permute.xlu1 %915 }
  0xa3   : > { %1445 = vmatpush3.bf16.msra.mxu1 %v557_v19  ;;  %1446 = vmatprep.mubr.msk.bf16.mxu1 %vm1521_vm0, %v1520_v5 }
  0xa4   : > { %1385 = vmatmul.mubr.msk.bf16.vlgmr.msra.gmra.mxu0 %vm202_vm5, %v1384_v20  ;;  %1450 = vmatprep.subr.bf16.mxu1 %v1520_v5  ;;  %v789_v32 = vpop.permute.xlu0 %788 }
  0xa5   : > { %574 = vmatpush1.bf16.msra.mxu0 %v551_v24  ;;  %591 = vmatprep.mubr.bf16.mxu0 %v1524_v21  ;;  %v795_v37 = vsel %vm794_vm8, %v789_v32, %v791_v26 }
  0xa6   : > { %698 = vmatprep.subr.bf16.mxu0 %v679_v25  ;;  %v914_v41 = vpop.permute.xlu1 %913  ;;  %v801_v42 = vand.u32 %v795_v37, %v1616_v54 }
  0xa7   : > { %v920_v46 = vsel %vm919_vm9, %v914_v41, %v916_v35 }
  0xa8   : > { %v918_v36 = vpop.permute.xlu0 %917  ;;  %v926_v51 = vand.u32 %v920_v46, %v1616_v54 }
  0xa9   : > { %v921_v40 = vsel %vm919_vm9, %v916_v35, %v918_v36  ;;  %v932_v47 = vand.u32 %v918_v36, %v1616_v54 }
  0xaa   : > { %1447 = vmatmul.mubr.msk.bf16.vlgmr.msra.gmra.mxu1 %vm202_vm5, %v1387_v30  ;;  %v929_v43 = vand.u32 %v921_v40, %v1616_v54  ;;  %v1043_v45 = vpop.permute.xlu1 %1042 }
  0xab   : > { %1451 = vmatpush3.bf16.msra.mxu1 %v682_v29  ;;  %1452 = vmatprep.mubr.msk.bf16.mxu1 %vm1521_vm0, %v1520_v5  ;;  %v1057_v57 = vand.u32 %v1043_v45, %v1616_v54 }
  0xac   : > { %1388 = vmatmul.mubr.msk.bf16.vlgmr.msra.gmra.mxu0 %vm202_vm5, %v1387_v30  ;;  %1456 = vmatprep.subr.bf16.mxu1 %v1520_v5  ;;  %v1041_v44 = vpop.permute.xlu0 %1040 }
  0xad   : > { %699 = vmatpush1.bf16.msra.mxu0 %v676_v33  ;;  %716 = vmatprep.mubr.bf16.mxu0 %v1524_v21  ;;  %v1046_v49 = vsel %vm1044_vm10, %v1041_v44, %v1043_v45 }
  0xae   : > { %823 = vmatprep.subr.bf16.mxu0 %v804_v34  ;;  %v1054_v52 = vand.u32 %v1046_v49, %v1616_v54  ;;  %v1166_v55 = vpop.permute.xlu1 %1165 }
  0xb0   : > { %v1039_v50 = vpop.permute.xlu0 %1038 }
  0xb1   : > { %v1045_v56 = vsel %vm1044_vm10, %v1039_v50, %v1041_v44 }
  0xb2   : > { %1453 = vmatmul.mubr.msk.bf16.vlgmr.msra.gmra.mxu1 %vm202_vm5, %v1390_v39  ;;  %v1051_v60 = vand.u32 %v1045_v56, %v1616_v54  ;;  %v1164_v62 = vpop.permute.xlu1 %1163 }
  0xb3   : > { %1457 = vmatpush3.bf16.msra.mxu1 %v807_v38  ;;  %1458 = vmatprep.mubr.msk.bf16.mxu1 %vm1521_vm0, %v1520_v5  ;;  %v1170_v63 = vsel %vm1169_vm11, %v1164_v62, %v1166_v55 }
  0xb4   : > { %1391 = vmatmul.mubr.msk.bf16.vlgmr.msra.gmra.mxu0 %vm202_vm5, %v1390_v39  ;;  %1462 = vmatprep.subr.bf16.mxu1 %v1520_v5  ;;  %v1168_v53 = vpop.permute.xlu0 %1167  ;;  %v1176_v2 = vand.u32 %v1170_v63, %v1616_v54 }
  0xb5   : > { %824 = vmatpush1.bf16.msra.mxu0 %v801_v42  ;;  %841 = vmatprep.mubr.bf16.mxu0 %v1524_v21  ;;  %v1171_v59 = vsel %vm1169_vm11, %v1166_v55, %v1168_v53  ;;  %v1182_v0 = vand.u32 %v1168_v53, %v1616_v54 }
  0xb6   : > { %948 = vmatprep.subr.bf16.mxu0 %v929_v43  ;;  %v1179_v61 = vand.u32 %v1171_v59, %v1616_v54 }
  0xba   : > { %1459 = vmatmul.mubr.msk.bf16.vlgmr.msra.gmra.mxu1 %vm202_vm5, %v1393_v48 }
  0xbb   : > { %1463 = vmatpush3.bf16.msra.mxu1 %v932_v47  ;;  %1464 = vmatprep.mubr.msk.bf16.mxu1 %vm1521_vm0, %v1520_v5 }
  0xbc   : > { %1394 = vmatmul.mubr.msk.bf16.vlgmr.msra.gmra.mxu0 %vm202_vm5, %v1393_v48  ;;  %1468 = vmatprep.subr.bf16.mxu1 %v1520_v5 }
  0xbd   : > { %949 = vmatpush1.bf16.msra.mxu0 %v926_v51  ;;  %966 = vmatprep.mubr.bf16.mxu0 %v1524_v21 }
  0xbe   : > { %1073 = vmatprep.subr.bf16.mxu0 %v1054_v52 }
  0xc2   : > { %1465 = vmatmul.mubr.msk.bf16.vlgmr.msra.gmra.mxu1 %vm202_vm5, %v1396_v58 }
  0xc3   : > { %1469 = vmatpush3.bf16.msra.mxu1 %v1057_v57  ;;  %1470 = vmatprep.mubr.msk.bf16.mxu1 %vm1521_vm0, %v1520_v5 }
  0xc4   : > { %1397 = vmatmul.mubr.msk.bf16.vlgmr.msra.gmra.mxu0 %vm202_vm5, %v1396_v58  ;;  %1474 = vmatprep.subr.bf16.mxu1 %v1520_v5 }
  0xc5   : > { %1074 = vmatpush1.bf16.msra.mxu0 %v1051_v60  ;;  %1091 = vmatprep.mubr.bf16.mxu0 %v1524_v21 }
  0xc6   : > { %1198 = vmatprep.subr.bf16.mxu0 %v1179_v61 }
  0xca   : > { %1471 = vmatmul.mubr.msk.bf16.vlgmr.msra.gmra.mxu1 %vm202_vm5, %v1399_v1 }
  0xcb   : > { %1475 = vmatpush3.bf16.msra.mxu1 %v1182_v0  ;;  %1476 = vmatprep.mubr.msk.bf16.mxu1 %vm1521_vm0, %v1520_v5  ;;  %vm1308_vm0 = vmand %vm1306_vm13, %vm1307_vm14 }
  0xcc   : > { %1400 = vmatmul.mubr.msk.bf16.vlgmr.msra.gmra.mxu0 %vm202_vm5, %v1399_v1  ;;  %vm1309_vm4 = vmor %vm1308_vm0, %vm1740_vm15 }
  0xcd   : > { %1199 = vmatpush1.bf16.msra.mxu0 %v1176_v2  ;;  %1216 = vmatprep.mubr.bf16.mxu0 %v1524_v21 }
  0xd2   : > { %1477 = vmatmul.mubr.msk.bf16.vlgmr.msra.gmra.mxu1 %vm202_vm5, %v1402_v3 }
  0xd4   : > { %1403 = vmatmul.mubr.msk.bf16.vlgmr.msra.gmra.mxu0 %vm202_vm5, %v1402_v3  ;;  %vm1313_vm5 = vmor %vm1312_vm2, %vm1309_vm4 }
 0x152   : > { %v294_v54 = vpop.f32.mrf.mxu1 }
 0x154   : > { %v253_v4 = vpop.f32.mrf.mxu0  ;;  %v1430_v7 = vpop.f32.mrf.mxu1 }
 0x156   : > { %v255_v8 = vpop.f32.mrf.mxu0  ;;  %v297_v9 = vpop.f32.mrf.mxu1 }
 0x158   : > { %v257_v10 = vpop.f32.mrf.mxu0  ;;  %v1431_v5 = vpop.f32.mrf.mxu1 }
 0x15a   : > { %v258_v11 = vpop.f32.mrf.mxu0  ;;  %v387_v12 = vpop.f32.mrf.mxu1 }
 0x15b   : > { %v388_v56 = vadd.f32 %v387_v12, %v294_v54 }
 0x15c   : > { %v346_v13 = vpop.f32.mrf.mxu0  ;;  %v1436_v14 = vpop.f32.mrf.mxu1 }
 0x15d   : > { %v347_v59 = vadd.f32 %v346_v13, %v253_v4 }
 0x15e   : > { %v348_v21 = vpop.f32.mrf.mxu0  ;;  %v390_v15 = vpop.f32.mrf.mxu1 }
 0x15f   : > { %v349_v63 = vadd.f32 %v348_v21, %v255_v8 }
 0x160   : > { %v350_v16 = vpop.f32.mrf.mxu0  ;;  %v1437_v17 = vpop.f32.mrf.mxu1 }
 0x162   : > { %v351_v18 = vpop.f32.mrf.mxu0  ;;  %v509_v19 = vpop.f32.mrf.mxu1 }
 0x163   : > { %v517_v60 = vadd.f32 %v509_v19, %v388_v56 }
 0x164   : > { %v468_v20 = vpop.f32.mrf.mxu0  ;;  %v1442_v22 = vpop.f32.mrf.mxu1 }
 0x165   : > { %v515_v0 = vadd.f32 %v468_v20, %v347_v59  ;;  %v1272_v22 = vpop.permute.xlu0 %1271 }
 0x166   : > { %v470_v23 = vpop.f32.mrf.mxu0  ;;  %v512_v24 = vpop.f32.mrf.mxu1 }
 0x167   : > { %v516_v7 = vadd.f32 %v470_v23, %v349_v63 }
 0x168   : > { %v472_v25 = vpop.f32.mrf.mxu0  ;;  %v1443_v26 = vpop.f32.mrf.mxu1 }
 0x16a   : > { %v473_v27 = vpop.f32.mrf.mxu0  ;;  %v634_v28 = vpop.f32.mrf.mxu1 }
 0x16b   : > { %v642_v1 = vadd.f32 %v634_v28, %v517_v60 }
 0x16c   : > { %v593_v29 = vpop.f32.mrf.mxu0  ;;  %v1448_v30 = vpop.f32.mrf.mxu1 }
 0x16d   : > { %v640_v9 = vadd.f32 %v593_v29, %v515_v0 }
 0x16e   : > { %v595_v31 = vpop.f32.mrf.mxu0  ;;  %v637_v32 = vpop.f32.mrf.mxu1 }
 0x16f   : > { %v641_v14 = vadd.f32 %v595_v31, %v516_v7 }
 0x170   : > { %v597_v33 = vpop.f32.mrf.mxu0  ;;  %v1449_v34 = vpop.f32.mrf.mxu1 }
 0x172   : > { %v598_v35 = vpop.f32.mrf.mxu0  ;;  %v759_v36 = vpop.f32.mrf.mxu1 }
 0x173   : > { %v767_v10 = vadd.f32 %v759_v36, %v642_v1 }
 0x174   : > { %v718_v37 = vpop.f32.mrf.mxu0  ;;  %v1454_v38 = vpop.f32.mrf.mxu1 }
 0x175   : > { %v765_v15 = vadd.f32 %v718_v37, %v640_v9 }
 0x176   : > { %v720_v39 = vpop.f32.mrf.mxu0  ;;  %v762_v40 = vpop.f32.mrf.mxu1 }
 0x177   : > { %v766_v17 = vadd.f32 %v720_v39, %v641_v14 }
 0x178   : > { %v722_v41 = vpop.f32.mrf.mxu0  ;;  %v1455_v42 = vpop.f32.mrf.mxu1 }
 0x17a   : > { %v723_v43 = vpop.f32.mrf.mxu0  ;;  %v884_v44 = vpop.f32.mrf.mxu1 }
 0x17b   : > { %v892_v16 = vadd.f32 %v884_v44, %v767_v10 }
 0x17c   : > { %v843_v45 = vpop.f32.mrf.mxu0  ;;  %v1460_v46 = vpop.f32.mrf.mxu1 }
 0x17d   : > { %v890_v4 = vadd.f32 %v843_v45, %v765_v15 }
 0x17e   : > { %v845_v47 = vpop.f32.mrf.mxu0  ;;  %v887_v48 = vpop.f32.mrf.mxu1 }
 0x17f   : > { %v891_v8 = vadd.f32 %v845_v47, %v766_v17 }
 0x180   : > { %v847_v49 = vpop.f32.mrf.mxu0  ;;  %v1461_v50 = vpop.f32.mrf.mxu1 }
 0x181   : > { %v1314_v49 = vld [vmem:[%s170_s24] sm:$0x3f] }
 0x182   : > { %v848_v51 = vpop.f32.mrf.mxu0  ;;  %v1009_v52 = vpop.f32.mrf.mxu1 }
 0x183   : > { %v1017_v13 = vadd.f32 %v1009_v52, %v892_v16 }
 0x184   : > { %v968_v53 = vpop.f32.mrf.mxu0  ;;  %v1466_v55 = vpop.f32.mrf.mxu1 }
 0x185   : > { %v1015_v21 = vadd.f32 %v968_v53, %v890_v4 }
 0x186   : > { %v970_v57 = vpop.f32.mrf.mxu0  ;;  %v1012_v58 = vpop.f32.mrf.mxu1 }
 0x187   : > { %v1016_v25 = vadd.f32 %v970_v57, %v891_v8 }
 0x188   : > { %v972_v61 = vpop.f32.mrf.mxu0  ;;  %v1467_v62 = vpop.f32.mrf.mxu1 }
 0x18a   : > { %v973_v2 = vpop.f32.mrf.mxu0  ;;  %v1134_v3 = vpop.f32.mrf.mxu1 }
 0x18b   : > { %v1142_v20 = vadd.f32 %v1134_v3, %v1017_v13 }
 0x18c   : > { %v1093_v5 = vpop.f32.mrf.mxu0  ;;  %v1472_v11 = vpop.f32.mrf.mxu1 }
 0x18d   : > { %v1140_v26 = vadd.f32 %v1093_v5, %v1015_v21 }
 0x18e   : > { %v1095_v54 = vpop.f32.mrf.mxu0  ;;  %v1137_v12 = vpop.f32.mrf.mxu1 }
 0x18f   : > { %v1141_v30 = vadd.f32 %v1095_v54, %v1016_v25 }
 0x190   : > { %v1097_v18 = vpop.f32.mrf.mxu0  ;;  %v1473_v19 = vpop.f32.mrf.mxu1 }
 0x192   : > { %v1098_v24 = vpop.f32.mrf.mxu0  ;;  %v1259_v23 = vpop.f32.mrf.mxu1 }
 0x193   : > { %v1267_v27 = vadd.f32 %v1259_v23, %v1142_v20 }
 0x194   : > { %v1218_v28 = vpop.f32.mrf.mxu0  ;;  %v1478_v29 = vpop.f32.mrf.mxu1 }
 0x195   : > { %v1265_v31 = vadd.f32 %v1218_v28, %v1140_v26  ;;  %v1276_v32 = vadd.f32 %v1272_v22, %v1267_v27 }
 0x196   : > { %v1220_v33 = vpop.f32.mrf.mxu0  ;;  %v1262_v34 = vpop.f32.mrf.mxu1 }
 0x197   : > { %v1274_v35 = vadd.f32 %v1272_v22, %v1265_v31  ;;  %v1279_v36 = vmax.f32 %v1276_v32, 0.0  ;;  %v1266_v37 = vadd.f32 %v1220_v33, %v1141_v30 }
 0x198   : > { %v1222_v39 = vpop.f32.mrf.mxu0  ;;  %v1479_v40 = vpop.f32.mrf.mxu1 }
 0x199   : > { %v1275_v41 = vadd.f32 %v1272_v22, %v1266_v37  ;;  %v1277_v43 = vmax.f32 %v1274_v35, 0.0  ;;  %v1282_v44 = vpack.c.bf16 %v1279_v36, %v1279_v36 }
 0x19a   : > { %v1223_v42 = vpop.f32.mrf.mxu0 }
 0x19b   : > { %v1278_v45 = vmax.f32 %v1275_v41, 0.0  ;;  %v1300_v47 = vrot.slane %v1282_v44, %v1564_v6 }
 0x19d   : > { %v1405_v46 = vpack.c.bf16 %v1278_v45, %v1277_v43 }
 0x19f   : > { %v1293_v48 = vrot.slane %v1405_v46, %v1564_v6 }
 0x1a1   : > { %v1301_v50 = vcombine.low %v1293_v48, %v1300_v47 }
 0x1a3   : > { %v1315_v51 = vsel %vm1313_vm5, %v1301_v50, %v1314_v49 }
 0x1a4   : > { %1316 = vst [vmem:[%s170_s24] sm:$0x3f] %v1315_v51 }
 0x1a5 PF: > { %s13_s12 = sadd.s32 1, %s1517_s12  }
 0x1a6   : > { %p10_p4 = scmp.ge.s32.totalorder %s13_s12, 4  }
 0x1a8   :  { %12 = sbr.rel (!%p10_p4) target bundleno = 1 (0x1), region = 70 }

// kernel: rsu3_forward.7
= control target key start
LH: loop header
LB: loop body
LE: loop exit
PB: predicated region body
PF: predicated region fallthrough
CT: control target
= control target key end

     0   :  { %s1690_s12 = smov 0   ;;  %s1888_s0 = inlined_call_operand.vmem [shape: bf16[2,3,342], index: 0, kind: input, shape index: {}]   ;;  %s1889_s1 = inlined_call_operand.vmem [shape: bf16[9,12,3], index: 1, kind: input, shape index: {}]   ;;  %s1890_s2 = inlined_call_operand.vmem [shape: f32[12,1], index: 2, kind: input, shape index: {}]   ;;  %s1891_s3 = inlined_call_operand.vmem [shape: bf16[2,12,288], index: 3, kind: output, shape index: {}]  }
   0x1 LB: > { %s1475_s13 = sadd.s32 4294967295, %s1655_s12   ;;  %p1479_p0 = scmp.ge.s32.totalorder %s1655_s12, 1  ;;  %s1655_s12 = sphi %s1690_s12, %s13_s12  }
   0x2   : > { %p137_p1 = scmp.lt.s32.totalorder %s1655_s12, 3 }
   0x4   : > { %p138_p2 = pnand %p1479_p0, %p137_p1 }
   0x5   : > { %p161_p3 = scmp.lt.s32.totalorder (!%p138_p2), %s1475_s13, 1  ;;  %s1660_s18 = smov (!%p138_p2), 127  }
   0x6   : > { %141 = sbr.rel (%p138_p2) target bundleno = 420 (0x1a4), region = 32  ;;  %s1661_s19 = smov (!%p138_p2), 126  }
   0x7   : > { %s1663_s20 = smov (!%p138_p2), 110   ;;  %s1664_s21 = smov (!%p138_p2), 109  }
   0x8   : > { %s1665_s22 = smov (!%p138_p2), 108   ;;  %s1666_s23 = smov (!%p138_p2), 92  }
   0x9   : > { %s1667_s24 = smov (!%p138_p2), 91   ;;  %s1668_s25 = smov (!%p138_p2), 90  }
   0xb   : > { %v188_v0 = vlaneseq  ;;  %v1657_v1 = vmov 1983009808   ;;  %s1893_s13 = smov (!%p161_p3, %s1475_s13), 1  ;;  %v1658_v5 = vmov 0.0   ;;  %vm1659_vm0 = vmmov 0   ;;  %v1370_v48 = vld [vmem:[%s1890_s2] sm:$0xff] }
   0xc   : > { %v186_v2 = vunpack.c.l.s4 %v1657_v1  ;;  %1553 = vmatprep.subr.bf16.mxu1 %v1658_v5  ;;  %s1607_s14 = smul.u32 6, %s1893_s13  ;;  %1555 = vmatprep.mubr.msk.bf16.mxu1 %vm1659_vm0, %v1658_v5  ;;  %v1662_v21 = vmov 0   ;;  %v1371_v49 = vld [vmem:[%s1890_s2 + $0x8] sm:$0xf]  ;;  %vm213_vm1 = vcmask 1040384   ;;  %vm214_vm2 = vcmask 1041408  }
   0xd   : > { %v189_v3 = vshrl.u32 %v188_v0, 7  ;;  %258 = vmatprep.mubr.bf16.mxu0 %v1662_v21  ;;  %1630 = vset.pattern.permute.xlu0 %v1662_v21  ;;  %v1669_v52 = vmov 65535   ;;  %vm206_vm3 = vcmask 1039360   ;;  %v1640_v62 = vld [vmem:[%s1889_s1 + $0x8] sm:$0x3f]   ;;  %vm443_vm4 = vcmask 1031168  }
   0xe   : > { %v187_v4 = vunpack.c.0.s8 %v186_v2  ;;  %s1707_s17 = scalar_lea.vmem %s1888_s0, %s1607_s14  ;;  %1631 = vset.pattern.permute.xlu1 %v1662_v21  ;;  %v215_v53 = vsel %vm213_vm1, 4294967295, %v1669_v52  ;;  %vm209_vm5 = vcmask 23552   ;;  %vm580_vm6 = vcmask 900096  }
   0xf   : > { %v174_v7 = vld [vmem:[%s1707_s17] sm:$0x3f]  ;;  %v1755_v55 = vsel %vm214_vm2, %v215_v53, 0  ;;  %vm717_vm7 = vcmask 891904   ;;  %vm854_vm8 = vcmask 883712   ;;  %vm991_vm9 = vcmask 752640  }
  0x10   : > { %v1702_v6 = vsub.s32 %v187_v4, %v189_v3  ;;  %v414_v8 = vld [vmem:[%s1707_s17] sm:$0x3f]  ;;  %v184_v10 = vcombine.high %v174_v7, %v174_v7  ;;  %vm1128_vm10 = vcmask 744448   ;;  %vm1265_vm11 = vcmask 736256  }
  0x11   : > { %v421_v15 = vcombine.high %v414_v8, %v414_v8  ;;  %v551_v16 = vld [vmem:[%s1707_s17] sm:$0x3f]  ;;  %vm1415_vm12 = vcmask 257024   ;;  %vm1418_vm13 = vcmask 254976  }
  0x12   : > { %v1714_v9 = vrot.slane %v174_v7, %v1702_v6  ;;  %v428_v11 = vrot.slane %v414_v8, %v1702_v6  ;;  %v1724_v14 = vrot.slane %v184_v10, %v1702_v6  ;;  %v558_v17 = vcombine.high %v551_v16, %v551_v16  ;;  %v688_v18 = vld [vmem:[%s1707_s17] sm:$0x3f] }
  0x13   : > { %v435_v19 = vrot.slane %v421_v15, %v1702_v6  ;;  %v565_v20 = vrot.slane %v551_v16, %v1702_v6  ;;  %v702_v23 = vrot.slane %v688_v18, %v1702_v6  ;;  %v695_v26 = vcombine.high %v688_v18, %v688_v18  ;;  %v825_v27 = vld [vmem:[%s1707_s17] sm:$0x3f] }
  0x14   : > { %200 = vrot.lane.b32.xlu1 %v1714_v9, %s1660_s18  ;;  %v1720_v12 = vcombine.high %v1714_v9, %v1714_v9  ;;  %v436_v13 = vcombine.high %v428_v11, %v428_v11  ;;  %v572_v22 = vrot.slane %v558_v17, %v1702_v6  ;;  %v832_v28 = vcombine.high %v825_v27, %v825_v27  ;;  %v962_v29 = vld [vmem:[%s1707_s17] sm:$0x3f] }
  0x15   : > { %v573_v24 = vcombine.high %v565_v20, %v565_v20  ;;  %v710_v25 = vcombine.high %v702_v23, %v702_v23  ;;  %v709_v30 = vrot.slane %v695_v26, %v1702_v6  ;;  %v839_v31 = vrot.slane %v825_v27, %v1702_v6  ;;  %v1099_v37 = vld [vmem:[%s1707_s17] sm:$0x3f] }
  0x16   : > { %202 = vrot.lane.b32.xlu0 %v1720_v12, %s1660_s18  ;;  %v846_v32 = vrot.slane %v832_v28, %v1702_v6  ;;  %v976_v33 = vrot.slane %v962_v29, %v1702_v6  ;;  %v969_v36 = vcombine.high %v962_v29, %v962_v29  ;;  %v1106_v38 = vcombine.high %v1099_v37, %v1099_v37  ;;  %v1236_v39 = vld [vmem:[%s1707_s17] sm:$0x3f]  ;;  %v1643_v29 = vld [vmem:[%s1889_s1 + $0x18] sm:$0x3f]  }
  0x17   : > { %v847_v34 = vcombine.high %v839_v31, %v839_v31  ;;  %v1113_v41 = vrot.slane %v1099_v37, %v1702_v6  ;;  %v1250_v43 = vrot.slane %v1236_v39, %v1702_v6  ;;  %v1243_v46 = vcombine.high %v1236_v39, %v1236_v39  ;;  %v1641_v10 = vld [vmem:[%s1889_s1] sm:$0x3f]  }
  0x18   : > { %439 = vrot.lane.b32.xlu1 %v436_v13, %s1661_s19  ;;  %v984_v35 = vcombine.high %v976_v33, %v976_v33  ;;  %v983_v40 = vrot.slane %v969_v36, %v1702_v6  ;;  %v1120_v42 = vrot.slane %v1106_v38, %v1702_v6  ;;  %v322_v60 = vand.u32 %v1755_v55, %v1720_v12  ;;  %v1644_v38 = vld [vmem:[%s1889_s1 + $0x20] sm:$0x3f]  }
  0x19   : > { %v1121_v44 = vcombine.high %v1113_v41, %v1113_v41  ;;  %v1258_v45 = vcombine.high %v1250_v43, %v1250_v43  ;;  %v1257_v47 = vrot.slane %v1243_v46, %v1702_v6  ;;  %v325_v63 = vand.u32 %v1755_v55, %v1724_v14 }
  0x1a   : > { %204 = vrot.lane.b32.xlu0 %v1724_v14, %s1660_s18  ;;  %v319_v3 = vand.u32 %v1755_v55, %v1714_v9 }
  0x1c   : > { %437 = vrot.lane.b32.xlu1 %v428_v11, %s1661_s19 }
  0x1e   : > { %441 = vrot.lane.b32.xlu0 %v435_v19, %s1661_s19  ;;  %v1642_v19 = vld [vmem:[%s1889_s1 + $0x10] sm:$0x3f]  }
  0x20   : > { %578 = vrot.lane.b32.xlu1 %v572_v22, %s1663_s20 }
  0x22   : > { %576 = vrot.lane.b32.xlu0 %v573_v24, %s1663_s20 }
  0x24   : > { %713 = vrot.lane.b32.xlu1 %v710_v25, %s1664_s21 }
  0x26   : > { %574 = vrot.lane.b32.xlu0 %v565_v20, %s1663_s20 }
  0x28   : > { %711 = vrot.lane.b32.xlu1 %v702_v23, %s1664_s21 }
  0x2a   : > { %715 = vrot.lane.b32.xlu0 %v709_v30, %s1664_s21 }
  0x2c   : > { %852 = vrot.lane.b32.xlu1 %v846_v32, %s1665_s22 }
  0x2e   : > { %850 = vrot.lane.b32.xlu0 %v847_v34, %s1665_s22 }
  0x30   : > { %987 = vrot.lane.b32.xlu1 %v984_v35, %s1666_s23 }
  0x32   : > { %848 = vrot.lane.b32.xlu0 %v839_v31, %s1665_s22 }
  0x34   : > { %985 = vrot.lane.b32.xlu1 %v976_v33, %s1666_s23 }
  0x36   : > { %989 = vrot.lane.b32.xlu0 %v983_v40, %s1666_s23  ;;  %s1608_s23 = smul.u32 24, %s1893_s13 }
  0x38   : > { %1126 = vrot.lane.b32.xlu1 %v1120_v42, %s1667_s24  ;;  %s170_s26 = scalar_lea.vmem %s1891_s3, %s1608_s23 }
  0x3a   : > { %1124 = vrot.lane.b32.xlu0 %v1121_v44, %s1667_s24 }
  0x3c   : > { %1261 = vrot.lane.b32.xlu1 %v1258_v45, %s1668_s25 }
  0x3e   : > { %1122 = vrot.lane.b32.xlu0 %v1113_v41, %s1667_s24 }
  0x40   : > { %1259 = vrot.lane.b32.xlu1 %v1250_v43, %s1668_s25 }
  0x42   : > { %1263 = vrot.lane.b32.xlu0 %v1257_v47, %s1668_s25  ;;  %v1645_v47 = vld [vmem:[%s1889_s1 + $0x28] sm:$0x3f]  }
  0x44   : > { %1379 = vperm.xlu1 %1631, %v1371_v49  }
  0x46   : > { %1374 = vperm.xlu0 %1630, %v1370_v48  }
  0x86   : > { %v201_v50 = vpop.permute.xlu1 %200 }
  0x88   : > { %v203_v51 = vpop.permute.xlu0 %202 }
  0x89   : > { %v207_v56 = vsel %vm206_vm3, %v201_v50, %v203_v51 }
  0x8a   : > { %v440_v54 = vpop.permute.xlu1 %439  ;;  %v218_v0 = vand.u32 %v1755_v55, %v207_v56 }
  0x8c   : > { %v205_v57 = vpop.permute.xlu0 %204 }
  0x8d   : > { %v224_v58 = vand.u32 %v1755_v55, %v205_v57  ;;  %v208_v59 = vsel %vm206_vm3, %v203_v51, %v205_v57  ;;  %v1646_v57 = vld [vmem:[%s1889_s1 + $0x30] sm:$0x3f]  }
  0x8e   : > { %v221_v61 = vand.u32 %v1755_v55, %v208_v59  ;;  %v438_v1 = vpop.permute.xlu1 %437 }
  0x8f   : > { %1554 = vmatpush3.bf16.msra.mxu1 %v224_v58  ;;  %v444_v9 = vsel %vm443_vm4, %v438_v1, %v440_v54 }
  0x90   : > { %240 = vmatprep.subr.bf16.mxu0 %v221_v61  ;;  %v442_v2 = vpop.permute.xlu0 %441  ;;  %1559 = vmatprep.subr.bf16.mxu1 %v1658_v5  ;;  %v450_v14 = vand.u32 %v444_v9, %v1755_v55 }
  0x91   : > { %241 = vmatpush1.bf16.msra.mxu0 %v218_v0  ;;  %v445_v4 = vsel %vm443_vm4, %v440_v54, %v442_v2  ;;  %v456_v11 = vand.u32 %v442_v2, %v1755_v55  ;;  %v1647_v0 = vld [vmem:[%s1889_s1 + $0x38] sm:$0x3f]  }
  0x92   : > { %1556 = vmatmul.mubr.msk.bf16.vlgmr.msra.gmra.mxu1 %vm209_vm5, %v1640_v62  ;;  %341 = vmatprep.subr.bf16.mxu0 %v322_v60  ;;  %v453_v6 = vand.u32 %v445_v4, %v1755_v55  ;;  %v579_v8 = vpop.permute.xlu1 %578 }
  0x93   : > { %1560 = vmatpush3.bf16.msra.mxu1 %v325_v63  ;;  %1561 = vmatprep.mubr.msk.bf16.mxu1 %vm1659_vm0, %v1658_v5  ;;  %v593_v20 = vand.u32 %v579_v8, %v1755_v55 }
  0x94   : > { %1485 = vmatmul.mubr.msk.bf16.vlgmr.msra.gmra.mxu0 %vm209_vm5, %v1640_v62  ;;  %v577_v7 = vpop.permute.xlu0 %576  ;;  %1565 = vmatprep.subr.bf16.mxu1 %v1658_v5 }
  0x95   : > { %342 = vmatpush1.bf16.msra.mxu0 %v319_v3  ;;  %359 = vmatprep.mubr.bf16.mxu0 %v1662_v21  ;;  %v582_v12 = vsel %vm580_vm6, %v577_v7, %v579_v8  ;;  %v1648_v3 = vld [vmem:[%s1889_s1 + $0x40] sm:$0x3f]  }
  0x96   : > { %472 = vmatprep.subr.bf16.mxu0 %v453_v6  ;;  %v590_v15 = vand.u32 %v582_v12, %v1755_v55  ;;  %v714_v16 = vpop.permute.xlu1 %713 }
  0x98   : > { %v575_v13 = vpop.permute.xlu0 %574 }
  0x99   : > { %v581_v18 = vsel %vm580_vm6, %v575_v13, %v577_v7 }
  0x9a   : > { %1562 = vmatmul.mubr.msk.bf16.vlgmr.msra.gmra.mxu1 %vm209_vm5, %v1641_v10  ;;  %v712_v23 = vpop.permute.xlu1 %711  ;;  %v587_v24 = vand.u32 %v581_v18, %v1755_v55 }
  0x9b   : > { %1566 = vmatpush3.bf16.msra.mxu1 %v456_v11  ;;  %1567 = vmatprep.mubr.msk.bf16.mxu1 %vm1659_vm0, %v1658_v5  ;;  %v718_v28 = vsel %vm717_vm7, %v712_v23, %v714_v16 }
  0x9c   : > { %1488 = vmatmul.mubr.msk.bf16.vlgmr.msra.gmra.mxu0 %vm209_vm5, %v1641_v10  ;;  %1571 = vmatprep.subr.bf16.mxu1 %v1658_v5  ;;  %v716_v17 = vpop.permute.xlu0 %715  ;;  %v724_v33 = vand.u32 %v718_v28, %v1755_v55 }
  0x9d   : > { %473 = vmatpush1.bf16.msra.mxu0 %v450_v14  ;;  %490 = vmatprep.mubr.bf16.mxu0 %v1662_v21  ;;  %v719_v22 = vsel %vm717_vm7, %v714_v16, %v716_v17  ;;  %v730_v30 = vand.u32 %v716_v17, %v1755_v55 }
  0x9e   : > { %609 = vmatprep.subr.bf16.mxu0 %v590_v15  ;;  %v727_v25 = vand.u32 %v719_v22, %v1755_v55  ;;  %v853_v27 = vpop.permute.xlu1 %852 }
  0x9f   : > { %v867_v39 = vand.u32 %v853_v27, %v1755_v55 }
  0xa0   : > { %v851_v26 = vpop.permute.xlu0 %850 }
  0xa1   : > { %v856_v31 = vsel %vm854_vm8, %v851_v26, %v853_v27 }
  0xa2   : > { %1568 = vmatmul.mubr.msk.bf16.vlgmr.msra.gmra.mxu1 %vm209_vm5, %v1642_v19  ;;  %v864_v34 = vand.u32 %v856_v31, %v1755_v55  ;;  %v988_v35 = vpop.permute.xlu1 %987 }
  0xa3   : > { %1572 = vmatpush3.bf16.msra.mxu1 %v593_v20  ;;  %1573 = vmatprep.mubr.msk.bf16.mxu1 %vm1659_vm0, %v1658_v5 }
  0xa4   : > { %1493 = vmatmul.mubr.msk.bf16.vlgmr.msra.gmra.mxu0 %vm209_vm5, %v1642_v19  ;;  %1577 = vmatprep.subr.bf16.mxu1 %v1658_v5  ;;  %v849_v32 = vpop.permute.xlu0 %848 }
  0xa5   : > { %610 = vmatpush1.bf16.msra.mxu0 %v587_v24  ;;  %627 = vmatprep.mubr.bf16.mxu0 %v1662_v21  ;;  %v855_v37 = vsel %vm854_vm8, %v849_v32, %v851_v26 }
  0xa6   : > { %746 = vmatprep.subr.bf16.mxu0 %v727_v25  ;;  %v986_v41 = vpop.permute.xlu1 %985  ;;  %v861_v42 = vand.u32 %v855_v37, %v1755_v55 }
  0xa7   : > { %v992_v46 = vsel %vm991_vm9, %v986_v41, %v988_v35 }
  0xa8   : > { %v990_v36 = vpop.permute.xlu0 %989  ;;  %v998_v51 = vand.u32 %v992_v46, %v1755_v55 }
  0xa9   : > { %v993_v40 = vsel %vm991_vm9, %v988_v35, %v990_v36  ;;  %v1004_v48 = vand.u32 %v990_v36, %v1755_v55 }
  0xaa   : > { %1574 = vmatmul.mubr.msk.bf16.vlgmr.msra.gmra.mxu1 %vm209_vm5, %v1643_v29  ;;  %v1001_v43 = vand.u32 %v993_v40, %v1755_v55  ;;  %v1127_v45 = vpop.permute.xlu1 %1126 }
  0xab   : > { %1578 = vmatpush3.bf16.msra.mxu1 %v730_v30  ;;  %1579 = vmatprep.mubr.msk.bf16.mxu1 %vm1659_vm0, %v1658_v5  ;;  %v1141_v58 = vand.u32 %v1127_v45, %v1755_v55 }
  0xac   : > { %1498 = vmatmul.mubr.msk.bf16.vlgmr.msra.gmra.mxu0 %vm209_vm5, %v1643_v29  ;;  %1583 = vmatprep.subr.bf16.mxu1 %v1658_v5  ;;  %v1125_v44 = vpop.permute.xlu0 %1124 }
  0xad   : > { %747 = vmatpush1.bf16.msra.mxu0 %v724_v33  ;;  %764 = vmatprep.mubr.bf16.mxu0 %v1662_v21  ;;  %v1130_v49 = vsel %vm1128_vm10, %v1125_v44, %v1127_v45 }
  0xae   : > { %883 = vmatprep.subr.bf16.mxu0 %v864_v34  ;;  %v1138_v52 = vand.u32 %v1130_v49, %v1755_v55  ;;  %v1262_v54 = vpop.permute.xlu1 %1261 }
  0xb0   : > { %v1123_v50 = vpop.permute.xlu0 %1122 }
  0xb1   : > { %v1129_v56 = vsel %vm1128_vm10, %v1123_v50, %v1125_v44 }
  0xb2   : > { %1580 = vmatmul.mubr.msk.bf16.vlgmr.msra.gmra.mxu1 %vm209_vm5, %v1644_v38  ;;  %v1135_v60 = vand.u32 %v1129_v56, %v1755_v55  ;;  %v1260_v62 = vpop.permute.xlu1 %1259 }
  0xb3   : > { %1584 = vmatpush3.bf16.msra.mxu1 %v867_v39  ;;  %1585 = vmatprep.mubr.msk.bf16.mxu1 %vm1659_vm0, %v1658_v5  ;;  %v1266_v63 = vsel %vm1265_vm11, %v1260_v62, %v1262_v54 }
  0xb4   : > { %1503 = vmatmul.mubr.msk.bf16.vlgmr.msra.gmra.mxu0 %vm209_vm5, %v1644_v38  ;;  %1589 = vmatprep.subr.bf16.mxu1 %v1658_v5  ;;  %v1264_v53 = vpop.permute.xlu0 %1263  ;;  %v1272_v2 = vand.u32 %v1266_v63, %v1755_v55 }
  0xb5   : > { %884 = vmatpush1.bf16.msra.mxu0 %v861_v42  ;;  %901 = vmatprep.mubr.bf16.mxu0 %v1662_v21  ;;  %v1267_v59 = vsel %vm1265_vm11, %v1262_v54, %v1264_v53  ;;  %v1278_v1 = vand.u32 %v1264_v53, %v1755_v55 }
  0xb6   : > { %1020 = vmatprep.subr.bf16.mxu0 %v1001_v43  ;;  %v1275_v61 = vand.u32 %v1267_v59, %v1755_v55 }
  0xba   : > { %1586 = vmatmul.mubr.msk.bf16.vlgmr.msra.gmra.mxu1 %vm209_vm5, %v1645_v47 }
  0xbb   : > { %1590 = vmatpush3.bf16.msra.mxu1 %v1004_v48  ;;  %1591 = vmatprep.mubr.msk.bf16.mxu1 %vm1659_vm0, %v1658_v5 }
  0xbc   : > { %1508 = vmatmul.mubr.msk.bf16.vlgmr.msra.gmra.mxu0 %vm209_vm5, %v1645_v47  ;;  %1595 = vmatprep.subr.bf16.mxu1 %v1658_v5 }
  0xbd   : > { %1021 = vmatpush1.bf16.msra.mxu0 %v998_v51  ;;  %1038 = vmatprep.mubr.bf16.mxu0 %v1662_v21 }
  0xbe   : > { %1157 = vmatprep.subr.bf16.mxu0 %v1138_v52 }
  0xc2   : > { %1592 = vmatmul.mubr.msk.bf16.vlgmr.msra.gmra.mxu1 %vm209_vm5, %v1646_v57 }
  0xc3   : > { %1596 = vmatpush3.bf16.msra.mxu1 %v1141_v58  ;;  %1597 = vmatprep.mubr.msk.bf16.mxu1 %vm1659_vm0, %v1658_v5 }
  0xc4   : > { %1513 = vmatmul.mubr.msk.bf16.vlgmr.msra.gmra.mxu0 %vm209_vm5, %v1646_v57  ;;  %1601 = vmatprep.subr.bf16.mxu1 %v1658_v5 }
  0xc5   : > { %1158 = vmatpush1.bf16.msra.mxu0 %v1135_v60  ;;  %1175 = vmatprep.mubr.bf16.mxu0 %v1662_v21 }
  0xc6   : > { %1294 = vmatprep.subr.bf16.mxu0 %v1275_v61 }
  0xca   : > { %1598 = vmatmul.mubr.msk.bf16.vlgmr.msra.gmra.mxu1 %vm209_vm5, %v1647_v0 }
  0xcb   : > { %1602 = vmatpush3.bf16.msra.mxu1 %v1278_v1  ;;  %1603 = vmatprep.mubr.msk.bf16.mxu1 %vm1659_vm0, %v1658_v5 }
  0xcc   : > { %1518 = vmatmul.mubr.msk.bf16.vlgmr.msra.gmra.mxu0 %vm209_vm5, %v1647_v0 }
  0xcd   : > { %1295 = vmatpush1.bf16.msra.mxu0 %v1272_v2  ;;  %1312 = vmatprep.mubr.bf16.mxu0 %v1662_v21 }
  0xd2   : > { %1604 = vmatmul.mubr.msk.bf16.vlgmr.msra.gmra.mxu1 %vm209_vm5, %v1648_v3 }
  0xd4   : > { %1523 = vmatmul.mubr.msk.bf16.vlgmr.msra.gmra.mxu0 %vm209_vm5, %v1648_v3 }
 0x152   : > { %v303_v55 = vpop.f32.mrf.mxu1 }
 0x154   : > { %v260_v4 = vpop.f32.mrf.mxu0  ;;  %v1557_v6 = vpop.f32.mrf.mxu1 }
 0x156   : > { %v262_v7 = vpop.f32.mrf.mxu0  ;;  %v306_v8 = vpop.f32.mrf.mxu1 }
 0x158   : > { %v1878_v9 = vpop.f32.mrf.mxu0  ;;  %v1558_v5 = vpop.f32.mrf.mxu1 }
 0x15a   : > { %v266_v10 = vpop.f32.mrf.mxu0  ;;  %v404_v11 = vpop.f32.mrf.mxu1 }
 0x15b   : > { %v405_v54 = vadd.f32 %v404_v11, %v303_v55 }
 0x15c   : > { %v361_v12 = vpop.f32.mrf.mxu0  ;;  %v1563_v21 = vpop.f32.mrf.mxu1 }
 0x15d   : > { %v362_v58 = vadd.f32 %v361_v12, %v260_v4 }
 0x15e   : > { %v363_v13 = vpop.f32.mrf.mxu0  ;;  %v407_v14 = vpop.f32.mrf.mxu1 }
 0x15f   : > { %v364_v62 = vadd.f32 %v363_v13, %v262_v7  ;;  %v408_v63 = vadd.f32 %v407_v14, %v306_v8 }
 0x160   : > { %v365_v15 = vpop.f32.mrf.mxu0  ;;  %v1564_v16 = vpop.f32.mrf.mxu1 }
 0x162   : > { %v367_v17 = vpop.f32.mrf.mxu0  ;;  %v535_v18 = vpop.f32.mrf.mxu1 }
 0x163   : > { %v544_v59 = vadd.f32 %v535_v18, %v405_v54 }
 0x164   : > { %v492_v19 = vpop.f32.mrf.mxu0  ;;  %v1569_v20 = vpop.f32.mrf.mxu1 }
 0x165   : > { %v542_v0 = vadd.f32 %v492_v19, %v362_v58  ;;  %v366_v20 = vadd.f32 %v365_v15, %v1878_v9 }
 0x166   : > { %v494_v22 = vpop.f32.mrf.mxu0  ;;  %v538_v23 = vpop.f32.mrf.mxu1 }
 0x167   : > { %v543_v6 = vadd.f32 %v494_v22, %v364_v62  ;;  %v547_v5 = vadd.f32 %v538_v23, %v408_v63 }
 0x168   : > { %v496_v24 = vpop.f32.mrf.mxu0  ;;  %v1570_v25 = vpop.f32.mrf.mxu1 }
 0x169   : > { %v368_v25 = vadd.f32 %v367_v17, %v266_v10 }
 0x16a   : > { %v498_v26 = vpop.f32.mrf.mxu0  ;;  %v672_v27 = vpop.f32.mrf.mxu1 }
 0x16b   : > { %v681_v1 = vadd.f32 %v672_v27, %v544_v59  ;;  %v546_v7 = vadd.f32 %v498_v26, %v368_v25 }
 0x16c   : > { %v629_v28 = vpop.f32.mrf.mxu0  ;;  %v1575_v29 = vpop.f32.mrf.mxu1 }
 0x16d   : > { %v679_v21 = vadd.f32 %v629_v28, %v542_v0 }
 0x16e   : > { %v631_v30 = vpop.f32.mrf.mxu0  ;;  %v675_v31 = vpop.f32.mrf.mxu1 }
 0x16f   : > { %v680_v29 = vadd.f32 %v631_v30, %v543_v6  ;;  %v684_v4 = vadd.f32 %v675_v31, %v547_v5  ;;  %v1375_v30 = vpop.permute.xlu0 %1374 }
 0x170   : > { %v633_v32 = vpop.f32.mrf.mxu0  ;;  %v1576_v33 = vpop.f32.mrf.mxu1 }
 0x171   : > { %v545_v33 = vadd.f32 %v496_v24, %v366_v20 }
 0x172   : > { %v635_v34 = vpop.f32.mrf.mxu0  ;;  %v809_v35 = vpop.f32.mrf.mxu1 }
 0x173   : > { %v818_v16 = vadd.f32 %v809_v35, %v681_v1  ;;  %v682_v23 = vadd.f32 %v633_v32, %v545_v33  ;;  %v683_v28 = vadd.f32 %v635_v34, %v546_v7 }
 0x174   : > { %v766_v36 = vpop.f32.mrf.mxu0  ;;  %v1581_v37 = vpop.f32.mrf.mxu1 }
 0x175   : > { %v816_v12 = vadd.f32 %v766_v36, %v679_v21 }
 0x176   : > { %v768_v38 = vpop.f32.mrf.mxu0  ;;  %v812_v39 = vpop.f32.mrf.mxu1 }
 0x177   : > { %v817_v14 = vadd.f32 %v768_v38, %v680_v29  ;;  %v821_v19 = vadd.f32 %v812_v39, %v684_v4 }
 0x178   : > { %v770_v40 = vpop.f32.mrf.mxu0  ;;  %v1582_v41 = vpop.f32.mrf.mxu1 }
 0x179   : > { %v819_v31 = vadd.f32 %v770_v40, %v682_v23 }
 0x17a   : > { %v772_v42 = vpop.f32.mrf.mxu0  ;;  %v946_v43 = vpop.f32.mrf.mxu1 }
 0x17b   : > { %v955_v18 = vadd.f32 %v946_v43, %v818_v16  ;;  %v820_v36 = vadd.f32 %v772_v42, %v683_v28 }
 0x17c   : > { %v903_v44 = vpop.f32.mrf.mxu0  ;;  %v1587_v45 = vpop.f32.mrf.mxu1 }
 0x17d   : > { %v953_v27 = vadd.f32 %v903_v44, %v816_v12 }
 0x17e   : > { %v905_v46 = vpop.f32.mrf.mxu0  ;;  %v949_v47 = vpop.f32.mrf.mxu1 }
 0x17f   : > { %v954_v9 = vadd.f32 %v905_v46, %v817_v14  ;;  %v958_v10 = vadd.f32 %v949_v47, %v821_v19 }
 0x180   : > { %v907_v48 = vpop.f32.mrf.mxu0  ;;  %v1588_v49 = vpop.f32.mrf.mxu1 }
 0x181   : > { %v956_v44 = vadd.f32 %v907_v48, %v819_v31 }
 0x182   : > { %v909_v50 = vpop.f32.mrf.mxu0  ;;  %v1083_v51 = vpop.f32.mrf.mxu1 }
 0x183   : > { %v1092_v22 = vadd.f32 %v1083_v51, %v955_v18  ;;  %v957_v45 = vadd.f32 %v909_v50, %v820_v36 }
 0x184   : > { %v1040_v52 = vpop.f32.mrf.mxu0  ;;  %v1593_v53 = vpop.f32.mrf.mxu1 }
 0x185   : > { %v1090_v15 = vadd.f32 %v1040_v52, %v953_v27  ;;  %v1380_v52 = vpop.permute.xlu1 %1379 }
 0x186   : > { %v1042_v56 = vpop.f32.mrf.mxu0  ;;  %v1086_v57 = vpop.f32.mrf.mxu1 }
 0x187   : > { %v1091_v41 = vadd.f32 %v1042_v56, %v954_v9  ;;  %v1095_v43 = vadd.f32 %v1086_v57, %v958_v10 }
 0x188   : > { %v1044_v60 = vpop.f32.mrf.mxu0  ;;  %v1594_v61 = vpop.f32.mrf.mxu1 }
 0x189   : > { %v1093_v53 = vadd.f32 %v1044_v60, %v956_v44 }
 0x18a   : > { %v1046_v2 = vpop.f32.mrf.mxu0  ;;  %v1220_v3 = vpop.f32.mrf.mxu1 }
 0x18b   : > { %v1229_v17 = vadd.f32 %v1220_v3, %v1092_v22  ;;  %v1094_v54 = vadd.f32 %v1046_v2, %v957_v45 }
 0x18c   : > { %v1177_v55 = vpop.f32.mrf.mxu0  ;;  %v1599_v11 = vpop.f32.mrf.mxu1 }
 0x18d   : > { %v1227_v38 = vadd.f32 %v1177_v55, %v1090_v15 }
 0x18e   : > { %v1179_v8 = vpop.f32.mrf.mxu0  ;;  %v1223_v13 = vpop.f32.mrf.mxu1 }
 0x18f   : > { %v1228_v49 = vadd.f32 %v1179_v8, %v1091_v41  ;;  %v1232_v46 = vadd.f32 %v1223_v13, %v1095_v43 }
 0x190   : > { %v1181_v35 = vpop.f32.mrf.mxu0  ;;  %v1600_v37 = vpop.f32.mrf.mxu1 }
 0x191   : > { %v1230_v61 = vadd.f32 %v1181_v35, %v1093_v53 }
 0x192   : > { %v1183_v24 = vpop.f32.mrf.mxu0  ;;  %v1357_v26 = vpop.f32.mrf.mxu1 }
 0x193   : > { %v1366_v39 = vadd.f32 %v1357_v26, %v1229_v17  ;;  %v1231_v62 = vadd.f32 %v1183_v24, %v1094_v54 }
 0x194   : > { %v1314_v32 = vpop.f32.mrf.mxu0  ;;  %v1605_v34 = vpop.f32.mrf.mxu1 }
 0x195   : > { %v1364_v51 = vadd.f32 %v1314_v32, %v1227_v38  ;;  %v1384_v47 = vadd.f32 %v1375_v30, %v1366_v39 }
 0x196   : > { %v1316_v40 = vpop.f32.mrf.mxu0  ;;  %v1360_v42 = vpop.f32.mrf.mxu1 }
 0x197   : > { %v1382_v58 = vadd.f32 %v1375_v30, %v1364_v51  ;;  %v1390_v59 = vmax.f32 %v1384_v47, 0.0  ;;  %v1365_v56 = vadd.f32 %v1316_v40, %v1228_v49  ;;  %v1369_v57 = vadd.f32 %v1360_v42, %v1232_v46 }
 0x198   : > { %v1318_v48 = vpop.f32.mrf.mxu0  ;;  %v1606_v50 = vpop.f32.mrf.mxu1 }
 0x199   : > { %v1532_v63 = vpack.c.bf16 %v1390_v59, %v1390_v59  ;;  %v1383_v0 = vadd.f32 %v1375_v30, %v1365_v56  ;;  %v1387_v1 = vadd.f32 %v1380_v52, %v1369_v57  ;;  %v1367_v60 = vadd.f32 %v1318_v48, %v1230_v61 }
 0x19a   : > { %v1320_v2 = vpop.f32.mrf.mxu0  ;;  %v1388_v3 = vmax.f32 %v1382_v58, 0.0 }
 0x19b   : > { %1416 = vst.msk [vmem:[%s170_s26 + $0x8] sm:$0xf] %vm1415_vm12, %v1532_v63  ;;  %v1389_v6 = vmax.f32 %v1383_v0, 0.0  ;;  %v1393_v5 = vmax.f32 %v1387_v1, 0.0  ;;  %v1368_v21 = vadd.f32 %v1320_v2, %v1231_v62  ;;  %v1385_v16 = vadd.f32 %v1380_v52, %v1367_v60 }
 0x19d   : > { %v1531_v20 = vpack.c.bf16 %v1389_v6, %v1388_v3  ;;  %v1534_v25 = vpack.c.bf16 %v1393_v5, %v1393_v5  ;;  %v1386_v55 = vadd.f32 %v1380_v52, %v1368_v21  ;;  %v1391_v11 = vmax.f32 %v1385_v16, 0.0 }
 0x19f   : > { %1414 = vst [vmem:[%s170_s26] sm:$0xff] %v1531_v20  ;;  %1419 = vst.msk [vmem:[%s170_s26 + $0x14] sm:$0x3] %vm1418_vm13, %v1534_v25  ;;  %v1392_v29 = vmax.f32 %v1386_v55, 0.0 }
 0x1a1   : > { %v1533_v4 = vpack.c.bf16 %v1392_v29, %v1391_v11 }
 0x1a3   : > { %1417 = vst [vmem:[%s170_s26 + $0xc] sm:$0x33] %v1533_v4 }
 0x1a4 PF: > { %s13_s12 = sadd.s32 1, %s1655_s12  }
 0x1a5   : > { %p10_p4 = scmp.ge.s32.totalorder %s13_s12, 4  }
 0x1a7   :  { %12 = sbr.rel (!%p10_p4) target bundleno = 1 (0x1), region = 70 }

// kernel: rsu3_forward.8
= control target key start
LH: loop header
LB: loop body
LE: loop exit
PB: predicated region body
PF: predicated region fallthrough
CT: control target
= control target key end

     0   :  { %s982_s12 = smov 0   ;;  %s1084_s0 = inlined_call_operand.vmem [shape: bf16[2,12,110], index: 0, kind: input, shape index: {}]   ;;  %s1085_s1 = inlined_call_operand.vmem [shape: bf16[9,12,12], index: 1, kind: input, shape index: {}]   ;;  %s1086_s2 = inlined_call_operand.vmem [shape: f32[12,1], index: 2, kind: input, shape index: {}]   ;;  %s1087_s3 = inlined_call_operand.vmem [shape: bf16[2,12,80], index: 3, kind: output, shape index: {}]  }
   0x1 LB: > { %s788_s13 = sadd.s32 4294967295, %s949_s12   ;;  %p792_p0 = scmp.ge.s32.totalorder %s949_s12, 1  ;;  %s949_s12 = sphi %s982_s12, %s13_s12  }
   0x2   : > { %p137_p1 = scmp.lt.s32.totalorder %s949_s12, 3 }
   0x4   : > { %p138_p2 = pnand %p792_p0, %p137_p1 }
   0x5   : > { %p161_p3 = scmp.lt.s32.totalorder (!%p138_p2), %s788_s13, 1  ;;  %s953_s18 = smov (!%p138_p2), 127  }
   0x6   : > { %141 = sbr.rel (%p138_p2) target bundleno = 372 (0x174), region = 32  ;;  %s954_s19 = smov (!%p138_p2), 118  }
   0x7   : > { %s955_s22 = smov (!%p138_p2), 126   ;;  %s956_s23 = smov (!%p138_p2), 117  }
   0x8   : > { %s957_s24 = smov (!%p138_p2), 116   ;;  %s958_s25 = smov (!%p138_p2), 108  }
   0x9   : > { %s959_s26 = smov (!%p138_p2), 107   ;;  %s960_s27 = smov (!%p138_p2), 106  }
   0xb   : > { %v951_v0 = vmov 0.0   ;;  %s1089_s13 = smov (!%p161_p3, %s788_s13), 1  ;;  %vm952_vm0 = vmmov 0   ;;  %vm195_vm1 = vcmask 1045504   ;;  %vm191_vm2 = vcmask 97280   ;;  %v705_v4 = vld [vmem:[%s1086_s2] sm:$0xff] }
   0xc   : > { %858 = vmatprep.subr.bf16.mxu0 %v951_v0  ;;  %864 = vmatprep.subr.bf16.mxu1 %v951_v0  ;;  %s836_s14 = sshll.u32 %s1089_s13, 3  ;;  %v935_v3 = vld [vmem:[%s1085_s1] sm:$0x3f]   ;;  %v706_v5 = vld [vmem:[%s1086_s2 + $0x8] sm:$0xf]  ;;  %v961_v6 = vmov 0  }
   0xd   : > { %860 = vmatprep.mubr.msk.bf16.mxu0 %vm952_vm0, %v951_v0  ;;  %866 = vmatprep.mubr.msk.bf16.mxu1 %vm952_vm0, %v951_v0  ;;  %s165_s17 = scalar_lea.vmem %s1084_s0, %s836_s14  ;;  %v934_v10 = vld [vmem:[%s1085_s1 + $0x8] sm:$0x3f]   ;;  %v937_v12 = vld [vmem:[%s1085_s1 + $0x18] sm:$0x3f]   ;;  %v936_v17 = vld [vmem:[%s1085_s1 + $0x10] sm:$0x3f]  }
   0xe   : > { %v933_v1 = vld [vmem:[%s165_s17] sm:$0x3f]   ;;  %931 = vset.pattern.permute.xlu0 %v961_v6  ;;  %932 = vset.pattern.permute.xlu1 %v961_v6  ;;  %v939_v19 = vld [vmem:[%s1085_s1 + $0x28] sm:$0x3f]   ;;  %v941_v25 = vld [vmem:[%s1085_s1 + $0x38] sm:$0x3f]  }
   0xf   : > { %189 = vrot.lane.b32.xlu0 %v933_v1, %s953_s18  ;;  %359 = vrot.lane.b32.xlu1 %v933_v1, %s954_s19  ;;  %v249_v2 = vsel %vm195_vm1, %v933_v1, 0  ;;  %v938_v24 = vld [vmem:[%s1085_s1 + $0x20] sm:$0x3f]   ;;  %v940_v28 = vld [vmem:[%s1085_s1 + $0x30] sm:$0x3f]   ;;  %vm729_vm3 = vcmask 650240  }
  0x10   : > { %865 = vmatpush3.bf16.msra.mxu1 %v249_v2  ;;  %v942_v30 = vld [vmem:[%s1085_s1 + $0x40] sm:$0x3f]   ;;  %vm731_vm4 = vcmask 648192  }
  0x11   : > { %876 = vmatprep.subr.bf16.mxu1 %v951_v0 }
  0x13   : > { %300 = vrot.lane.b32.xlu0 %v933_v1, %s955_s22  ;;  %418 = vrot.lane.b32.xlu1 %v933_v1, %s956_s23 }
  0x14   : > { %867 = vmatmul.mubr.msk.bf16.vlgmr.msra.gmra.mxu1 %vm191_vm2, %v935_v3 }
  0x15   : > { %878 = vmatprep.mubr.msk.bf16.mxu1 %vm952_vm0, %v951_v0 }
  0x17   : > { %477 = vrot.lane.b32.xlu0 %v933_v1, %s957_s24  ;;  %536 = vrot.lane.b32.xlu1 %v933_v1, %s958_s25 }
  0x1b   : > { %595 = vrot.lane.b32.xlu0 %v933_v1, %s959_s26  ;;  %654 = vrot.lane.b32.xlu1 %v933_v1, %s960_s27  ;;  %s170_s26 = scalar_lea.vmem %s1087_s3, %s836_s14 }
  0x1f   : > { %709 = vperm.xlu0 %931, %v705_v4   ;;  %714 = vperm.xlu1 %932, %v706_v5  }
  0x81   : > { %v190_v7 = vpop.permute.xlu0 %189  ;;  %v360_v8 = vpop.permute.xlu1 %359 }
  0x82   : > { %v197_v9 = vsel %vm195_vm1, %v190_v7, 0  ;;  %v365_v11 = vsel %vm195_vm1, %v360_v8, 0 }
  0x83   : > { %859 = vmatpush3.bf16.msra.mxu0 %v197_v9  ;;  %877 = vmatpush3.bf16.msra.mxu1 %v365_v11 }
  0x84   : > { %870 = vmatprep.subr.bf16.mxu0 %v951_v0  ;;  %888 = vmatprep.subr.bf16.mxu1 %v951_v0 }
  0x85   : > { %v301_v13 = vpop.permute.xlu0 %300  ;;  %v419_v15 = vpop.permute.xlu1 %418 }
  0x86   : > { %v306_v14 = vsel %vm195_vm1, %v301_v13, 0  ;;  %861 = vmatmul.mubr.msk.bf16.vlgmr.msra.gmra.mxu0 %vm191_vm2, %v934_v10  ;;  %879 = vmatmul.mubr.msk.bf16.vlgmr.msra.gmra.mxu1 %vm191_vm2, %v937_v12  ;;  %v424_v20 = vsel %vm195_vm1, %v419_v15, 0 }
  0x87   : > { %871 = vmatpush3.bf16.msra.mxu0 %v306_v14  ;;  %872 = vmatprep.mubr.msk.bf16.mxu0 %vm952_vm0, %v951_v0 }
  0x88   : > { %882 = vmatprep.subr.bf16.mxu0 %v951_v0  ;;  %890 = vmatprep.mubr.msk.bf16.mxu1 %vm952_vm0, %v951_v0 }
  0x89   : > { %v478_v16 = vpop.permute.xlu0 %477  ;;  %v537_v23 = vpop.permute.xlu1 %536 }
  0x8a   : > { %v483_v18 = vsel %vm195_vm1, %v478_v16, 0  ;;  %v542_v26 = vsel %vm195_vm1, %v537_v23, 0 }
  0x8b   : > { %889 = vmatpush3.bf16.msra.mxu1 %v483_v18 }
  0x8c   : > { %900 = vmatprep.subr.bf16.mxu1 %v951_v0 }
  0x8d   : > { %v596_v21 = vpop.permute.xlu0 %595  ;;  %v655_v27 = vpop.permute.xlu1 %654 }
  0x8e   : > { %873 = vmatmul.mubr.msk.bf16.vlgmr.msra.gmra.mxu0 %vm191_vm2, %v936_v17  ;;  %891 = vmatmul.mubr.msk.bf16.vlgmr.msra.gmra.mxu1 %vm191_vm2, %v939_v19  ;;  %v601_v22 = vsel %vm195_vm1, %v596_v21, 0  ;;  %v660_v29 = vsel %vm195_vm1, %v655_v27, 0 }
  0x8f   : > { %883 = vmatpush3.bf16.msra.mxu0 %v424_v20  ;;  %884 = vmatprep.mubr.msk.bf16.mxu0 %vm952_vm0, %v951_v0 }
  0x90   : > { %894 = vmatprep.subr.bf16.mxu0 %v951_v0  ;;  %901 = vmatpush3.bf16.msra.mxu1 %v601_v22 }
  0x91   : > { %902 = vmatprep.mubr.msk.bf16.mxu1 %vm952_vm0, %v951_v0 }
  0x96   : > { %885 = vmatmul.mubr.msk.bf16.vlgmr.msra.gmra.mxu0 %vm191_vm2, %v938_v24  ;;  %903 = vmatmul.mubr.msk.bf16.vlgmr.msra.gmra.mxu1 %vm191_vm2, %v941_v25 }
  0x97   : > { %895 = vmatpush3.bf16.msra.mxu0 %v542_v26  ;;  %896 = vmatprep.mubr.msk.bf16.mxu0 %vm952_vm0, %v951_v0 }
  0x98   : > { %906 = vmatprep.subr.bf16.mxu0 %v951_v0 }
  0x9a   : > { %v710_v13 = vpop.permute.xlu0 %709  ;;  %v715_v19 = vpop.permute.xlu1 %714 }
  0x9e   : > { %897 = vmatmul.mubr.msk.bf16.vlgmr.msra.gmra.mxu0 %vm191_vm2, %v940_v28 }
  0x9f   : > { %907 = vmatpush3.bf16.msra.mxu0 %v660_v29  ;;  %908 = vmatprep.mubr.msk.bf16.mxu0 %vm952_vm0, %v951_v0 }
  0xa6   : > { %909 = vmatmul.mubr.msk.bf16.vlgmr.msra.gmra.mxu0 %vm191_vm2, %v942_v30 }
  0xd4   : > { %v285_v31 = vpop.f32.mrf.mxu1 }
  0xd6   : > { %v868_v32 = vpop.f32.mrf.mxu1 }
  0xd8   : > { %v288_v33 = vpop.f32.mrf.mxu1 }
  0xda   : > { %v869_v34 = vpop.f32.mrf.mxu1 }
 0x146   : > { %v233_v35 = vpop.f32.mrf.mxu0  ;;  %v401_v36 = vpop.f32.mrf.mxu1 }
 0x147   : > { %v286_v49 = vadd.f32 %v285_v31, %v233_v35 }
 0x148   : > { %v862_v37 = vpop.f32.mrf.mxu0  ;;  %v880_v38 = vpop.f32.mrf.mxu1 }
 0x14a   : > { %v236_v39 = vpop.f32.mrf.mxu0  ;;  %v404_v40 = vpop.f32.mrf.mxu1 }
 0x14b   : > { %v289_v55 = vadd.f32 %v288_v33, %v236_v39 }
 0x14c   : > { %v863_v41 = vpop.f32.mrf.mxu0  ;;  %v881_v42 = vpop.f32.mrf.mxu1 }
 0x14e   : > { %v342_v43 = vpop.f32.mrf.mxu0  ;;  %v519_v44 = vpop.f32.mrf.mxu1 }
 0x14f   : > { %v349_v52 = vadd.f32 %v342_v43, %v286_v49 }
 0x150   : > { %v874_v45 = vpop.f32.mrf.mxu0  ;;  %v892_v46 = vpop.f32.mrf.mxu1 }
 0x151   : > { %v408_v58 = vadd.f32 %v401_v36, %v349_v52 }
 0x152   : > { %v345_v47 = vpop.f32.mrf.mxu0  ;;  %v522_v48 = vpop.f32.mrf.mxu1 }
 0x153   : > { %v350_v59 = vadd.f32 %v345_v47, %v289_v55 }
 0x154   : > { %v875_v50 = vpop.f32.mrf.mxu0  ;;  %v893_v51 = vpop.f32.mrf.mxu1 }
 0x155   : > { %v409_v1 = vadd.f32 %v404_v40, %v350_v59 }
 0x156   : > { %v460_v53 = vpop.f32.mrf.mxu0  ;;  %v637_v54 = vpop.f32.mrf.mxu1 }
 0x157   : > { %v467_v62 = vadd.f32 %v460_v53, %v408_v58 }
 0x158   : > { %v886_v56 = vpop.f32.mrf.mxu0  ;;  %v904_v57 = vpop.f32.mrf.mxu1 }
 0x159   : > { %v526_v3 = vadd.f32 %v519_v44, %v467_v62 }
 0x15a   : > { %v463_v60 = vpop.f32.mrf.mxu0  ;;  %v640_v61 = vpop.f32.mrf.mxu1 }
 0x15b   : > { %v468_v4 = vadd.f32 %v463_v60, %v409_v1 }
 0x15c   : > { %v887_v63 = vpop.f32.mrf.mxu0  ;;  %v905_v0 = vpop.f32.mrf.mxu1 }
 0x15d   : > { %v527_v8 = vadd.f32 %v522_v48, %v468_v4 }
 0x15e   : > { %v578_v2 = vpop.f32.mrf.mxu0 }
 0x15f   : > { %v585_v6 = vadd.f32 %v578_v2, %v526_v3 }
 0x160   : > { %v898_v5 = vpop.f32.mrf.mxu0 }
 0x161   : > { %v644_v10 = vadd.f32 %v637_v54, %v585_v6 }
 0x162   : > { %v581_v7 = vpop.f32.mrf.mxu0 }
 0x163   : > { %v586_v11 = vadd.f32 %v581_v7, %v527_v8 }
 0x164   : > { %v899_v9 = vpop.f32.mrf.mxu0 }
 0x165   : > { %v645_v16 = vadd.f32 %v640_v61, %v586_v11 }
 0x166   : > { %v696_v12 = vpop.f32.mrf.mxu0 }
 0x167   : > { %v703_v14 = vadd.f32 %v696_v12, %v644_v10 }
 0x168   : > { %v910_v15 = vpop.f32.mrf.mxu0 }
 0x169   : > { %v717_v17 = vadd.f32 %v710_v13, %v703_v14 }
 0x16a   : > { %v699_v18 = vpop.f32.mrf.mxu0 }
 0x16b   : > { %v719_v20 = vmax.f32 %v717_v17, 0.0  ;;  %v704_v21 = vadd.f32 %v699_v18, %v645_v16 }
 0x16c   : > { %v911_v22 = vpop.f32.mrf.mxu0 }
 0x16d   : > { %v838_v23 = vpack.c.bf16 %v719_v20, %v719_v20  ;;  %v718_v24 = vadd.f32 %v715_v19, %v704_v21 }
 0x16f   : > { %730 = vst.msk [vmem:[%s170_s26] sm:$0xf] %vm729_vm3, %v838_v23  ;;  %v720_v25 = vmax.f32 %v718_v24, 0.0 }
 0x171   : > { %v839_v26 = vpack.c.bf16 %v720_v25, %v720_v25 }
 0x173   : > { %732 = vst.msk [vmem:[%s170_s26 + $0x4] sm:$0x3] %vm731_vm4, %v839_v26 }
 0x174 PF: > { %s13_s12 = sadd.s32 1, %s949_s12  }
 0x175   : > { %p10_p4 = scmp.ge.s32.totalorder %s13_s12, 4  }
 0x177   :  { %12 = sbr.rel (!%p10_p4) target bundleno = 1 (0x1), region = 70 }

// kernel: rsu3_forward.9
= control target key start
LH: loop header
LB: loop body
LE: loop exit
PB: predicated region body
PF: predicated region fallthrough
CT: control target
= control target key end

     0   :  { %s1009_s12 = smov 0   ;;  %s1108_s0 = inlined_call_operand.vmem [shape: bf16[2,12,156], index: 0, kind: input, shape index: {}]   ;;  %s1109_s1 = inlined_call_operand.vmem [shape: bf16[9,12,12], index: 1, kind: input, shape index: {}]   ;;  %s1110_s2 = inlined_call_operand.vmem [shape: f32[12,1], index: 2, kind: input, shape index: {}]   ;;  %s1111_s3 = inlined_call_operand.vmem [shape: bf16[2,12,96], index: 3, kind: output, shape index: {}]  }
   0x1 LB: > { %s810_s13 = sadd.s32 4294967295, %s976_s12   ;;  %p814_p0 = scmp.ge.s32.totalorder %s976_s12, 1  ;;  %s976_s12 = sphi %s1009_s12, %s13_s12  }
   0x2   : > { %p137_p1 = scmp.lt.s32.totalorder %s976_s12, 3 }
   0x4   : > { %p138_p2 = pnand %p814_p0, %p137_p1 }
   0x5   : > { %p161_p3 = scmp.lt.s32.totalorder (!%p138_p2), %s810_s13, 1  ;;  %s980_s18 = smov (!%p138_p2), 126  }
   0x6   : > { %141 = sbr.rel (%p138_p2) target bundleno = 372 (0x174), region = 32  ;;  %s981_s19 = smov (!%p138_p2), 104  }
   0x7   : > { %s982_s22 = smov (!%p138_p2), 124   ;;  %s983_s23 = smov (!%p138_p2), 102  }
   0x8   : > { %s984_s24 = smov (!%p138_p2), 100   ;;  %s985_s25 = smov (!%p138_p2), 80  }
   0x9   : > { %s986_s26 = smov (!%p138_p2), 78   ;;  %s987_s27 = smov (!%p138_p2), 76  }
   0xb   : > { %v978_v0 = vmov 0.0   ;;  %s1113_s13 = smov (!%p161_p3, %s810_s13), 1  ;;  %vm979_vm0 = vmmov 0   ;;  %vm195_vm1 = vcmask 1045504   ;;  %vm191_vm2 = vcmask 97280   ;;  %v727_v6 = vld [vmem:[%s1110_s2] sm:$0xff] }
   0xc   : > { %882 = vmatprep.subr.bf16.mxu0 %v978_v0  ;;  %888 = vmatprep.subr.bf16.mxu1 %v978_v0  ;;  %s860_s14 = sshll.u32 %s1113_s13, 4  ;;  %v962_v3 = vld [vmem:[%s1109_s1] sm:$0x3f]   ;;  %v728_v7 = vld [vmem:[%s1110_s2 + $0x8] sm:$0xf]  ;;  %v988_v8 = vmov 0  }
   0xd   : > { %884 = vmatprep.mubr.msk.bf16.mxu0 %vm979_vm0, %v978_v0  ;;  %890 = vmatprep.mubr.msk.bf16.mxu1 %vm979_vm0, %v978_v0  ;;  %s165_s17 = scalar_lea.vmem %s1108_s0, %s860_s14  ;;  %v961_v12 = vld [vmem:[%s1109_s1 + $0x8] sm:$0x3f]   ;;  %v964_v14 = vld [vmem:[%s1109_s1 + $0x18] sm:$0x3f]   ;;  %v963_v20 = vld [vmem:[%s1109_s1 + $0x10] sm:$0x3f]  }
   0xe   : > { %v957_v1 = vld [vmem:[%s165_s17] ss:$8 sps:$4 sm:$0x3f]   ;;  %v960_v5 = vld [vmem:[%s165_s17 + $0x4] ss:$8 sps:$4 sm:$0x3f]   ;;  %955 = vset.pattern.permute.xlu1 %v988_v8  ;;  %956 = vset.pattern.permute.xlu0 %v988_v8 }
   0xf   : > { %189 = vrot.lane.b32.xlu0 %v957_v1, %s980_s18  ;;  %359 = vrot.lane.b32.xlu1 %v957_v1, %s981_s19  ;;  %v249_v2 = vsel %vm195_vm1, %v957_v1, 0  ;;  %v958_v4 = vld [vmem:[%s165_s17] ss:$8 sps:$4 sm:$0x3f]   ;;  %vm550_vm3 = vcmask 654336   ;;  %vm613_vm4 = vcmask 637952  }
  0x10   : > { %889 = vmatpush3.bf16.msra.mxu1 %v249_v2  ;;  %v966_v22 = vld [vmem:[%s1109_s1 + $0x28] sm:$0x3f]   ;;  %v965_v28 = vld [vmem:[%s1109_s1 + $0x20] sm:$0x3f]   ;;  %v968_v32 = vld [vmem:[%s1109_s1 + $0x38] sm:$0x3f]  }
  0x11   : > { %900 = vmatprep.subr.bf16.mxu1 %v978_v0  ;;  %vm676_vm5 = vcmask 621568   ;;  %v967_v36 = vld [vmem:[%s1109_s1 + $0x30] sm:$0x3f]   ;;  %v969_v38 = vld [vmem:[%s1109_s1 + $0x40] sm:$0x3f]   ;;  %vm751_vm6 = vcmask 781312  }
  0x12   : > { %vm753_vm7 = vcmask 779264  }
  0x13   : > { %300 = vrot.lane.b32.xlu0 %v957_v1, %s982_s22  ;;  %418 = vrot.lane.b32.xlu1 %v957_v1, %s983_s23  ;;  %s861_s23 = sshll.u32 %s1113_s13, 3 }
  0x14   : > { %891 = vmatmul.mubr.msk.bf16.vlgmr.msra.gmra.mxu1 %vm191_vm2, %v962_v3 }
  0x15   : > { %902 = vmatprep.mubr.msk.bf16.mxu1 %vm979_vm0, %v978_v0 }
  0x17   : > { %477 = vrot.lane.b32.xlu0 %v957_v1, %s984_s24  ;;  %546 = vrot.lane.b32.xlu1 %v958_v4, %s985_s25 }
  0x1b   : > { %548 = vrot.lane.b32.xlu0 %v960_v5, %s985_s25  ;;  %609 = vrot.lane.b32.xlu1 %v958_v4, %s986_s26 }
  0x1f   : > { %611 = vrot.lane.b32.xlu0 %v960_v5, %s986_s26  ;;  %672 = vrot.lane.b32.xlu1 %v958_v4, %s987_s27  ;;  %s170_s26 = scalar_lea.vmem %s1111_s3, %s861_s23 }
  0x23   : > { %674 = vrot.lane.b32.xlu0 %v960_v5, %s987_s27  ;;  %731 = vperm.xlu1 %955, %v727_v6  }
  0x27   : > { %736 = vperm.xlu0 %956, %v728_v7  }
  0x81   : > { %v190_v9 = vpop.permute.xlu0 %189  ;;  %v360_v10 = vpop.permute.xlu1 %359 }
  0x82   : > { %v197_v11 = vsel %vm195_vm1, %v190_v9, 0  ;;  %v365_v13 = vsel %vm195_vm1, %v360_v10, 0 }
  0x83   : > { %883 = vmatpush3.bf16.msra.mxu0 %v197_v11  ;;  %901 = vmatpush3.bf16.msra.mxu1 %v365_v13 }
  0x84   : > { %894 = vmatprep.subr.bf16.mxu0 %v978_v0  ;;  %912 = vmatprep.subr.bf16.mxu1 %v978_v0 }
  0x85   : > { %v301_v15 = vpop.permute.xlu0 %300  ;;  %v419_v16 = vpop.permute.xlu1 %418 }
  0x86   : > { %v306_v17 = vsel %vm195_vm1, %v301_v15, 0  ;;  %885 = vmatmul.mubr.msk.bf16.vlgmr.msra.gmra.mxu0 %vm191_vm2, %v961_v12  ;;  %903 = vmatmul.mubr.msk.bf16.vlgmr.msra.gmra.mxu1 %vm191_vm2, %v964_v14  ;;  %v424_v23 = vsel %vm195_vm1, %v419_v16, 0 }
  0x87   : > { %895 = vmatpush3.bf16.msra.mxu0 %v306_v17  ;;  %896 = vmatprep.mubr.msk.bf16.mxu0 %vm979_vm0, %v978_v0 }
  0x88   : > { %906 = vmatprep.subr.bf16.mxu0 %v978_v0  ;;  %914 = vmatprep.mubr.msk.bf16.mxu1 %vm979_vm0, %v978_v0 }
  0x89   : > { %v478_v18 = vpop.permute.xlu0 %477  ;;  %v547_v19 = vpop.permute.xlu1 %546 }
  0x8a   : > { %v483_v21 = vsel %vm195_vm1, %v478_v18, 0 }
  0x8b   : > { %913 = vmatpush3.bf16.msra.mxu1 %v483_v21 }
  0x8c   : > { %924 = vmatprep.subr.bf16.mxu1 %v978_v0 }
  0x8d   : > { %v549_v24 = vpop.permute.xlu0 %548  ;;  %v610_v25 = vpop.permute.xlu1 %609 }
  0x8e   : > { %897 = vmatmul.mubr.msk.bf16.vlgmr.msra.gmra.mxu0 %vm191_vm2, %v963_v20  ;;  %915 = vmatmul.mubr.msk.bf16.vlgmr.msra.gmra.mxu1 %vm191_vm2, %v966_v22  ;;  %v551_v26 = vsel %vm550_vm3, %v547_v19, %v549_v24 }
  0x8f   : > { %907 = vmatpush3.bf16.msra.mxu0 %v424_v23  ;;  %908 = vmatprep.mubr.msk.bf16.mxu0 %vm979_vm0, %v978_v0  ;;  %v556_v31 = vsel %vm195_vm1, %v551_v26, 0 }
  0x90   : > { %918 = vmatprep.subr.bf16.mxu0 %v978_v0  ;;  %926 = vmatprep.mubr.msk.bf16.mxu1 %vm979_vm0, %v978_v0 }
  0x91   : > { %v612_v27 = vpop.permute.xlu0 %611  ;;  %v673_v33 = vpop.permute.xlu1 %672 }
  0x92   : > { %v614_v29 = vsel %vm613_vm4, %v610_v25, %v612_v27 }
  0x93   : > { %v619_v30 = vsel %vm195_vm1, %v614_v29, 0 }
  0x94   : > { %925 = vmatpush3.bf16.msra.mxu1 %v619_v30 }
  0x95   : > { %v675_v34 = vpop.permute.xlu0 %674 }
  0x96   : > { %909 = vmatmul.mubr.msk.bf16.vlgmr.msra.gmra.mxu0 %vm191_vm2, %v965_v28  ;;  %v677_v35 = vsel %vm676_vm5, %v673_v33, %v675_v34 }
  0x97   : > { %919 = vmatpush3.bf16.msra.mxu0 %v556_v31  ;;  %920 = vmatprep.mubr.msk.bf16.mxu0 %vm979_vm0, %v978_v0  ;;  %v682_v37 = vsel %vm195_vm1, %v677_v35, 0 }
  0x98   : > { %930 = vmatprep.subr.bf16.mxu0 %v978_v0  ;;  %927 = vmatmul.mubr.msk.bf16.vlgmr.msra.gmra.mxu1 %vm191_vm2, %v968_v32 }
  0x9e   : > { %921 = vmatmul.mubr.msk.bf16.vlgmr.msra.gmra.mxu0 %vm191_vm2, %v967_v36  ;;  %v732_v21 = vpop.permute.xlu1 %731 }
  0x9f   : > { %931 = vmatpush3.bf16.msra.mxu0 %v682_v37  ;;  %932 = vmatprep.mubr.msk.bf16.mxu0 %vm979_vm0, %v978_v0 }
  0xa2   : > { %v737_v27 = vpop.permute.xlu0 %736 }
  0xa6   : > { %933 = vmatmul.mubr.msk.bf16.vlgmr.msra.gmra.mxu0 %vm191_vm2, %v969_v38 }
  0xd4   : > { %v285_v39 = vpop.f32.mrf.mxu1 }
  0xd6   : > { %v892_v40 = vpop.f32.mrf.mxu1 }
  0xd8   : > { %v288_v41 = vpop.f32.mrf.mxu1 }
  0xda   : > { %v893_v42 = vpop.f32.mrf.mxu1 }
 0x146   : > { %v233_v43 = vpop.f32.mrf.mxu0  ;;  %v401_v44 = vpop.f32.mrf.mxu1 }
 0x147   : > { %v286_v57 = vadd.f32 %v285_v39, %v233_v43 }
 0x148   : > { %v886_v45 = vpop.f32.mrf.mxu0  ;;  %v904_v46 = vpop.f32.mrf.mxu1 }
 0x14a   : > { %v236_v47 = vpop.f32.mrf.mxu0  ;;  %v404_v48 = vpop.f32.mrf.mxu1 }
 0x14b   : > { %v289_v62 = vadd.f32 %v288_v41, %v236_v47 }
 0x14c   : > { %v887_v49 = vpop.f32.mrf.mxu0  ;;  %v905_v50 = vpop.f32.mrf.mxu1 }
 0x14e   : > { %v342_v51 = vpop.f32.mrf.mxu0  ;;  %v519_v52 = vpop.f32.mrf.mxu1 }
 0x14f   : > { %v349_v60 = vadd.f32 %v342_v51, %v286_v57 }
 0x150   : > { %v898_v53 = vpop.f32.mrf.mxu0  ;;  %v916_v54 = vpop.f32.mrf.mxu1 }
 0x151   : > { %v408_v1 = vadd.f32 %v401_v44, %v349_v60 }
 0x152   : > { %v345_v55 = vpop.f32.mrf.mxu0  ;;  %v522_v56 = vpop.f32.mrf.mxu1 }
 0x153   : > { %v350_v2 = vadd.f32 %v345_v55, %v289_v62 }
 0x154   : > { %v899_v58 = vpop.f32.mrf.mxu0  ;;  %v917_v59 = vpop.f32.mrf.mxu1 }
 0x155   : > { %v409_v8 = vadd.f32 %v404_v48, %v350_v2 }
 0x156   : > { %v460_v61 = vpop.f32.mrf.mxu0 }
 0x157   : > { %v467_v5 = vadd.f32 %v460_v61, %v408_v1 }
 0x158   : > { %v910_v63 = vpop.f32.mrf.mxu0  ;;  %v655_v0 = vpop.f32.mrf.mxu1 }
 0x159   : > { %v526_v11 = vadd.f32 %v519_v52, %v467_v5 }
 0x15a   : > { %v463_v3 = vpop.f32.mrf.mxu0  ;;  %v928_v4 = vpop.f32.mrf.mxu1 }
 0x15b   : > { %v468_v12 = vadd.f32 %v463_v3, %v409_v8 }
 0x15c   : > { %v911_v6 = vpop.f32.mrf.mxu0  ;;  %v658_v7 = vpop.f32.mrf.mxu1 }
 0x15d   : > { %v527_v16 = vadd.f32 %v522_v56, %v468_v12 }
 0x15e   : > { %v592_v9 = vpop.f32.mrf.mxu0  ;;  %v929_v10 = vpop.f32.mrf.mxu1 }
 0x15f   : > { %v599_v14 = vadd.f32 %v592_v9, %v526_v11 }
 0x160   : > { %v922_v13 = vpop.f32.mrf.mxu0 }
 0x161   : > { %v662_v18 = vadd.f32 %v655_v0, %v599_v14 }
 0x162   : > { %v595_v15 = vpop.f32.mrf.mxu0 }
 0x163   : > { %v600_v19 = vadd.f32 %v595_v15, %v527_v16 }
 0x164   : > { %v923_v17 = vpop.f32.mrf.mxu0 }
 0x165   : > { %v663_v24 = vadd.f32 %v658_v7, %v600_v19 }
 0x166   : > { %v718_v20 = vpop.f32.mrf.mxu0 }
 0x167   : > { %v725_v22 = vadd.f32 %v718_v20, %v662_v18 }
 0x168   : > { %v934_v23 = vpop.f32.mrf.mxu0 }
 0x169   : > { %v739_v25 = vadd.f32 %v732_v21, %v725_v22 }
 0x16a   : > { %v721_v26 = vpop.f32.mrf.mxu0 }
 0x16b   : > { %v741_v28 = vmax.f32 %v739_v25, 0.0  ;;  %v726_v29 = vadd.f32 %v721_v26, %v663_v24 }
 0x16c   : > { %v935_v30 = vpop.f32.mrf.mxu0 }
 0x16d   : > { %v862_v31 = vpack.c.bf16 %v741_v28, %v741_v28  ;;  %v740_v32 = vadd.f32 %v737_v27, %v726_v29 }
 0x16f   : > { %752 = vst.msk [vmem:[%s170_s26] sm:$0xf] %vm751_vm6, %v862_v31  ;;  %v742_v33 = vmax.f32 %v740_v32, 0.0 }
 0x171   : > { %v863_v34 = vpack.c.bf16 %v742_v33, %v742_v33 }
 0x173   : > { %754 = vst.msk [vmem:[%s170_s26 + $0x4] sm:$0x3] %vm753_vm7, %v863_v34 }
 0x174 PF: > { %s13_s12 = sadd.s32 1, %s976_s12  }
 0x175   : > { %p10_p4 = scmp.ge.s32.totalorder %s13_s12, 4  }
 0x177   :  { %12 = sbr.rel (!%p10_p4) target bundleno = 1 (0x1), region = 70 }

// kernel: rsu3_forward.10
= control target key start
LH: loop header
LB: loop body
LE: loop exit
PB: predicated region body
PF: predicated region fallthrough
CT: control target
= control target key end

     0   :  { %s1733_s18 = smov 0   ;;  %s1908_s0 = inlined_call_operand.vmem [shape: bf16[2,12,110], index: 0, kind: input, shape index: {}]   ;;  %s1909_s1 = inlined_call_operand.vmem [shape: bf16[2,12,110], index: 1, kind: input, shape index: {}]   ;;  %s1910_s2 = inlined_call_operand.vmem [shape: bf16[9,12,12], index: 2, kind: input, shape index: {}]   ;;  %s1911_s3 = inlined_call_operand.vmem [shape: bf16[9,12,12], index: 3, kind: input, shape index: {}]   ;;  %s1912_s4 = inlined_call_operand.vmem [shape: f32[12,1], index: 4, kind: input, shape index: {}]   ;;  %s1913_s5 = inlined_call_operand.vmem [shape: bf16[2,12,80], index: 5, kind: output, shape index: {}]  }
   0x1 LB: > { %s1409_s19 = sadd.s32 4294967295, %s1690_s18   ;;  %p1413_p0 = scmp.ge.s32.totalorder %s1690_s18, 1  ;;  %s1690_s18 = sphi %s1733_s18, %s15_s18  }
   0x2   : > { %p197_p1 = scmp.lt.s32.totalorder %s1690_s18, 3 }
   0x4   : > { %p198_p2 = pnand %p1413_p0, %p197_p1 }
   0x5   : > { %p230_p3 = scmp.lt.s32.totalorder (!%p198_p2), %s1409_s19, 1  ;;  %s1694_s27 = smov (!%p198_p2), 127  }
   0x6   : > { %201 = sbr.rel (%p198_p2) target bundleno = 406 (0x196), region = 40  ;;  %s1695_s28 = smov (!%p198_p2), 118  }
   0x7   : > { %s1696_s6 = smov (!%p198_p2), 126   ;;  %s1697_s7 = smov (!%p198_p2), 117  }
   0x8   : > { %s1698_s8 = smov (!%p198_p2), 116   ;;  %s1699_s9 = smov (!%p198_p2), 108  }
   0x9   : > { %s1700_s10 = smov (!%p198_p2), 107   ;;  %s1701_s11 = smov (!%p198_p2), 106  }
   0xb   : > { %v1692_v0 = vmov 0.0   ;;  %s1915_s19 = smov (!%p230_p3, %s1409_s19), 1  ;;  %vm1693_vm0 = vmmov 0   ;;  %vm269_vm1 = vcmask 1045504   ;;  %v1666_v3 = vld [vmem:[%s1910_s2] sm:$0x3f]  }
   0xc   : > { %1541 = vmatprep.subr.bf16.mxu1 %v1692_v0  ;;  %1535 = vmatprep.subr.bf16.mxu0 %v1692_v0  ;;  %s1747_s20 = sshll.u32 %s1915_s19, 3  ;;  %vm265_vm2 = vcmask 97280   ;;  %v1314_v5 = vld [vmem:[%s1912_s4] sm:$0xff]  ;;  %v1315_v6 = vld [vmem:[%s1912_s4 + $0x8] sm:$0xf]  ;;  %v1702_v7 = vmov 0  }
   0xd   : > { %1543 = vmatprep.mubr.msk.bf16.mxu1 %vm1693_vm0, %v1692_v0  ;;  %1537 = vmatprep.mubr.msk.bf16.mxu0 %vm1693_vm0, %v1692_v0  ;;  %s234_s23 = scalar_lea.vmem %s1908_s0, %s1747_s20  ;;  %s239_s26 = scalar_lea.vmem %s1909_s1, %s1747_s20  ;;  %v1667_v12 = vld [vmem:[%s1910_s2 + $0x8] sm:$0x3f]   ;;  %v1668_v13 = vld [vmem:[%s1910_s2 + $0x18] sm:$0x3f]   ;;  %v1669_v18 = vld [vmem:[%s1910_s2 + $0x10] sm:$0x3f]  }
   0xe   : > { %v1664_v1 = vld [vmem:[%s234_s23] sm:$0x3f]   ;;  %1662 = vset.pattern.permute.xlu0 %v1702_v7  ;;  %1663 = vset.pattern.permute.xlu1 %v1702_v7  ;;  %v1670_v20 = vld [vmem:[%s1910_s2 + $0x28] sm:$0x3f]   ;;  %v1672_v26 = vld [vmem:[%s1910_s2 + $0x38] sm:$0x3f]  }
   0xf   : > { %263 = vrot.lane.b32.xlu0 %v1664_v1, %s1694_s27  ;;  %433 = vrot.lane.b32.xlu1 %v1664_v1, %s1695_s28  ;;  %v323_v2 = vsel %vm269_vm1, %v1664_v1, 0  ;;  %v1665_v4 = vld [vmem:[%s239_s26] sm:$0x3f]   ;;  %v1673_v30 = vld [vmem:[%s1910_s2 + $0x30] sm:$0x3f]   ;;  %vm1338_vm3 = vcmask 650240  }
  0x10   : > { %1542 = vmatpush3.bf16.msra.mxu1 %v323_v2  ;;  %v1671_v25 = vld [vmem:[%s1910_s2 + $0x20] sm:$0x3f]   ;;  %v797_v29 = vsel %vm269_vm1, %v1665_v4, 0  ;;  %v1676_v37 = vld [vmem:[%s1911_s3 + $0x10] sm:$0x3f]   ;;  %vm1340_vm4 = vcmask 648192  }
  0x11   : > { %1553 = vmatprep.subr.bf16.mxu1 %v1692_v0  ;;  %v1674_v31 = vld [vmem:[%s1911_s3] sm:$0x3f]   ;;  %v1677_v42 = vld [vmem:[%s1911_s3 + $0x8] sm:$0x3f]   ;;  %v1679_v48 = vld [vmem:[%s1911_s3 + $0x18] sm:$0x3f]  }
  0x12   : > { %v1675_v36 = vld [vmem:[%s1910_s2 + $0x40] sm:$0x3f]   ;;  %v1680_v49 = vld [vmem:[%s1911_s3 + $0x30] sm:$0x3f]   ;;  %v1681_v54 = vld [vmem:[%s1911_s3 + $0x28] sm:$0x3f]  }
  0x13   : > { %374 = vrot.lane.b32.xlu0 %v1664_v1, %s1696_s6  ;;  %492 = vrot.lane.b32.xlu1 %v1664_v1, %s1697_s7  ;;  %v1678_v43 = vld [vmem:[%s1911_s3 + $0x20] sm:$0x3f]   ;;  %v1683_v57 = vld [vmem:[%s1911_s3 + $0x38] sm:$0x3f]  }
  0x14   : > { %1544 = vmatmul.mubr.msk.bf16.vlgmr.msra.gmra.mxu1 %vm265_vm2, %v1666_v3  ;;  %v1682_v55 = vld [vmem:[%s1911_s3 + $0x40] sm:$0x3f]  }
  0x15   : > { %1555 = vmatprep.mubr.msk.bf16.mxu1 %vm1693_vm0, %v1692_v0 }
  0x17   : > { %551 = vrot.lane.b32.xlu0 %v1664_v1, %s1698_s8  ;;  %610 = vrot.lane.b32.xlu1 %v1664_v1, %s1699_s9 }
  0x1b   : > { %669 = vrot.lane.b32.xlu0 %v1664_v1, %s1700_s10  ;;  %728 = vrot.lane.b32.xlu1 %v1664_v1, %s1701_s11 }
  0x1f   : > { %850 = vrot.lane.b32.xlu0 %v1665_v4, %s1694_s27  ;;  %909 = vrot.lane.b32.xlu1 %v1665_v4, %s1696_s6  ;;  %s244_s6 = scalar_lea.vmem %s1913_s5, %s1747_s20 }
  0x23   : > { %968 = vrot.lane.b32.xlu0 %v1665_v4, %s1695_s28  ;;  %1027 = vrot.lane.b32.xlu1 %v1665_v4, %s1697_s7 }
  0x27   : > { %1086 = vrot.lane.b32.xlu0 %v1665_v4, %s1698_s8  ;;  %1145 = vrot.lane.b32.xlu1 %v1665_v4, %s1699_s9 }
  0x2b   : > { %1204 = vrot.lane.b32.xlu0 %v1665_v4, %s1700_s10  ;;  %1263 = vrot.lane.b32.xlu1 %v1665_v4, %s1701_s11 }
  0x2f   : > { %1318 = vperm.xlu0 %1662, %v1314_v5   ;;  %1323 = vperm.xlu1 %1663, %v1315_v6  }
  0x81   : > { %v264_v8 = vpop.permute.xlu0 %263  ;;  %v434_v9 = vpop.permute.xlu1 %433 }
  0x82   : > { %v271_v10 = vsel %vm269_vm1, %v264_v8, 0  ;;  %v439_v11 = vsel %vm269_vm1, %v434_v9, 0 }
  0x83   : > { %1536 = vmatpush3.bf16.msra.mxu0 %v271_v10  ;;  %1554 = vmatpush3.bf16.msra.mxu1 %v439_v11 }
  0x84   : > { %1547 = vmatprep.subr.bf16.mxu0 %v1692_v0  ;;  %1565 = vmatprep.subr.bf16.mxu1 %v1692_v0 }
  0x85   : > { %v375_v14 = vpop.permute.xlu0 %374  ;;  %v493_v16 = vpop.permute.xlu1 %492 }
  0x86   : > { %v380_v15 = vsel %vm269_vm1, %v375_v14, 0  ;;  %1538 = vmatmul.mubr.msk.bf16.vlgmr.msra.gmra.mxu0 %vm265_vm2, %v1667_v12  ;;  %1556 = vmatmul.mubr.msk.bf16.vlgmr.msra.gmra.mxu1 %vm265_vm2, %v1668_v13  ;;  %v498_v21 = vsel %vm269_vm1, %v493_v16, 0 }
  0x87   : > { %1548 = vmatpush3.bf16.msra.mxu0 %v380_v15  ;;  %1549 = vmatprep.mubr.msk.bf16.mxu0 %vm1693_vm0, %v1692_v0 }
  0x88   : > { %1559 = vmatprep.subr.bf16.mxu0 %v1692_v0  ;;  %1567 = vmatprep.mubr.msk.bf16.mxu1 %vm1693_vm0, %v1692_v0 }
  0x89   : > { %v552_v17 = vpop.permute.xlu0 %551  ;;  %v611_v24 = vpop.permute.xlu1 %610 }
  0x8a   : > { %v557_v19 = vsel %vm269_vm1, %v552_v17, 0  ;;  %v616_v27 = vsel %vm269_vm1, %v611_v24, 0 }
  0x8b   : > { %1566 = vmatpush3.bf16.msra.mxu1 %v557_v19 }
  0x8c   : > { %1577 = vmatprep.subr.bf16.mxu1 %v1692_v0 }
  0x8d   : > { %v670_v22 = vpop.permute.xlu0 %669  ;;  %v729_v28 = vpop.permute.xlu1 %728 }
  0x8e   : > { %1550 = vmatmul.mubr.msk.bf16.vlgmr.msra.gmra.mxu0 %vm265_vm2, %v1669_v18  ;;  %1568 = vmatmul.mubr.msk.bf16.vlgmr.msra.gmra.mxu1 %vm265_vm2, %v1670_v20  ;;  %v675_v23 = vsel %vm269_vm1, %v670_v22, 0  ;;  %v734_v33 = vsel %vm269_vm1, %v729_v28, 0 }
  0x8f   : > { %1560 = vmatpush3.bf16.msra.mxu0 %v498_v21  ;;  %1561 = vmatprep.mubr.msk.bf16.mxu0 %vm1693_vm0, %v1692_v0 }
  0x90   : > { %1571 = vmatprep.subr.bf16.mxu0 %v1692_v0  ;;  %1578 = vmatpush3.bf16.msra.mxu1 %v675_v23 }
  0x91   : > { %1579 = vmatprep.mubr.msk.bf16.mxu1 %vm1693_vm0, %v1692_v0  ;;  %1589 = vmatprep.subr.bf16.mxu1 %v1692_v0  ;;  %v910_v32 = vpop.permute.xlu1 %909  ;;  %v851_v35 = vpop.permute.xlu0 %850 }
  0x92   : > { %v915_v34 = vsel %vm269_vm1, %v910_v32, 0  ;;  %v856_v39 = vsel %vm269_vm1, %v851_v35, 0 }
  0x95   : > { %v1028_v38 = vpop.permute.xlu1 %1027  ;;  %v969_v41 = vpop.permute.xlu0 %968 }
  0x96   : > { %1562 = vmatmul.mubr.msk.bf16.vlgmr.msra.gmra.mxu0 %vm265_vm2, %v1671_v25  ;;  %1580 = vmatmul.mubr.msk.bf16.vlgmr.msra.gmra.mxu1 %vm265_vm2, %v1672_v26  ;;  %v1033_v40 = vsel %vm269_vm1, %v1028_v38, 0  ;;  %v974_v45 = vsel %vm269_vm1, %v969_v41, 0 }
  0x97   : > { %1572 = vmatpush3.bf16.msra.mxu0 %v616_v27  ;;  %1573 = vmatprep.mubr.msk.bf16.mxu0 %vm1693_vm0, %v1692_v0 }
  0x98   : > { %1583 = vmatprep.subr.bf16.mxu0 %v1692_v0  ;;  %1590 = vmatpush3.bf16.msra.mxu1 %v797_v29 }
  0x99   : > { %1591 = vmatprep.mubr.msk.bf16.mxu1 %vm1693_vm0, %v1692_v0  ;;  %1601 = vmatprep.subr.bf16.mxu1 %v1692_v0  ;;  %v1146_v44 = vpop.permute.xlu1 %1145  ;;  %v1087_v47 = vpop.permute.xlu0 %1086 }
  0x9a   : > { %v1151_v46 = vsel %vm269_vm1, %v1146_v44, 0  ;;  %v1092_v51 = vsel %vm269_vm1, %v1087_v47, 0 }
  0x9d   : > { %v1264_v50 = vpop.permute.xlu1 %1263  ;;  %v1205_v53 = vpop.permute.xlu0 %1204 }
  0x9e   : > { %1574 = vmatmul.mubr.msk.bf16.vlgmr.msra.gmra.mxu0 %vm265_vm2, %v1673_v30  ;;  %1592 = vmatmul.mubr.msk.bf16.vlgmr.msra.gmra.mxu1 %vm265_vm2, %v1674_v31  ;;  %v1269_v52 = vsel %vm269_vm1, %v1264_v50, 0  ;;  %v1210_v56 = vsel %vm269_vm1, %v1205_v53, 0 }
  0x9f   : > { %1584 = vmatpush3.bf16.msra.mxu0 %v734_v33  ;;  %1585 = vmatprep.mubr.msk.bf16.mxu0 %vm1693_vm0, %v1692_v0 }
  0xa0   : > { %1595 = vmatprep.subr.bf16.mxu0 %v1692_v0  ;;  %1602 = vmatpush3.bf16.msra.mxu1 %v915_v34 }
  0xa1   : > { %1603 = vmatprep.mubr.msk.bf16.mxu1 %vm1693_vm0, %v1692_v0  ;;  %1613 = vmatprep.subr.bf16.mxu1 %v1692_v0 }
  0xa6   : > { %1586 = vmatmul.mubr.msk.bf16.vlgmr.msra.gmra.mxu0 %vm265_vm2, %v1675_v36  ;;  %1604 = vmatmul.mubr.msk.bf16.vlgmr.msra.gmra.mxu1 %vm265_vm2, %v1676_v37 }
  0xa7   : > { %1596 = vmatpush3.bf16.msra.mxu0 %v856_v39  ;;  %1597 = vmatprep.mubr.msk.bf16.mxu0 %vm1693_vm0, %v1692_v0 }
  0xa8   : > { %1607 = vmatprep.subr.bf16.mxu0 %v1692_v0  ;;  %1614 = vmatpush3.bf16.msra.mxu1 %v1033_v40 }
  0xa9   : > { %1615 = vmatprep.mubr.msk.bf16.mxu1 %vm1693_vm0, %v1692_v0  ;;  %1625 = vmatprep.subr.bf16.mxu1 %v1692_v0 }
  0xae   : > { %1598 = vmatmul.mubr.msk.bf16.vlgmr.msra.gmra.mxu0 %vm265_vm2, %v1677_v42  ;;  %1616 = vmatmul.mubr.msk.bf16.vlgmr.msra.gmra.mxu1 %vm265_vm2, %v1678_v43 }
  0xaf   : > { %1608 = vmatpush3.bf16.msra.mxu0 %v974_v45  ;;  %1609 = vmatprep.mubr.msk.bf16.mxu0 %vm1693_vm0, %v1692_v0 }
  0xb0   : > { %1619 = vmatprep.subr.bf16.mxu0 %v1692_v0  ;;  %1626 = vmatpush3.bf16.msra.mxu1 %v1151_v46 }
  0xb1   : > { %1627 = vmatprep.mubr.msk.bf16.mxu1 %vm1693_vm0, %v1692_v0  ;;  %1637 = vmatprep.subr.bf16.mxu1 %v1692_v0 }
  0xb6   : > { %1610 = vmatmul.mubr.msk.bf16.vlgmr.msra.gmra.mxu0 %vm265_vm2, %v1679_v48  ;;  %1628 = vmatmul.mubr.msk.bf16.vlgmr.msra.gmra.mxu1 %vm265_vm2, %v1680_v49 }
  0xb7   : > { %1620 = vmatpush3.bf16.msra.mxu0 %v1092_v51  ;;  %1621 = vmatprep.mubr.msk.bf16.mxu0 %vm1693_vm0, %v1692_v0 }
  0xb8   : > { %1631 = vmatprep.subr.bf16.mxu0 %v1692_v0  ;;  %1638 = vmatpush3.bf16.msra.mxu1 %v1269_v52 }
  0xb9   : > { %1639 = vmatprep.mubr.msk.bf16.mxu1 %vm1693_vm0, %v1692_v0 }
  0xbe   : > { %1622 = vmatmul.mubr.msk.bf16.vlgmr.msra.gmra.mxu0 %vm265_vm2, %v1681_v54  ;;  %1640 = vmatmul.mubr.msk.bf16.vlgmr.msra.gmra.mxu1 %vm265_vm2, %v1682_v55 }
  0xbf   : > { %1632 = vmatpush3.bf16.msra.mxu0 %v1210_v56  ;;  %1633 = vmatprep.mubr.msk.bf16.mxu0 %vm1693_vm0, %v1692_v0 }
  0xc6   : > { %1634 = vmatmul.mubr.msk.bf16.vlgmr.msra.gmra.mxu0 %vm265_vm2, %v1683_v57 }
  0xd4   : > { %v359_v58 = vpop.f32.mrf.mxu1 }
  0xd6   : > { %v1545_v59 = vpop.f32.mrf.mxu1 }
  0xd8   : > { %v362_v60 = vpop.f32.mrf.mxu1 }
  0xda   : > { %v1546_v61 = vpop.f32.mrf.mxu1 }
 0x146   : > { %v307_v62 = vpop.f32.mrf.mxu0  ;;  %v475_v63 = vpop.f32.mrf.mxu1 }
 0x147   : > { %v360_v20 = vadd.f32 %v359_v58, %v307_v62 }
 0x148   : > { %v1539_v1 = vpop.f32.mrf.mxu0  ;;  %v1557_v2 = vpop.f32.mrf.mxu1 }
 0x14a   : > { %v310_v3 = vpop.f32.mrf.mxu0  ;;  %v478_v4 = vpop.f32.mrf.mxu1 }
 0x14b   : > { %v363_v26 = vadd.f32 %v362_v60, %v310_v3 }
 0x14c   : > { %v1540_v5 = vpop.f32.mrf.mxu0  ;;  %v1558_v6 = vpop.f32.mrf.mxu1 }
 0x14e   : > { %v416_v7 = vpop.f32.mrf.mxu0  ;;  %v593_v0 = vpop.f32.mrf.mxu1 }
 0x14f   : > { %v423_v23 = vadd.f32 %v416_v7, %v360_v20 }
 0x150   : > { %v1551_v8 = vpop.f32.mrf.mxu0  ;;  %v1569_v9 = vpop.f32.mrf.mxu1 }
 0x151   : > { %v482_v30 = vadd.f32 %v475_v63, %v423_v23 }
 0x152   : > { %v419_v10 = vpop.f32.mrf.mxu0  ;;  %v596_v11 = vpop.f32.mrf.mxu1 }
 0x153   : > { %v424_v29 = vadd.f32 %v419_v10, %v363_v26 }
 0x154   : > { %v1552_v12 = vpop.f32.mrf.mxu0  ;;  %v1570_v13 = vpop.f32.mrf.mxu1 }
 0x155   : > { %v483_v36 = vadd.f32 %v478_v4, %v424_v29 }
 0x156   : > { %v534_v14 = vpop.f32.mrf.mxu0  ;;  %v711_v15 = vpop.f32.mrf.mxu1 }
 0x157   : > { %v541_v33 = vadd.f32 %v534_v14, %v482_v30  ;;  %v1319_v30 = vpop.permute.xlu0 %1318 }
 0x158   : > { %v1563_v16 = vpop.f32.mrf.mxu0  ;;  %v1581_v17 = vpop.f32.mrf.mxu1 }
 0x159   : > { %v600_v40 = vadd.f32 %v593_v0, %v541_v33 }
 0x15a   : > { %v537_v18 = vpop.f32.mrf.mxu0  ;;  %v714_v19 = vpop.f32.mrf.mxu1 }
 0x15b   : > { %v542_v39 = vadd.f32 %v537_v18, %v483_v36 }
 0x15c   : > { %v1564_v21 = vpop.f32.mrf.mxu0  ;;  %v1582_v22 = vpop.f32.mrf.mxu1 }
 0x15d   : > { %v601_v46 = vadd.f32 %v596_v11, %v542_v39 }
 0x15e   : > { %v652_v24 = vpop.f32.mrf.mxu0  ;;  %v833_v25 = vpop.f32.mrf.mxu1 }
 0x15f   : > { %v659_v43 = vadd.f32 %v652_v24, %v600_v40 }
 0x160   : > { %v1575_v27 = vpop.f32.mrf.mxu0  ;;  %v1593_v28 = vpop.f32.mrf.mxu1 }
 0x161   : > { %v718_v50 = vadd.f32 %v711_v15, %v659_v43 }
 0x162   : > { %v655_v31 = vpop.f32.mrf.mxu0  ;;  %v836_v32 = vpop.f32.mrf.mxu1 }
 0x163   : > { %v660_v49 = vadd.f32 %v655_v31, %v601_v46 }
 0x164   : > { %v1576_v34 = vpop.f32.mrf.mxu0  ;;  %v1594_v35 = vpop.f32.mrf.mxu1 }
 0x165   : > { %v719_v56 = vadd.f32 %v714_v19, %v660_v49 }
 0x166   : > { %v770_v37 = vpop.f32.mrf.mxu0  ;;  %v951_v38 = vpop.f32.mrf.mxu1 }
 0x167   : > { %v777_v53 = vadd.f32 %v770_v37, %v718_v50  ;;  %v1324_v37 = vpop.permute.xlu1 %1323 }
 0x168   : > { %v1587_v41 = vpop.f32.mrf.mxu0  ;;  %v1605_v42 = vpop.f32.mrf.mxu1 }
 0x169   : > { %v840_v60 = vadd.f32 %v833_v25, %v777_v53 }
 0x16a   : > { %v773_v44 = vpop.f32.mrf.mxu0  ;;  %v954_v45 = vpop.f32.mrf.mxu1 }
 0x16b   : > { %v778_v59 = vadd.f32 %v773_v44, %v719_v56 }
 0x16c   : > { %v1588_v47 = vpop.f32.mrf.mxu0  ;;  %v1606_v48 = vpop.f32.mrf.mxu1 }
 0x16d   : > { %v841_v3 = vadd.f32 %v836_v32, %v778_v59 }
 0x16e   : > { %v892_v51 = vpop.f32.mrf.mxu0  ;;  %v1069_v52 = vpop.f32.mrf.mxu1 }
 0x16f   : > { %v899_v63 = vadd.f32 %v892_v51, %v840_v60 }
 0x170   : > { %v1599_v54 = vpop.f32.mrf.mxu0  ;;  %v1617_v55 = vpop.f32.mrf.mxu1 }
 0x171   : > { %v958_v7 = vadd.f32 %v951_v38, %v899_v63 }
 0x172   : > { %v895_v57 = vpop.f32.mrf.mxu0  ;;  %v1072_v58 = vpop.f32.mrf.mxu1 }
 0x173   : > { %v900_v6 = vadd.f32 %v895_v57, %v841_v3 }
 0x174   : > { %v1600_v61 = vpop.f32.mrf.mxu0  ;;  %v1618_v62 = vpop.f32.mrf.mxu1 }
 0x175   : > { %v959_v12 = vadd.f32 %v954_v45, %v900_v6 }
 0x176   : > { %v1010_v1 = vpop.f32.mrf.mxu0  ;;  %v1187_v2 = vpop.f32.mrf.mxu1 }
 0x177   : > { %v1017_v9 = vadd.f32 %v1010_v1, %v958_v7 }
 0x178   : > { %v1611_v4 = vpop.f32.mrf.mxu0  ;;  %v1629_v5 = vpop.f32.mrf.mxu1 }
 0x179   : > { %v1076_v16 = vadd.f32 %v1069_v52, %v1017_v9 }
 0x17a   : > { %v1013_v0 = vpop.f32.mrf.mxu0  ;;  %v1190_v8 = vpop.f32.mrf.mxu1 }
 0x17b   : > { %v1018_v15 = vadd.f32 %v1013_v0, %v959_v12 }
 0x17c   : > { %v1612_v10 = vpop.f32.mrf.mxu0  ;;  %v1630_v11 = vpop.f32.mrf.mxu1 }
 0x17d   : > { %v1077_v22 = vadd.f32 %v1072_v58, %v1018_v15 }
 0x17e   : > { %v1128_v13 = vpop.f32.mrf.mxu0  ;;  %v1305_v14 = vpop.f32.mrf.mxu1 }
 0x17f   : > { %v1135_v19 = vadd.f32 %v1128_v13, %v1076_v16 }
 0x180   : > { %v1623_v17 = vpop.f32.mrf.mxu0  ;;  %v1641_v18 = vpop.f32.mrf.mxu1 }
 0x181   : > { %v1194_v26 = vadd.f32 %v1187_v2, %v1135_v19 }
 0x182   : > { %v1131_v20 = vpop.f32.mrf.mxu0  ;;  %v1308_v21 = vpop.f32.mrf.mxu1 }
 0x183   : > { %v1136_v25 = vadd.f32 %v1131_v20, %v1077_v22 }
 0x184   : > { %v1624_v23 = vpop.f32.mrf.mxu0  ;;  %v1642_v24 = vpop.f32.mrf.mxu1 }
 0x185   : > { %v1195_v31 = vadd.f32 %v1190_v8, %v1136_v25 }
 0x186   : > { %v1246_v27 = vpop.f32.mrf.mxu0 }
 0x187   : > { %v1253_v28 = vadd.f32 %v1246_v27, %v1194_v26 }
 0x188   : > { %v1635_v29 = vpop.f32.mrf.mxu0 }
 0x189   : > { %v1312_v32 = vadd.f32 %v1305_v14, %v1253_v28 }
 0x18a   : > { %v1249_v33 = vpop.f32.mrf.mxu0 }
 0x18b   : > { %v1254_v34 = vadd.f32 %v1249_v33, %v1195_v31  ;;  %v1326_v35 = vadd.f32 %v1319_v30, %v1312_v32 }
 0x18c   : > { %v1636_v36 = vpop.f32.mrf.mxu0 }
 0x18d   : > { %v1328_v38 = vmax.f32 %v1326_v35, 0.0  ;;  %v1313_v39 = vadd.f32 %v1308_v21, %v1254_v34 }
 0x18f   : > { %v1497_v40 = vpack.c.bf16 %v1328_v38, %v1328_v38  ;;  %v1327_v41 = vadd.f32 %v1324_v37, %v1313_v39 }
 0x191   : > { %1339 = vst.msk [vmem:[%s244_s6] sm:$0xf] %vm1338_vm3, %v1497_v40  ;;  %v1329_v42 = vmax.f32 %v1327_v41, 0.0 }
 0x193   : > { %v1498_v43 = vpack.c.bf16 %v1329_v42, %v1329_v42 }
 0x195   : > { %1341 = vst.msk [vmem:[%s244_s6 + $0x4] sm:$0x3] %vm1340_vm4, %v1498_v43 }
 0x196 PF: > { %s15_s18 = sadd.s32 1, %s1690_s18  }
 0x197   : > { %p12_p4 = scmp.ge.s32.totalorder %s15_s18, 4  }
 0x199   :  { %14 = sbr.rel (!%p12_p4) target bundleno = 1 (0x1), region = 89 }

// kernel: rsu3_forward.11
= control target key start
LH: loop header
LB: loop body
LE: loop exit
PB: predicated region body
PF: predicated region fallthrough
CT: control target
= control target key end

     0   :  { %s2676_s21 = smov 0   ;;  %s3108_s0 = inlined_call_operand.vmem [shape: bf16[2,12,342], index: 0, kind: input, shape index: {}]   ;;  %s3109_s1 = inlined_call_operand.vmem [shape: bf16[2,12,342], index: 1, kind: input, shape index: {}]   ;;  %s3110_s2 = inlined_call_operand.vmem [shape: bf16[9,3,12], index: 2, kind: input, shape index: {}]   ;;  %s3111_s3 = inlined_call_operand.vmem [shape: bf16[9,3,12], index: 3, kind: input, shape index: {}]   ;;  %s3112_s4 = inlined_call_operand.vmem [shape: f32[3,1], index: 4, kind: input, shape index: {}]   ;;  %s3113_s5 = inlined_call_operand.vmem [shape: bf16[2,3,288], index: 5, kind: input, shape index: {}]   ;;  %s3114_s6 = inlined_call_operand.vmem [shape: bf16[2,3,288], index: 6, kind: output, shape index: {}]  }
   0x1 LB: > { %s2358_s22 = sadd.s32 4294967295, %s2627_s21   ;;  %p2362_p0 = scmp.ge.s32.totalorder %s2627_s21, 1  ;;  %s2627_s21 = sphi %s2676_s21, %s16_s21  }
   0x2   : > { %p232_p1 = scmp.lt.s32.totalorder %s2627_s21, 3 }
   0x4   : > { %p233_p2 = pnand %p2362_p0, %p232_p1 }
   0x5   : > { %p272_p3 = scmp.lt.s32.totalorder (!%p233_p2), %s2358_s22, 1  ;;  %s2632_s30 = smov (!%p233_p2), 127  }
   0x6   : > { %236 = sbr.rel (%p233_p2) target bundleno = 488 (0x1e8), region = 44  ;;  %s2633_s7 = smov (!%p233_p2), 126  }
   0x7   : > { %s2634_s8 = smov (!%p233_p2), 110   ;;  %s2635_s9 = smov (!%p233_p2), 109  }
   0x8   : > { %s2636_s10 = smov (!%p233_p2), 108   ;;  %s2637_s11 = smov (!%p233_p2), 92  }
   0x9   : > { %s2638_s12 = smov (!%p233_p2), 91   ;;  %s2639_s13 = smov (!%p233_p2), 90  }
   0xb   : > { %v2629_v0 = vmov 0.0   ;;  %vm2630_vm0 = vmmov 0   ;;  %s3120_s22 = smov (!%p272_p3, %s2358_s22), 1  ;;  %v2631_v1 = vmov 0   ;;  %vm326_vm1 = vcmask 1045504  }
   0xc   : > { %2482 = vmatprep.subr.bf16.mxu1 %v2629_v0  ;;  %2484 = vmatprep.mubr.msk.bf16.mxu1 %vm2630_vm0, %v2629_v0  ;;  %s2590_s23 = smul.u32 24, %s3120_s22  ;;  %v2367_v11 = vld [vmem:[%s3110_s2 + $0x2] sm:$0x3]  ;;  %vm322_vm2 = vcmask 97280   ;;  %vm319_vm3 = vcmask 1039360   ;;  %vm518_vm4 = vcmask 1031168  }
   0xd   : > { %368 = vmatprep.mubr.bf16.mxu0 %v2631_v1  ;;  %2612 = vset.pattern.permute.xlu0 %v2631_v1  ;;  %v293_v21 = vld [vmem:[%s3110_s2] sm:$0x3]  ;;  %vm625_vm5 = vcmask 900096   ;;  %v2377_v30 = vld [vmem:[%s3110_s2 + $0x4] sm:$0x3]  ;;  %vm732_vm6 = vcmask 891904  }
   0xe   : > { %s276_s26 = scalar_lea.vmem %s3108_s0, %s2590_s23  ;;  %s2698_s29 = scalar_lea.vmem %s3109_s1, %s2590_s23  ;;  %v2381_v38 = vld [vmem:[%s3110_s2 + $0x6] sm:$0x3]  ;;  %vm839_vm7 = vcmask 883712   ;;  %v2385_v46 = vld [vmem:[%s3110_s2 + $0x8] sm:$0x3]  ;;  %vm946_vm8 = vcmask 752640  }
   0xf   : > { %v2700_v2 = vld [vmem:[%s276_s26 + $0x8] ss:$12 sps:$4 sm:$0x3f]   ;;  %v2702_v3 = vld [vmem:[%s276_s26] ss:$12 sps:$4 sm:$0x3f]  }
  0x10   : > { %317 = vrot.lane.b32.xlu1 %v2700_v2, %s2632_s30  ;;  %313 = vrot.lane.b32.xlu0 %v2702_v3, %s2632_s30  ;;  %v2708_v4 = vld [vmem:[%s276_s26 + $0x4] ss:$12 sps:$4 sm:$0x3f]   ;;  %v2758_v6 = vld [vmem:[%s2698_s29] ss:$12 sps:$4 sm:$0x3f]  }
  0x11   : > { %v2753_v5 = vld [vmem:[%s2698_s29 + $0x4] ss:$12 sps:$4 sm:$0x3f]   ;;  %v2765_v7 = vld [vmem:[%s2698_s29 + $0x8] ss:$12 sps:$4 sm:$0x3f]  }
  0x12   : > { %v427_v12 = vsel %vm326_vm1, %v2700_v2, 0  ;;  %v421_v19 = vsel %vm326_vm1, %v2702_v3, 0  ;;  %v2389_v54 = vld [vmem:[%s3110_s2 + $0xa] sm:$0x3]  ;;  %vm1053_vm9 = vcmask 744448   ;;  %vm1160_vm10 = vcmask 736256  }
  0x13   : > { %v2393_v62 = vld [vmem:[%s3110_s2 + $0xc] sm:$0x3]  ;;  %vm2265_vm11 = vcmask 1041408   ;;  %vm2266_vm12 = vsmask.f32 1280  ;;  %vm2268_vm13 = vcmask 1043458  }
  0x14   : > { %512 = vrot.lane.b32.xlu1 %v2702_v3, %s2633_s7  ;;  %315 = vrot.lane.b32.xlu0 %v2708_v4, %s2632_s30  ;;  %vm2269_vm14 = vsmask.f32 3328  ;;  %vm3088_vm15 = vmand %vm2265_vm11, %vm2266_vm12 }
  0x18   : > { %516 = vrot.lane.b32.xlu1 %v2700_v2, %s2633_s7  ;;  %514 = vrot.lane.b32.xlu0 %v2708_v4, %s2633_s7 }
  0x1c   : > { %621 = vrot.lane.b32.xlu1 %v2708_v4, %s2634_s8  ;;  %619 = vrot.lane.b32.xlu0 %v2702_v3, %s2634_s8 }
  0x20   : > { %726 = vrot.lane.b32.xlu1 %v2702_v3, %s2635_s9  ;;  %623 = vrot.lane.b32.xlu0 %v2700_v2, %s2634_s8 }
  0x24   : > { %730 = vrot.lane.b32.xlu1 %v2700_v2, %s2635_s9  ;;  %728 = vrot.lane.b32.xlu0 %v2708_v4, %s2635_s9 }
  0x28   : > { %835 = vrot.lane.b32.xlu1 %v2708_v4, %s2636_s10  ;;  %833 = vrot.lane.b32.xlu0 %v2702_v3, %s2636_s10 }
  0x2c   : > { %940 = vrot.lane.b32.xlu1 %v2702_v3, %s2637_s11  ;;  %837 = vrot.lane.b32.xlu0 %v2700_v2, %s2636_s10 }
  0x30   : > { %944 = vrot.lane.b32.xlu1 %v2700_v2, %s2637_s11  ;;  %942 = vrot.lane.b32.xlu0 %v2708_v4, %s2637_s11 }
  0x34   : > { %1049 = vrot.lane.b32.xlu1 %v2708_v4, %s2638_s12  ;;  %1047 = vrot.lane.b32.xlu0 %v2702_v3, %s2638_s12 }
  0x38   : > { %1154 = vrot.lane.b32.xlu1 %v2702_v3, %s2639_s13  ;;  %1051 = vrot.lane.b32.xlu0 %v2700_v2, %s2638_s12 }
  0x3c   : > { %1158 = vrot.lane.b32.xlu1 %v2700_v2, %s2639_s13  ;;  %1156 = vrot.lane.b32.xlu0 %v2708_v4, %s2639_s13 }
  0x40   : > { %1377 = vrot.lane.b32.xlu1 %v2753_v5, %s2632_s30  ;;  %1375 = vrot.lane.b32.xlu0 %v2758_v6, %s2632_s30 }
  0x44   : > { %1481 = vrot.lane.b32.xlu1 %v2758_v6, %s2633_s7  ;;  %1379 = vrot.lane.b32.xlu0 %v2765_v7, %s2632_s30 }
  0x48   : > { %1485 = vrot.lane.b32.xlu1 %v2765_v7, %s2633_s7  ;;  %1483 = vrot.lane.b32.xlu0 %v2753_v5, %s2633_s7 }
  0x4c   : > { %1589 = vrot.lane.b32.xlu1 %v2753_v5, %s2634_s8  ;;  %1587 = vrot.lane.b32.xlu0 %v2758_v6, %s2634_s8 }
  0x50   : > { %1693 = vrot.lane.b32.xlu1 %v2758_v6, %s2635_s9  ;;  %1591 = vrot.lane.b32.xlu0 %v2765_v7, %s2634_s8  ;;  %s2591_s8 = smul.u32 6, %s3120_s22 }
  0x52   : > { %s291_s14 = scalar_lea.vmem %s3114_s6, %s2591_s8 }
  0x54   : > { %1697 = vrot.lane.b32.xlu1 %v2765_v7, %s2635_s9  ;;  %1695 = vrot.lane.b32.xlu0 %v2753_v5, %s2635_s9 }
  0x58   : > { %1801 = vrot.lane.b32.xlu1 %v2753_v5, %s2636_s10  ;;  %1799 = vrot.lane.b32.xlu0 %v2758_v6, %s2636_s10 }
  0x5c   : > { %1905 = vrot.lane.b32.xlu1 %v2758_v6, %s2637_s11  ;;  %1803 = vrot.lane.b32.xlu0 %v2765_v7, %s2636_s10 }
  0x60   : > { %1909 = vrot.lane.b32.xlu1 %v2765_v7, %s2637_s11  ;;  %1907 = vrot.lane.b32.xlu0 %v2753_v5, %s2637_s11  ;;  %s286_s11 = scalar_lea.vmem %s3113_s5, %s2591_s8 }
  0x64   : > { %2013 = vrot.lane.b32.xlu1 %v2753_v5, %s2638_s12  ;;  %2011 = vrot.lane.b32.xlu0 %v2758_v6, %s2638_s12 }
  0x68   : > { %2117 = vrot.lane.b32.xlu1 %v2758_v6, %s2639_s13  ;;  %2015 = vrot.lane.b32.xlu0 %v2765_v7, %s2638_s12 }
  0x6c   : > { %2121 = vrot.lane.b32.xlu1 %v2765_v7, %s2639_s13  ;;  %2119 = vrot.lane.b32.xlu0 %v2753_v5, %s2639_s13 }
  0x82   : > { %v318_v8 = vpop.permute.xlu1 %317  ;;  %v314_v9 = vpop.permute.xlu0 %313 }
  0x83   : > { %v334_v10 = vsel %vm326_vm1, %v318_v8, 0 }
  0x84   : > { %2483 = vmatpush3.bf16.msra.mxu1 %v334_v10  ;;  %v2397_v10 = vld [vmem:[%s3110_s2 + $0xe] sm:$0x3] }
  0x85   : > { %2488 = vmatprep.subr.bf16.mxu1 %v2629_v0 }
  0x86   : > { %v513_v13 = vpop.permute.xlu1 %512  ;;  %v316_v14 = vpop.permute.xlu0 %315 }
  0x87   : > { %2485 = vmatmul.mubr.msk.bf16.vlgmr.msra.gmra.mxu1 %vm322_vm2, %v2367_v11  ;;  %v321_v15 = vsel %vm319_vm3, %v316_v14, %v318_v8  ;;  %v320_v16 = vsel %vm319_vm3, %v314_v9, %v316_v14 }
  0x88   : > { %2489 = vmatpush3.bf16.msra.mxu1 %v427_v12  ;;  %2490 = vmatprep.mubr.msk.bf16.mxu1 %vm2630_vm0, %v2629_v0  ;;  %v328_v17 = vsel %vm326_vm1, %v320_v16, 0  ;;  %v2401_v16 = vld [vmem:[%s3110_s2 + $0x10] sm:$0x3] }
  0x89   : > { %2371 = vmatprep.subr.msk.bf16.mxu0 %vm326_vm1, %v321_v15  ;;  %2494 = vmatprep.subr.bf16.mxu1 %v2629_v0 }
  0x8a   : > { %351 = vmatpush1.bf16.msra.mxu0 %v328_v17  ;;  %v517_v18 = vpop.permute.xlu1 %516  ;;  %v515_v20 = vpop.permute.xlu0 %514  ;;  %v1287_v17 = vsel %vm326_vm1, %v2765_v7, 0 }
  0x8b   : > { %2374 = vmatprep.subr.msk.bf16.mxu0 %vm326_vm1, %v2708_v4  ;;  %v520_v22 = vsel %vm518_vm4, %v515_v20, %v517_v18  ;;  %v531_v23 = vsel %vm326_vm1, %v517_v18, 0  ;;  %v519_v26 = vsel %vm518_vm4, %v513_v13, %v515_v20  ;;  %v1281_v20 = vsel %vm326_vm1, %v2758_v6, 0 }
  0x8c   : > { %v525_v27 = vsel %vm326_vm1, %v519_v26, 0 }
  0x8d   : > { %2372 = vmatmul.mubr.msk.bf16.vlgmr.msra.gmra.mxu0 %vm322_vm2, %v2367_v11 }
  0x8e   : > { %444 = vmatpush1.bf16.msra.mxu0 %v421_v19  ;;  %461 = vmatprep.mubr.bf16.mxu0 %v2631_v1  ;;  %v622_v24 = vpop.permute.xlu1 %621  ;;  %v620_v25 = vpop.permute.xlu0 %619 }
  0x8f   : > { %2491 = vmatmul.mubr.msk.bf16.vlgmr.msra.gmra.mxu1 %vm322_vm2, %v293_v21  ;;  %2378 = vmatprep.subr.msk.bf16.mxu0 %vm326_vm1, %v520_v22  ;;  %v626_v34 = vsel %vm625_vm5, %v620_v25, %v622_v24 }
  0x90   : > { %2495 = vmatpush3.bf16.msra.mxu1 %v531_v23  ;;  %2496 = vmatprep.mubr.msk.bf16.mxu1 %vm2630_vm0, %v2629_v0  ;;  %v632_v36 = vsel %vm326_vm1, %v626_v34, 0 }
  0x91   : > { %2500 = vmatprep.subr.bf16.mxu1 %v2629_v0 }
  0x92   : > { %v624_v28 = vpop.permute.xlu0 %623  ;;  %v727_v29 = vpop.permute.xlu1 %726 }
  0x93   : > { %v627_v31 = vsel %vm625_vm5, %v622_v24, %v624_v28  ;;  %v638_v32 = vsel %vm326_vm1, %v624_v28, 0 }
  0x95   : > { %2375 = vmatmul.mubr.msk.bf16.vlgmr.msra.gmra.mxu0 %vm322_vm2, %v293_v21  ;;  %v1259_v21 = vld [vmem:[%s3111_s3] sm:$0x3] }
  0x96   : > { %548 = vmatpush1.bf16.msra.mxu0 %v525_v27  ;;  %565 = vmatprep.mubr.bf16.mxu0 %v2631_v1  ;;  %v729_v33 = vpop.permute.xlu0 %728  ;;  %v731_v35 = vpop.permute.xlu1 %730  ;;  %v2411_v27 = vld [vmem:[%s3111_s3 + $0x2] sm:$0x3] }
  0x97   : > { %2497 = vmatmul.mubr.msk.bf16.vlgmr.msra.gmra.mxu1 %vm322_vm2, %v2377_v30  ;;  %2382 = vmatprep.subr.msk.bf16.mxu0 %vm326_vm1, %v627_v31  ;;  %v734_v39 = vsel %vm732_vm6, %v729_v33, %v731_v35  ;;  %v745_v40 = vsel %vm326_vm1, %v731_v35, 0  ;;  %v733_v42 = vsel %vm732_vm6, %v727_v29, %v729_v33  ;;  %v2221_v31 = vld [vmem:[%s3112_s4] sm:$0x7] }
  0x98   : > { %2501 = vmatpush3.bf16.msra.mxu1 %v638_v32  ;;  %2502 = vmatprep.mubr.msk.bf16.mxu1 %vm2630_vm0, %v2629_v0  ;;  %v739_v44 = vsel %vm326_vm1, %v733_v42, 0 }
  0x99   : > { %2506 = vmatprep.subr.bf16.mxu1 %v2629_v0  ;;  %2224 = vperm.xlu0 %2612, %v2221_v31  }
  0x9a   : > { %v834_v37 = vpop.permute.xlu0 %833  ;;  %v836_v41 = vpop.permute.xlu1 %835 }
  0x9b   : > { %v840_v50 = vsel %vm839_vm7, %v834_v37, %v836_v41 }
  0x9c   : > { %v846_v52 = vsel %vm326_vm1, %v840_v50, 0 }
  0x9d   : > { %2379 = vmatmul.mubr.msk.bf16.vlgmr.msra.gmra.mxu0 %vm322_vm2, %v2377_v30 }
  0x9e   : > { %655 = vmatpush1.bf16.msra.mxu0 %v632_v36  ;;  %672 = vmatprep.mubr.bf16.mxu0 %v2631_v1  ;;  %v838_v43 = vpop.permute.xlu0 %837  ;;  %v941_v45 = vpop.permute.xlu1 %940  ;;  %v2415_v36 = vld [vmem:[%s3111_s3 + $0x4] sm:$0x3] }
  0x9f   : > { %2503 = vmatmul.mubr.msk.bf16.vlgmr.msra.gmra.mxu1 %vm322_vm2, %v2381_v38  ;;  %2386 = vmatprep.subr.msk.bf16.mxu0 %vm326_vm1, %v734_v39  ;;  %v841_v47 = vsel %vm839_vm7, %v836_v41, %v838_v43  ;;  %v852_v48 = vsel %vm326_vm1, %v838_v43, 0 }
  0xa0   : > { %2507 = vmatpush3.bf16.msra.mxu1 %v745_v40  ;;  %2508 = vmatprep.mubr.msk.bf16.mxu1 %vm2630_vm0, %v2629_v0 }
  0xa1   : > { %2512 = vmatprep.subr.bf16.mxu1 %v2629_v0 }
  0xa2   : > { %v943_v49 = vpop.permute.xlu0 %942  ;;  %v945_v51 = vpop.permute.xlu1 %944 }
  0xa3   : > { %v948_v55 = vsel %vm946_vm8, %v943_v49, %v945_v51  ;;  %v959_v56 = vsel %vm326_vm1, %v945_v51, 0  ;;  %v947_v58 = vsel %vm946_vm8, %v941_v45, %v943_v49 }
  0xa4   : > { %v953_v60 = vsel %vm326_vm1, %v947_v58, 0 }
  0xa5   : > { %2383 = vmatmul.mubr.msk.bf16.vlgmr.msra.gmra.mxu0 %vm322_vm2, %v2381_v38 }
  0xa6   : > { %762 = vmatpush1.bf16.msra.mxu0 %v739_v44  ;;  %779 = vmatprep.mubr.bf16.mxu0 %v2631_v1  ;;  %v1048_v53 = vpop.permute.xlu0 %1047  ;;  %v1050_v57 = vpop.permute.xlu1 %1049  ;;  %v2419_v44 = vld [vmem:[%s3111_s3 + $0x6] sm:$0x3] }
  0xa7   : > { %2509 = vmatmul.mubr.msk.bf16.vlgmr.msra.gmra.mxu1 %vm322_vm2, %v2385_v46  ;;  %2390 = vmatprep.subr.msk.bf16.mxu0 %vm326_vm1, %v841_v47  ;;  %v1054_v3 = vsel %vm1053_vm9, %v1048_v53, %v1050_v57 }
  0xa8   : > { %2513 = vmatpush3.bf16.msra.mxu1 %v852_v48  ;;  %2514 = vmatprep.mubr.msk.bf16.mxu1 %vm2630_vm0, %v2629_v0  ;;  %v1060_v9 = vsel %vm326_vm1, %v1054_v3, 0 }
  0xa9   : > { %2518 = vmatprep.subr.bf16.mxu1 %v2629_v0 }
  0xaa   : > { %v1052_v59 = vpop.permute.xlu0 %1051  ;;  %v1155_v61 = vpop.permute.xlu1 %1154 }
  0xab   : > { %v1055_v63 = vsel %vm1053_vm9, %v1050_v57, %v1052_v59  ;;  %v1066_v2 = vsel %vm326_vm1, %v1052_v59, 0 }
  0xad   : > { %2387 = vmatmul.mubr.msk.bf16.vlgmr.msra.gmra.mxu0 %vm322_vm2, %v2385_v46 }
  0xae   : > { %869 = vmatpush1.bf16.msra.mxu0 %v846_v52  ;;  %886 = vmatprep.mubr.bf16.mxu0 %v2631_v1  ;;  %v1157_v4 = vpop.permute.xlu0 %1156  ;;  %v1159_v8 = vpop.permute.xlu1 %1158  ;;  %v2423_v52 = vld [vmem:[%s3111_s3 + $0x8] sm:$0x3] }
  0xaf   : > { %2515 = vmatmul.mubr.msk.bf16.vlgmr.msra.gmra.mxu1 %vm322_vm2, %v2389_v54  ;;  %2394 = vmatprep.subr.msk.bf16.mxu0 %vm326_vm1, %v948_v55  ;;  %v1162_v11 = vsel %vm1160_vm10, %v1157_v4, %v1159_v8  ;;  %v1173_v12 = vsel %vm326_vm1, %v1159_v8, 0  ;;  %v1161_v13 = vsel %vm1160_vm10, %v1155_v61, %v1157_v4 }
  0xb0   : > { %2519 = vmatpush3.bf16.msra.mxu1 %v959_v56  ;;  %2520 = vmatprep.mubr.msk.bf16.mxu1 %vm2630_vm0, %v2629_v0  ;;  %v1167_v14 = vsel %vm326_vm1, %v1161_v13, 0 }
  0xb1   : > { %2524 = vmatprep.subr.bf16.mxu1 %v2629_v0 }
  0xb2   : > { %v1376_v15 = vpop.permute.xlu0 %1375  ;;  %v1378_v18 = vpop.permute.xlu1 %1377 }
  0xb3   : > { %v1381_v6 = vsel %vm319_vm3, %v1376_v15, %v1378_v18 }
  0xb4   : > { %v1387_v25 = vsel %vm326_vm1, %v1381_v6, 0 }
  0xb5   : > { %2391 = vmatmul.mubr.msk.bf16.vlgmr.msra.gmra.mxu0 %vm322_vm2, %v2389_v54 }
  0xb6   : > { %976 = vmatpush1.bf16.msra.mxu0 %v953_v60  ;;  %993 = vmatprep.mubr.bf16.mxu0 %v2631_v1  ;;  %v1380_v19 = vpop.permute.xlu0 %1379  ;;  %v1482_v7 = vpop.permute.xlu1 %1481  ;;  %v2427_v60 = vld [vmem:[%s3111_s3 + $0xa] sm:$0x3] }
  0xb7   : > { %2521 = vmatmul.mubr.msk.bf16.vlgmr.msra.gmra.mxu1 %vm322_vm2, %v2393_v62  ;;  %2398 = vmatprep.subr.msk.bf16.mxu0 %vm326_vm1, %v1055_v63  ;;  %v1382_v22 = vsel %vm319_vm3, %v1378_v18, %v1380_v19 }
  0xb8   : > { %2525 = vmatpush3.bf16.msra.mxu1 %v1066_v2  ;;  %2526 = vmatprep.mubr.msk.bf16.mxu1 %vm2630_vm0, %v2629_v0 }
  0xb9   : > { %2530 = vmatprep.subr.bf16.mxu1 %v2629_v0 }
  0xba   : > { %v1484_v23 = vpop.permute.xlu0 %1483  ;;  %v1486_v24 = vpop.permute.xlu1 %1485 }
  0xbb   : > { %v1488_v28 = vsel %vm518_vm4, %v1484_v23, %v1486_v24  ;;  %v1499_v29 = vsel %vm326_vm1, %v1486_v24, 0  ;;  %v1487_v32 = vsel %vm518_vm4, %v1482_v7, %v1484_v23  ;;  %v2439_v7 = vld [vmem:[%s3111_s3 + $0x10] sm:$0x3] }
  0xbc   : > { %v1493_v34 = vsel %vm326_vm1, %v1487_v32, 0 }
  0xbd   : > { %2395 = vmatmul.mubr.msk.bf16.vlgmr.msra.gmra.mxu0 %vm322_vm2, %v2393_v62 }
  0xbe   : > { %1083 = vmatpush1.bf16.msra.mxu0 %v1060_v9  ;;  %1100 = vmatprep.mubr.bf16.mxu0 %v2631_v1  ;;  %v1588_v26 = vpop.permute.xlu0 %1587  ;;  %v1590_v30 = vpop.permute.xlu1 %1589  ;;  %v2431_v9 = vld [vmem:[%s3111_s3 + $0xc] sm:$0x3] }
  0xbf   : > { %2527 = vmatmul.mubr.msk.bf16.vlgmr.msra.gmra.mxu1 %vm322_vm2, %v2397_v10  ;;  %2402 = vmatprep.subr.msk.bf16.mxu0 %vm326_vm1, %v1162_v11  ;;  %v1593_v40 = vsel %vm625_vm5, %v1588_v26, %v1590_v30 }
  0xc0   : > { %2531 = vmatpush3.bf16.msra.mxu1 %v1173_v12  ;;  %2532 = vmatprep.mubr.msk.bf16.mxu1 %vm2630_vm0, %v2629_v0  ;;  %v1599_v42 = vsel %vm326_vm1, %v1593_v40, 0 }
  0xc1   : > { %2536 = vmatprep.subr.bf16.mxu1 %v2629_v0 }
  0xc2   : > { %v1592_v33 = vpop.permute.xlu0 %1591  ;;  %v1694_v35 = vpop.permute.xlu1 %1693 }
  0xc3   : > { %v1594_v37 = vsel %vm625_vm5, %v1590_v30, %v1592_v33  ;;  %v1605_v38 = vsel %vm326_vm1, %v1592_v33, 0 }
  0xc5   : > { %2399 = vmatmul.mubr.msk.bf16.vlgmr.msra.gmra.mxu0 %vm322_vm2, %v2397_v10 }
  0xc6   : > { %1190 = vmatpush1.bf16.msra.mxu0 %v1167_v14  ;;  %1207 = vmatprep.mubr.bf16.mxu0 %v2631_v1  ;;  %v1696_v39 = vpop.permute.xlu0 %1695  ;;  %v1698_v41 = vpop.permute.xlu1 %1697 }
  0xc7   : > { %2533 = vmatmul.mubr.msk.bf16.vlgmr.msra.gmra.mxu1 %vm322_vm2, %v2401_v16  ;;  %2408 = vmatprep.subr.msk.bf16.mxu0 %vm326_vm1, %v2753_v5  ;;  %v1393_v5 = vsel %vm326_vm1, %v1380_v19, 0  ;;  %v1700_v45 = vsel %vm732_vm6, %v1696_v39, %v1698_v41  ;;  %v1711_v46 = vsel %vm326_vm1, %v1698_v41, 0  ;;  %v1699_v48 = vsel %vm732_vm6, %v1694_v35, %v1696_v39 }
  0xc8   : > { %2537 = vmatpush3.bf16.msra.mxu1 %v1287_v17  ;;  %2538 = vmatprep.mubr.msk.bf16.mxu1 %vm2630_vm0, %v2629_v0  ;;  %v1705_v50 = vsel %vm326_vm1, %v1699_v48, 0 }
  0xc9   : > { %2542 = vmatprep.subr.bf16.mxu1 %v2629_v0 }
  0xca   : > { %v1800_v43 = vpop.permute.xlu0 %1799  ;;  %v1802_v47 = vpop.permute.xlu1 %1801 }
  0xcb   : > { %v1805_v56 = vsel %vm839_vm7, %v1800_v43, %v1802_v47 }
  0xcc   : > { %v1811_v58 = vsel %vm326_vm1, %v1805_v56, 0 }
  0xcd   : > { %2403 = vmatmul.mubr.msk.bf16.vlgmr.msra.gmra.mxu0 %vm322_vm2, %v2401_v16  ;;  %v2435_v16 = vld [vmem:[%s3111_s3 + $0xe] sm:$0x3] }
  0xce   : > { %1304 = vmatpush1.bf16.msra.mxu0 %v1281_v20  ;;  %1321 = vmatprep.mubr.bf16.mxu0 %v2631_v1  ;;  %v1804_v49 = vpop.permute.xlu0 %1803  ;;  %v1906_v51 = vpop.permute.xlu1 %1905 }
  0xcf   : > { %2539 = vmatmul.mubr.msk.bf16.vlgmr.msra.gmra.mxu1 %vm322_vm2, %v1259_v21  ;;  %2412 = vmatprep.subr.msk.bf16.mxu0 %vm326_vm1, %v1382_v22  ;;  %v1806_v53 = vsel %vm839_vm7, %v1802_v47, %v1804_v49  ;;  %v1817_v54 = vsel %vm326_vm1, %v1804_v49, 0 }
  0xd0   : > { %2543 = vmatpush3.bf16.msra.mxu1 %v1393_v5  ;;  %2544 = vmatprep.mubr.msk.bf16.mxu1 %vm2630_vm0, %v2629_v0 }
  0xd1   : > { %2548 = vmatprep.subr.bf16.mxu1 %v2629_v0 }
  0xd2   : > { %v1908_v55 = vpop.permute.xlu0 %1907  ;;  %v1910_v57 = vpop.permute.xlu1 %1909 }
  0xd3   : > { %v1912_v61 = vsel %vm946_vm8, %v1908_v55, %v1910_v57  ;;  %v1923_v62 = vsel %vm326_vm1, %v1910_v57, 0  ;;  %v1911_v2 = vsel %vm946_vm8, %v1906_v51, %v1908_v55 }
  0xd4   : > { %v1917_v4 = vsel %vm326_vm1, %v1911_v2, 0 }
  0xd5   : > { %2409 = vmatmul.mubr.msk.bf16.vlgmr.msra.gmra.mxu0 %vm322_vm2, %v1259_v21 }
  0xd6   : > { %1410 = vmatpush1.bf16.msra.mxu0 %v1387_v25  ;;  %1427 = vmatprep.mubr.bf16.mxu0 %v2631_v1  ;;  %v2012_v59 = vpop.permute.xlu0 %2011  ;;  %v2014_v63 = vpop.permute.xlu1 %2013 }
  0xd7   : > { %2545 = vmatmul.mubr.msk.bf16.vlgmr.msra.gmra.mxu1 %vm322_vm2, %v2411_v27  ;;  %2416 = vmatprep.subr.msk.bf16.mxu0 %vm326_vm1, %v1488_v28  ;;  %v2017_v12 = vsel %vm1053_vm9, %v2012_v59, %v2014_v63 }
  0xd8   : > { %2549 = vmatpush3.bf16.msra.mxu1 %v1499_v29  ;;  %2550 = vmatprep.mubr.msk.bf16.mxu1 %vm2630_vm0, %v2629_v0  ;;  %v2023_v15 = vsel %vm326_vm1, %v2017_v12, 0 }
  0xd9   : > { %2554 = vmatprep.subr.bf16.mxu1 %v2629_v0 }
  0xda   : > { %v2016_v3 = vpop.permute.xlu0 %2015  ;;  %v2118_v8 = vpop.permute.xlu1 %2117 }
  0xdb   : > { %v2018_v10 = vsel %vm1053_vm9, %v2014_v63, %v2016_v3  ;;  %v2029_v11 = vsel %vm326_vm1, %v2016_v3, 0 }
  0xdd   : > { %2413 = vmatmul.mubr.msk.bf16.vlgmr.msra.gmra.mxu0 %vm322_vm2, %v2411_v27 }
  0xde   : > { %1516 = vmatpush1.bf16.msra.mxu0 %v1493_v34  ;;  %1533 = vmatprep.mubr.bf16.mxu0 %v2631_v1  ;;  %v2120_v13 = vpop.permute.xlu0 %2119  ;;  %v2122_v14 = vpop.permute.xlu1 %2121 }
  0xdf   : > { %2551 = vmatmul.mubr.msk.bf16.vlgmr.msra.gmra.mxu1 %vm322_vm2, %v2415_v36  ;;  %2420 = vmatprep.subr.msk.bf16.mxu0 %vm326_vm1, %v1594_v37  ;;  %v2124_v17 = vsel %vm1160_vm10, %v2120_v13, %v2122_v14  ;;  %v2135_v18 = vsel %vm326_vm1, %v2122_v14, 0  ;;  %v2123_v19 = vsel %vm1160_vm10, %v2118_v8, %v2120_v13 }
  0xe0   : > { %2555 = vmatpush3.bf16.msra.mxu1 %v1605_v38  ;;  %2556 = vmatprep.mubr.msk.bf16.mxu1 %vm2630_vm0, %v2629_v0  ;;  %v2129_v20 = vsel %vm326_vm1, %v2123_v19, 0 }
  0xe1   : > { %2560 = vmatprep.subr.bf16.mxu1 %v2629_v0 }
  0xe5   : > { %2417 = vmatmul.mubr.msk.bf16.vlgmr.msra.gmra.mxu0 %vm322_vm2, %v2415_v36 }
  0xe6   : > { %1622 = vmatpush1.bf16.msra.mxu0 %v1599_v42  ;;  %1639 = vmatprep.mubr.bf16.mxu0 %v2631_v1 }
  0xe7   : > { %2557 = vmatmul.mubr.msk.bf16.vlgmr.msra.gmra.mxu1 %vm322_vm2, %v2419_v44  ;;  %2424 = vmatprep.subr.msk.bf16.mxu0 %vm326_vm1, %v1700_v45 }
  0xe8   : > { %2561 = vmatpush3.bf16.msra.mxu1 %v1711_v46  ;;  %2562 = vmatprep.mubr.msk.bf16.mxu1 %vm2630_vm0, %v2629_v0 }
  0xe9   : > { %2566 = vmatprep.subr.bf16.mxu1 %v2629_v0 }
  0xed   : > { %2421 = vmatmul.mubr.msk.bf16.vlgmr.msra.gmra.mxu0 %vm322_vm2, %v2419_v44 }
  0xee   : > { %1728 = vmatpush1.bf16.msra.mxu0 %v1705_v50  ;;  %1745 = vmatprep.mubr.bf16.mxu0 %v2631_v1 }
  0xef   : > { %2563 = vmatmul.mubr.msk.bf16.vlgmr.msra.gmra.mxu1 %vm322_vm2, %v2423_v52  ;;  %2428 = vmatprep.subr.msk.bf16.mxu0 %vm326_vm1, %v1806_v53 }
  0xf0   : > { %2567 = vmatpush3.bf16.msra.mxu1 %v1817_v54  ;;  %2568 = vmatprep.mubr.msk.bf16.mxu1 %vm2630_vm0, %v2629_v0 }
  0xf1   : > { %2572 = vmatprep.subr.bf16.mxu1 %v2629_v0 }
  0xf5   : > { %2425 = vmatmul.mubr.msk.bf16.vlgmr.msra.gmra.mxu0 %vm322_vm2, %v2423_v52 }
  0xf6   : > { %1834 = vmatpush1.bf16.msra.mxu0 %v1811_v58  ;;  %1851 = vmatprep.mubr.bf16.mxu0 %v2631_v1 }
  0xf7   : > { %2569 = vmatmul.mubr.msk.bf16.vlgmr.msra.gmra.mxu1 %vm322_vm2, %v2427_v60  ;;  %2432 = vmatprep.subr.msk.bf16.mxu0 %vm326_vm1, %v1912_v61 }
  0xf8   : > { %2573 = vmatpush3.bf16.msra.mxu1 %v1923_v62  ;;  %2574 = vmatprep.mubr.msk.bf16.mxu1 %vm2630_vm0, %v2629_v0 }
  0xf9   : > { %2578 = vmatprep.subr.bf16.mxu1 %v2629_v0 }
  0xfd   : > { %2429 = vmatmul.mubr.msk.bf16.vlgmr.msra.gmra.mxu0 %vm322_vm2, %v2427_v60 }
  0xfe   : > { %1940 = vmatpush1.bf16.msra.mxu0 %v1917_v4  ;;  %1957 = vmatprep.mubr.bf16.mxu0 %v2631_v1 }
  0xff   : > { %2575 = vmatmul.mubr.msk.bf16.vlgmr.msra.gmra.mxu1 %vm322_vm2, %v2431_v9  ;;  %2436 = vmatprep.subr.msk.bf16.mxu0 %vm326_vm1, %v2018_v10 }
 0x100   : > { %2579 = vmatpush3.bf16.msra.mxu1 %v2029_v11  ;;  %2580 = vmatprep.mubr.msk.bf16.mxu1 %vm2630_vm0, %v2629_v0 }
 0x101   : > { %2584 = vmatprep.subr.bf16.mxu1 %v2629_v0 }
 0x105   : > { %2433 = vmatmul.mubr.msk.bf16.vlgmr.msra.gmra.mxu0 %vm322_vm2, %v2431_v9 }
 0x106   : > { %2046 = vmatpush1.bf16.msra.mxu0 %v2023_v15  ;;  %2063 = vmatprep.mubr.bf16.mxu0 %v2631_v1 }
 0x107   : > { %2581 = vmatmul.mubr.msk.bf16.vlgmr.msra.gmra.mxu1 %vm322_vm2, %v2435_v16  ;;  %2440 = vmatprep.subr.msk.bf16.mxu0 %vm326_vm1, %v2124_v17  ;;  %vm2272_vm1 = vcmask 259076  }
 0x108   : > { %2585 = vmatpush3.bf16.msra.mxu1 %v2135_v18  ;;  %2586 = vmatprep.mubr.msk.bf16.mxu1 %vm2630_vm0, %v2629_v0  ;;  %vm3092_vm0 = vmand %vm2268_vm13, %vm2269_vm14 }
 0x109   : > { %vm2271_vm3 = vmor %vm3092_vm0, %vm3088_vm15 }
 0x10d   : > { %2437 = vmatmul.mubr.msk.bf16.vlgmr.msra.gmra.mxu0 %vm322_vm2, %v2435_v16 }
 0x10e   : > { %2152 = vmatpush1.bf16.msra.mxu0 %v2129_v20  ;;  %2169 = vmatprep.mubr.bf16.mxu0 %v2631_v1 }
 0x10f   : > { %2587 = vmatmul.mubr.msk.bf16.vlgmr.msra.gmra.mxu1 %vm322_vm2, %v2439_v7 }
 0x115   : > { %2441 = vmatmul.mubr.msk.bf16.vlgmr.msra.gmra.mxu0 %vm322_vm2, %v2439_v7  ;;  %vm2273_vm2 = vsmask.f32 5376 }
 0x116   : > { %vm2274_vm4 = vmand %vm2272_vm1, %vm2273_vm2 }
 0x117   : > { %vm2275_vm5 = vmor %vm2274_vm4, %vm2271_vm3 }
 0x147   : > { %v411_v21 = vpop.f32.mrf.mxu1 }
 0x149   : > { %v2486_v22 = vpop.f32.mrf.mxu1 }
 0x14b   : > { %v414_v5 = vpop.f32.mrf.mxu1 }
 0x14d   : > { %v370_v23 = vpop.f32.mrf.mxu0  ;;  %v2487_v0 = vpop.f32.mrf.mxu1 }
 0x14f   : > { %v372_v6 = vpop.f32.mrf.mxu0  ;;  %v504_v24 = vpop.f32.mrf.mxu1 }
 0x150   : > { %v505_v25 = vadd.f32 %v504_v24, %v411_v21 }
 0x151   : > { %v374_v26 = vpop.f32.mrf.mxu0  ;;  %v2492_v27 = vpop.f32.mrf.mxu1 }
 0x153   : > { %v375_v28 = vpop.f32.mrf.mxu0  ;;  %v507_v29 = vpop.f32.mrf.mxu1 }
 0x155   : > { %v463_v30 = vpop.f32.mrf.mxu0  ;;  %v2493_v31 = vpop.f32.mrf.mxu1 }
 0x156   : > { %v464_v32 = vadd.f32 %v463_v30, %v370_v23 }
 0x157   : > { %v465_v1 = vpop.f32.mrf.mxu0  ;;  %v608_v33 = vpop.f32.mrf.mxu1 }
 0x158   : > { %v466_v34 = vadd.f32 %v465_v1, %v372_v6  ;;  %v616_v35 = vadd.f32 %v608_v33, %v505_v25 }
 0x159   : > { %v467_v36 = vpop.f32.mrf.mxu0  ;;  %v2498_v37 = vpop.f32.mrf.mxu1 }
 0x15b   : > { %v468_v38 = vpop.f32.mrf.mxu0  ;;  %v611_v39 = vpop.f32.mrf.mxu1 }
 0x15d   : > { %v567_v40 = vpop.f32.mrf.mxu0  ;;  %v2499_v41 = vpop.f32.mrf.mxu1 }
 0x15e   : > { %v614_v42 = vadd.f32 %v567_v40, %v464_v32 }
 0x15f   : > { %v569_v43 = vpop.f32.mrf.mxu0  ;;  %v715_v44 = vpop.f32.mrf.mxu1 }
 0x160   : > { %v615_v45 = vadd.f32 %v569_v43, %v466_v34  ;;  %v723_v46 = vadd.f32 %v715_v44, %v616_v35 }
 0x161   : > { %v571_v47 = vpop.f32.mrf.mxu0  ;;  %v2504_v48 = vpop.f32.mrf.mxu1 }
 0x163   : > { %v572_v49 = vpop.f32.mrf.mxu0  ;;  %v718_v50 = vpop.f32.mrf.mxu1 }
 0x165   : > { %v674_v51 = vpop.f32.mrf.mxu0  ;;  %v2505_v52 = vpop.f32.mrf.mxu1 }
 0x166   : > { %v721_v53 = vadd.f32 %v674_v51, %v614_v42 }
 0x167   : > { %v676_v54 = vpop.f32.mrf.mxu0  ;;  %v822_v55 = vpop.f32.mrf.mxu1 }
 0x168   : > { %v722_v56 = vadd.f32 %v676_v54, %v615_v45  ;;  %v830_v57 = vadd.f32 %v822_v55, %v723_v46 }
 0x169   : > { %v678_v58 = vpop.f32.mrf.mxu0  ;;  %v2510_v59 = vpop.f32.mrf.mxu1 }
 0x16b   : > { %v679_v60 = vpop.f32.mrf.mxu0  ;;  %v825_v61 = vpop.f32.mrf.mxu1 }
 0x16d   : > { %v781_v62 = vpop.f32.mrf.mxu0  ;;  %v2511_v63 = vpop.f32.mrf.mxu1 }
 0x16e   : > { %v828_v2 = vadd.f32 %v781_v62, %v721_v53 }
 0x16f   : > { %v783_v3 = vpop.f32.mrf.mxu0  ;;  %v929_v4 = vpop.f32.mrf.mxu1 }
 0x170   : > { %v829_v8 = vadd.f32 %v783_v3, %v722_v56  ;;  %v937_v9 = vadd.f32 %v929_v4, %v830_v57 }
 0x171   : > { %v785_v10 = vpop.f32.mrf.mxu0  ;;  %v2516_v11 = vpop.f32.mrf.mxu1 }
 0x173   : > { %v786_v12 = vpop.f32.mrf.mxu0  ;;  %v932_v13 = vpop.f32.mrf.mxu1 }
 0x175   : > { %v888_v14 = vpop.f32.mrf.mxu0  ;;  %v2517_v15 = vpop.f32.mrf.mxu1 }
 0x176   : > { %v935_v16 = vadd.f32 %v888_v14, %v828_v2 }
 0x177   : > { %v890_v17 = vpop.f32.mrf.mxu0  ;;  %v1036_v18 = vpop.f32.mrf.mxu1 }
 0x178   : > { %v936_v19 = vadd.f32 %v890_v17, %v829_v8  ;;  %v1044_v20 = vadd.f32 %v1036_v18, %v937_v9 }
 0x179   : > { %v892_v7 = vpop.f32.mrf.mxu0  ;;  %v2522_v21 = vpop.f32.mrf.mxu1 }
 0x17b   : > { %v893_v22 = vpop.f32.mrf.mxu0  ;;  %v1039_v5 = vpop.f32.mrf.mxu1 }
 0x17d   : > { %v995_v23 = vpop.f32.mrf.mxu0  ;;  %v2523_v0 = vpop.f32.mrf.mxu1 }
 0x17e   : > { %v3064_v6 = vadd.f32 %v995_v23, %v935_v16 }
 0x17f   : > { %v997_v24 = vpop.f32.mrf.mxu0  ;;  %v1143_v25 = vpop.f32.mrf.mxu1 }
 0x180   : > { %v3066_v26 = vadd.f32 %v997_v24, %v936_v19  ;;  %v3068_v27 = vadd.f32 %v1143_v25, %v1044_v20 }
 0x181   : > { %v999_v28 = vpop.f32.mrf.mxu0  ;;  %v2528_v29 = vpop.f32.mrf.mxu1 }
 0x183   : > { %v1000_v30 = vpop.f32.mrf.mxu0  ;;  %v1146_v31 = vpop.f32.mrf.mxu1 }
 0x185   : > { %v3070_v32 = vpop.f32.mrf.mxu0  ;;  %v2529_v1 = vpop.f32.mrf.mxu1 }
 0x187   : > { %v3072_v33 = vpop.f32.mrf.mxu0  ;;  %v1250_v34 = vpop.f32.mrf.mxu1 }
 0x188   : > { %v1258_v29 = vadd.f32 %v1250_v34, %v3068_v27 }
 0x189   : > { %v1106_v35 = vpop.f32.mrf.mxu0  ;;  %v2534_v36 = vpop.f32.mrf.mxu1 }
 0x18b   : > { %v1107_v37 = vpop.f32.mrf.mxu0  ;;  %v1253_v38 = vpop.f32.mrf.mxu1 }
 0x18c   : > { %v1149_v37 = vadd.f32 %v3070_v32, %v3064_v6 }
 0x18d   : > { %v1209_v39 = vpop.f32.mrf.mxu0  ;;  %v2535_v40 = vpop.f32.mrf.mxu1 }
 0x18f   : > { %v3074_v41 = vpop.f32.mrf.mxu0  ;;  %v1364_v42 = vpop.f32.mrf.mxu1 }
 0x190   : > { %v1372_v1 = vadd.f32 %v1364_v42, %v1258_v29 }
 0x191   : > { %v1213_v43 = vpop.f32.mrf.mxu0  ;;  %v2540_v44 = vpop.f32.mrf.mxu1 }
 0x192   : > { %v1150_v44 = vadd.f32 %v3072_v33, %v3066_v26 }
 0x193   : > { %v1214_v45 = vpop.f32.mrf.mxu0  ;;  %v1367_v46 = vpop.f32.mrf.mxu1 }
 0x194   : > { %v1256_v45 = vadd.f32 %v1209_v39, %v1149_v37  ;;  %v1257_v27 = vadd.f32 %v3074_v41, %v1150_v44 }
 0x195   : > { %v1323_v47 = vpop.f32.mrf.mxu0  ;;  %v2541_v48 = vpop.f32.mrf.mxu1 }
 0x196   : > { %v1370_v34 = vadd.f32 %v1323_v47, %v1256_v45 }
 0x197   : > { %v1325_v49 = vpop.f32.mrf.mxu0  ;;  %v1470_v50 = vpop.f32.mrf.mxu1 }
 0x198   : > { %v1478_v38 = vadd.f32 %v1470_v50, %v1372_v1 }
 0x199   : > { %v1327_v51 = vpop.f32.mrf.mxu0  ;;  %v2546_v52 = vpop.f32.mrf.mxu1 }
 0x19b   : > { %v1328_v53 = vpop.f32.mrf.mxu0  ;;  %v1473_v54 = vpop.f32.mrf.mxu1 }
 0x19c   : > { %v1371_v54 = vadd.f32 %v1325_v49, %v1257_v27  ;;  %v2225_v49 = vpop.permute.xlu0 %2224 }
 0x19d   : > { %v1429_v55 = vpop.f32.mrf.mxu0  ;;  %v2547_v56 = vpop.f32.mrf.mxu1 }
 0x19e   : > { %v1476_v56 = vadd.f32 %v1429_v55, %v1370_v34 }
 0x19f   : > { %v1431_v57 = vpop.f32.mrf.mxu0  ;;  %v1576_v58 = vpop.f32.mrf.mxu1 }
 0x1a0   : > { %v1584_v46 = vadd.f32 %v1576_v58, %v1478_v38 }
 0x1a1   : > { %v1433_v59 = vpop.f32.mrf.mxu0  ;;  %v2552_v60 = vpop.f32.mrf.mxu1 }
 0x1a2   : > { %v1477_v59 = vadd.f32 %v1431_v57, %v1371_v54 }
 0x1a3   : > { %v1434_v61 = vpop.f32.mrf.mxu0  ;;  %v1579_v62 = vpop.f32.mrf.mxu1 }
 0x1a5   : > { %v1535_v63 = vpop.f32.mrf.mxu0  ;;  %v2553_v2 = vpop.f32.mrf.mxu1 }
 0x1a6   : > { %v1582_v60 = vadd.f32 %v1535_v63, %v1476_v56  ;;  %v2276_v56 = vld [vmem:[%s291_s14] sm:$0x3f] }
 0x1a7   : > { %v1537_v3 = vpop.f32.mrf.mxu0  ;;  %v1682_v4 = vpop.f32.mrf.mxu1 }
 0x1a8   : > { %v1690_v42 = vadd.f32 %v1682_v4, %v1584_v46  ;;  %v1583_v58 = vadd.f32 %v1537_v3, %v1477_v59 }
 0x1a9   : > { %v1539_v8 = vpop.f32.mrf.mxu0  ;;  %v2558_v9 = vpop.f32.mrf.mxu1 }
 0x1ab   : > { %v1540_v10 = vpop.f32.mrf.mxu0  ;;  %v1685_v11 = vpop.f32.mrf.mxu1 }
 0x1ad   : > { %v1641_v12 = vpop.f32.mrf.mxu0  ;;  %v2559_v13 = vpop.f32.mrf.mxu1 }
 0x1ae   : > { %v1688_v61 = vadd.f32 %v1641_v12, %v1582_v60 }
 0x1af   : > { %v1643_v14 = vpop.f32.mrf.mxu0  ;;  %v1788_v15 = vpop.f32.mrf.mxu1 }
 0x1b0   : > { %v1796_v6 = vadd.f32 %v1788_v15, %v1690_v42  ;;  %v1689_v2 = vadd.f32 %v1643_v14, %v1583_v58  ;;  %v2233_v15 = vld [vmem:[%s286_s11] sm:$0x3f] }
 0x1b1   : > { %v1645_v16 = vpop.f32.mrf.mxu0  ;;  %v2564_v17 = vpop.f32.mrf.mxu1 }
 0x1b3   : > { %v1646_v18 = vpop.f32.mrf.mxu0  ;;  %v1791_v19 = vpop.f32.mrf.mxu1 }
 0x1b5   : > { %v1747_v20 = vpop.f32.mrf.mxu0  ;;  %v2565_v7 = vpop.f32.mrf.mxu1 }
 0x1b6   : > { %v1794_v4 = vadd.f32 %v1747_v20, %v1688_v61  ;;  %v2235_v20 = vunpack.c.h.bf16 %v2233_v15  ;;  %v2640_v7 = vmov 1983009808  }
 0x1b7   : > { %v1749_v21 = vpop.f32.mrf.mxu0  ;;  %v1894_v22 = vpop.f32.mrf.mxu1 }
 0x1b8   : > { %v1902_v26 = vadd.f32 %v1894_v22, %v1796_v6  ;;  %v1795_v57 = vadd.f32 %v1749_v21, %v1689_v2  ;;  %v2250_v22 = vunpack.c.l.s4 %v2640_v7 }
 0x1b9   : > { %v1751_v5 = vpop.f32.mrf.mxu0  ;;  %v2570_v23 = vpop.f32.mrf.mxu1 }
 0x1ba   : > { %v2252_v5 = vlaneseq  ;;  %v2251_v1 = vunpack.c.0.s8 %v2250_v22 }
 0x1bb   : > { %v1752_v0 = vpop.f32.mrf.mxu0  ;;  %v1897_v24 = vpop.f32.mrf.mxu1 }
 0x1bd   : > { %v1853_v25 = vpop.f32.mrf.mxu0  ;;  %v2571_v28 = vpop.f32.mrf.mxu1 }
 0x1be   : > { %v1900_v63 = vadd.f32 %v1853_v25, %v1794_v4  ;;  %v2234_v28 = vunpack.c.l.bf16 %v2233_v15 }
 0x1bf   : > { %v1855_v30 = vpop.f32.mrf.mxu0  ;;  %v2000_v31 = vpop.f32.mrf.mxu1 }
 0x1c0   : > { %v2008_v62 = vadd.f32 %v2000_v31, %v1902_v26  ;;  %v1901_v12 = vadd.f32 %v1855_v30, %v1795_v57 }
 0x1c1   : > { %v1857_v35 = vpop.f32.mrf.mxu0  ;;  %v2576_v36 = vpop.f32.mrf.mxu1 }
 0x1c2   : > { %v2253_v35 = vshrl.u32 %v2252_v5, 7 }
 0x1c3   : > { %v1858_v40 = vpop.f32.mrf.mxu0  ;;  %v2003_v43 = vpop.f32.mrf.mxu1 }
 0x1c4   : > { %v2237_v43 = vcombine.high %v2234_v28, %v2234_v28 }
 0x1c5   : > { %v1959_v48 = vpop.f32.mrf.mxu0  ;;  %v2577_v51 = vpop.f32.mrf.mxu1 }
 0x1c6   : > { %v2006_v13 = vadd.f32 %v1959_v48, %v1900_v63  ;;  %v2254_v51 = vsub.s32 %v2251_v1, %v2253_v35 }
 0x1c7   : > { %v1961_v52 = vpop.f32.mrf.mxu0  ;;  %v2106_v53 = vpop.f32.mrf.mxu1 }
 0x1c8   : > { %v2114_v8 = vadd.f32 %v2106_v53, %v2008_v62  ;;  %v2007_v18 = vadd.f32 %v1961_v52, %v1901_v12 }
 0x1c9   : > { %v1963_v32 = vpop.f32.mrf.mxu0  ;;  %v2582_v50 = vpop.f32.mrf.mxu1 }
 0x1cb   : > { %v1964_v33 = vpop.f32.mrf.mxu0  ;;  %v2109_v39 = vpop.f32.mrf.mxu1 }
 0x1cd   : > { %v2065_v41 = vpop.f32.mrf.mxu0  ;;  %v2583_v47 = vpop.f32.mrf.mxu1 }
 0x1ce   : > { %v2112_v19 = vadd.f32 %v2065_v41, %v2006_v13 }
 0x1cf   : > { %v2067_v55 = vpop.f32.mrf.mxu0  ;;  %v2212_v9 = vpop.f32.mrf.mxu1 }
 0x1d0   : > { %v2220_v10 = vadd.f32 %v2212_v9, %v2114_v8  ;;  %v2113_v24 = vadd.f32 %v2067_v55, %v2007_v18 }
 0x1d1   : > { %v2069_v11 = vpop.f32.mrf.mxu0  ;;  %v2588_v3 = vpop.f32.mrf.mxu1 }
 0x1d2   : > { %v2229_v16 = vadd.f32 %v2225_v49, %v2220_v10 }
 0x1d3   : > { %v2070_v14 = vpop.f32.mrf.mxu0  ;;  %v2215_v17 = vpop.f32.mrf.mxu1 }
 0x1d4   : > { %v2232_v21 = vmax.f32 %v2229_v16, 0.0 }
 0x1d5   : > { %v2171_v23 = vpop.f32.mrf.mxu0  ;;  %v2589_v0 = vpop.f32.mrf.mxu1 }
 0x1d6   : > { %v2218_v25 = vadd.f32 %v2171_v23, %v2112_v19  ;;  %v2241_v37 = vadd.f32 %v2235_v20, %v2232_v21 }
 0x1d7   : > { %v2173_v29 = vpop.f32.mrf.mxu0 }
 0x1d8   : > { %v2227_v31 = vadd.f32 %v2225_v49, %v2218_v25  ;;  %v2219_v30 = vadd.f32 %v2173_v29, %v2113_v24  ;;  %v2244_v27 = vpack.c.bf16 %v2241_v37, %v2241_v37 }
 0x1d9   : > { %v2175_v36 = vpop.f32.mrf.mxu0 }
 0x1da   : > { %v2230_v38 = vmax.f32 %v2227_v31, 0.0  ;;  %v2228_v40 = vadd.f32 %v2225_v49, %v2219_v30  ;;  %v2262_v53 = vrot.slane %v2244_v27, %v2254_v51 }
 0x1db   : > { %v2176_v45 = vpop.f32.mrf.mxu0 }
 0x1dc   : > { %v2231_v46 = vmax.f32 %v2228_v40, 0.0  ;;  %v2239_v34 = vadd.f32 %v2234_v28, %v2230_v38 }
 0x1de   : > { %v2240_v42 = vadd.f32 %v2237_v43, %v2231_v46 }
 0x1e0   : > { %v2443_v52 = vpack.c.bf16 %v2240_v42, %v2239_v34 }
 0x1e2   : > { %v2255_v54 = vrot.slane %v2443_v52, %v2254_v51 }
 0x1e4   : > { %v2263_v6 = vcombine.low %v2255_v54, %v2262_v53 }
 0x1e6   : > { %v2277_v32 = vsel %vm2275_vm5, %v2263_v6, %v2276_v56 }
 0x1e7   : > { %2278 = vst [vmem:[%s291_s14] sm:$0x3f] %v2277_v32 }
 0x1e8 PF: > { %s16_s21 = sadd.s32 1, %s2627_s21  }
 0x1e9   : > { %p13_p4 = scmp.ge.s32.totalorder %s16_s21, 4  }
 0x1eb   :  { %15 = sbr.rel (!%p13_p4) target bundleno = 1 (0x1), region = 96 }

</bundles_post_ra>
